<compile_context>
chip_gen: v5e
topology: v5e:2x2
jax: 0.10.0
libtpu: 0.0.40
codegen_flags: <defaults>
</compile_context>

<pallas_src>
import math
from functools import partial

import jax
import jax.numpy as jnp
from jax.experimental import pallas as pl
from jax.experimental.pallas import tpu as pltpu

# ----------------- small synthetic LlamaConfig -----------------
VOCAB = 256
HIDDEN = 256
N_HEADS = 2
HEAD_DIM = HIDDEN // N_HEADS          # 128 -> lane-aligned heads
INTERMEDIATE = 512
N_LAYERS = 2
RMS_EPS = 1e-6
ROPE_THETA = 10000.0

COMPUTE_DTYPE = jnp.bfloat16          # MXU operand dtype (f32 accumulation)


# ----------------- in-kernel helpers -----------------
def _rms_norm(x_f32, w, eps):
    # matches LlamaRMSNorm: stats in float32, then scale by weight
    var = jnp.mean(x_f32 * x_f32, axis=-1, keepdims=True)
    return x_f32 * jax.lax.rsqrt(var + eps) * w


# ----------------- fused full-model kernel -----------------
def fused_llama_kernel(pad_ref, cos_ref, sin_ref, h0_ref,
                       ln1_ref, wqkv_ref, wo_ref, ln2_ref, wgu_ref, wd_ref,
                       fnorm_ref, lmw_ref,
                       logits_ref,
                       h_scr, attn_scr, bias_scr,
                       *, n_heads, head_dim, hidden, inter, eps, cdt, batch, seq):
    l = pl.program_id(0)
    n_layers = pl.num_programs(0)

    # ---- one-time setup at layer 0: load embeddings, build causal+pad bias ----
    # NOTE: h_scr / bias_scr carries across grid steps are only valid because the
    # layer axis is the sole (sequential, "arbitrary") grid axis.
    @pl.when(l == 0)
    def _():
        h_scr[...] = h0_ref[...].astype(jnp.float32)
        # finite big-negative keeps fully-masked rows NaN-free (single where)
        neg = jnp.float32(-1e30)
        rows = jax.lax.broadcasted_iota(jnp.int32, (seq, seq), 0)
        cols = jax.lax.broadcasted_iota(jnp.int32, (seq, seq), 1)
        causal = cols <= rows
        for b in range(batch):                                   # static unroll (tiny B)
            keep = causal & (pad_ref[b:b + 1, :] > 0.5)          # (1,S) lane-broadcast
            bias_scr[b] = jnp.where(keep, 0.0, neg)

    h = h_scr[...]                                               # (B*S, H) f32, resident
    cos = cos_ref[...]                                           # (B*S, hd), scale folded
    sin_s = sin_ref[...]                                         # sign + scale folded
    half = head_dim // 2

    # ---------------- self-attention ----------------
    hn = _rms_norm(h, ln1_ref[...], eps).astype(cdt)
    # fused QKV projection: one MXU pass with N = 3H, M = B*S
    qkv = jnp.dot(hn, wqkv_ref[...], preferred_element_type=jnp.float32)   # (B*S, 3H)

    # RoPE applied to all batch rows at once per head
    # rotate_half(x) == roll(x, head_dim/2) * [-1...,+1...]; the sign (and the
    # 1/sqrt(head_dim)^(1/2) scale) are folded into the host-built sin/cos tables.
    q_heads, k_heads = [], []
    for hd_i in range(n_heads):                                  # static loop, 128-lane slices
        lo = hd_i * head_dim
        qh = qkv[:, lo:lo + head_dim]
        kh = qkv[:, hidden + lo:hidden + lo + head_dim]
        qh = qh * cos + pltpu.roll(qh, half, axis=1) * sin_s
        kh = kh * cos + pltpu.roll(kh, half, axis=1) * sin_s
        q_heads.append(qh.astype(cdt))
        k_heads.append(kh.astype(cdt))

    # scores / softmax / context per (batch, head): the only place batch structure matters
    for b in range(batch):
        r0 = b * seq
        bias_b = bias_scr[b]                                     # (S, S)
        for hd_i in range(n_heads):
            lo = hd_i * head_dim
            qh = q_heads[hd_i][r0:r0 + seq, :]
            kh = k_heads[hd_i][r0:r0 + seq, :]
            vh = qkv[r0:r0 + seq, 2 * hidden + lo:2 * hidden + lo + head_dim]
            # q @ k^T without an explicit transpose (contract last dims)
            sc = jax.lax.dot_general(qh, kh, (((1,), (1,)), ((), ())),
                                     preferred_element_type=jnp.float32)
            sc = sc + bias_b                                     # scale already folded into RoPE
            m = jnp.max(sc, axis=-1, keepdims=True)
            e = jnp.exp(sc - m)                                  # f32 softmax (HF semantics)
            p = e / jnp.sum(e, axis=-1, keepdims=True)           # exact division
            ctx = jnp.dot(p.astype(cdt), vh.astype(cdt),
                          preferred_element_type=jnp.float32)    # (S, hd)
            # write into a static lane/sublane-aligned slice: no concatenate temp
            attn_scr[r0:r0 + seq, lo:lo + head_dim] = ctx.astype(cdt)

    h = h + jnp.dot(attn_scr[...], wo_ref[...], preferred_element_type=jnp.float32)

    # ---------------- MLP (gate/up fused) ----------------
    hn = _rms_norm(h, ln2_ref[...], eps).astype(cdt)
    gu = jnp.dot(hn, wgu_ref[...], preferred_element_type=jnp.float32)     # (B*S, 2I)
    g = gu[:, :inter]
    u = gu[:, inter:]
    act = g * jax.nn.sigmoid(g)                                  # SiLU in f32 on the VPU
    h = h + jnp.dot((act * u).astype(cdt), wd_ref[...],
                    preferred_element_type=jnp.float32)

    h_scr[...] = h

    # ---------------- final RMSNorm + lm_head (last layer only) ----------------
    @pl.when(l == n_layers - 1)
    def _():
        hn_f = _rms_norm(h, fnorm_ref[...], eps).astype(cdt)
        logits_ref[...] = jnp.dot(hn_f, lmw_ref[...],
                                  preferred_element_type=jnp.float32
                                  ).astype(logits_ref.dtype)


# ----------------- full forward (embedding gather is glue) -----------------
def llama_forward(params, input_ids, attention_mask):
    B, S = input_ids.shape
    H, I, V, L = HIDDEN, INTERMEDIATE, VOCAB, N_LAYERS
    M = B * S

    # LlamaEmbedLayer: token embedding (gather stays in plain JAX)
    h0 = jnp.take(params['embed'], input_ids, axis=0).astype(jnp.float32)   # (B,S,H)
    h0_flat = h0.reshape(M, H)

    # padding mask as (B,S) float; the causal part is built in-kernel once (layer 0)
    pad = attention_mask.astype(jnp.float32)

    # Rotary tables for position_ids = arange(S), tiled to (B*S, hd) so RoPE runs on
    # all batch rows in one pass.  The attention scale 1/sqrt(hd) is folded in as
    # hd**-0.25 on each of q and k; rotate_half's sign is folded into sin.
    inv_freq = 1.0 / (ROPE_THETA ** (jnp.arange(0, HEAD_DIM, 2,
                                                dtype=jnp.float32) / HEAD_DIM))
    freqs = jnp.arange(S, dtype=jnp.float32)[:, None] * inv_freq[None, :]
    emb = jnp.concatenate([freqs, freqs], axis=-1)               # (S, hd)
    half = HEAD_DIM // 2
    sign = jnp.concatenate([-jnp.ones((half,), jnp.float32),
                            jnp.ones((half,), jnp.float32)])
    qk_scale = jnp.float32(HEAD_DIM) ** -0.25                    # sqrt(1/sqrt(hd)) per operand
    cos = jnp.tile(jnp.cos(emb) * qk_scale, (B, 1))              # (B*S, hd)
    sin_s = jnp.tile(jnp.sin(emb) * sign[None, :] * qk_scale, (B, 1))

    kern = partial(fused_llama_kernel, n_heads=N_HEADS, head_dim=HEAD_DIM,
                   hidden=H, inter=I, eps=RMS_EPS, cdt=COMPUTE_DTYPE,
                   batch=B, seq=S)

    # constant-index inputs: single-buffered (index never changes across layers)
    def const_spec(shape):
        return pl.BlockSpec(shape, lambda l, _n=len(shape): (0,) * _n,
                            pipeline_mode=pl.Buffered(1))

    # per-layer weight blocks (leading layer axis squeezed out)
    def layer_spec(shape):
        return pl.BlockSpec((None,) + shape,
                            lambda l, _n=len(shape): (l,) + (0,) * _n)

    # rough cost hint for the XLA scheduler
    per_layer = (2 * M * H * 3 * H + 4 * B * S * S * H + 2 * M * H * H
                 + 2 * M * H * 2 * I + 2 * M * I * H)
    flops = L * per_layer + 2 * M * H * V
    trans = L * (B * N_HEADS * S * S + M * I)
    bytes_acc = (L * 2 * (3 * H * H + H * H + 2 * H * I + I * H)   # bf16 weights once/layer
                 + M * H * 4 + M * V * 4 + H * V * 2 + 2 * M * HEAD_DIM * 4 + B * S * 4)
    cost = pl.CostEstimate(flops=int(flops), transcendentals=int(trans),
                           bytes_accessed=int(bytes_acc))

    logits_flat = pl.pallas_call(
        kern,
        out_shape=jax.ShapeDtypeStruct((M, V), jnp.float32),
        grid=(L,),                                               # layer axis ONLY (sequential)
        in_specs=[
            const_spec((B, S)),            # padding mask
            const_spec((M, HEAD_DIM)),     # cos (scale folded)
            const_spec((M, HEAD_DIM)),     # sin (sign + scale folded)
            const_spec((M, H)),            # embeddings (flattened batch*seq)
            layer_spec((1, H)),            # ln1 (per layer)
            layer_spec((H, 3 * H)),        # fused Wq|Wk|Wv
            layer_spec((H, H)),            # Wo
            layer_spec((1, H)),            # ln2
            layer_spec((H, 2 * I)),        # fused Wgate|Wup
            layer_spec((I, H)),            # Wdown
            const_spec((1, H)),            # final RMSNorm weight
            const_spec((H, V)),            # lm_head
        ],
        out_specs=pl.BlockSpec((M, V), lambda l: (0, 0)),        # resident, written on last layer
        scratch_shapes=[pltpu.VMEM((M, H), jnp.float32),         # resident hidden state
                        pltpu.VMEM((M, H), COMPUTE_DTYPE),       # per-head attention outputs
                        pltpu.VMEM((B, S, S), jnp.float32)],     # causal+pad bias (built once)
        compiler_params=pltpu.CompilerParams(
            dimension_semantics=("arbitrary",),                  # single sequential layer loop
            vmem_limit_bytes=32 * 1024 * 1024),                  # explicit (v5e default is 16 MiB)
        cost_estimate=cost,
    )(pad, cos, sin_s, h0_flat,
      params['ln1'], params['wqkv'], params['wo'],
      params['ln2'], params['wgu'], params['wd'],
      params['final_norm'], params['lm_head'])

    return {'logits': logits_flat.reshape(B, S, V)}


# ----------------- deterministic parameter init -----------------
def init_params(key):
    scale = 0.02
    keys = jax.random.split(key, 6)

    def w(k, shape):  # bf16 matmul weights (f32 accumulation in-kernel)
        return (jax.random.normal(k, shape, jnp.float32) * scale).astype(COMPUTE_DTYPE)

    return {
        'embed': jax.random.normal(keys[0], (VOCAB, HIDDEN), jnp.float32) * scale,
        'final_norm': jnp.ones((1, HIDDEN), jnp.float32),
        'lm_head': w(keys[1], (HIDDEN, VOCAB)),
        'ln1': jnp.ones((N_LAYERS, 1, HIDDEN), jnp.float32),
        'ln2': jnp.ones((N_LAYERS, 1, HIDDEN), jnp.float32),
        'wqkv': w(keys[2], (N_LAYERS, HIDDEN, 3 * HIDDEN)),
        'wo': w(keys[3], (N_LAYERS, HIDDEN, HIDDEN)),
        'wgu': w(keys[4], (N_LAYERS, HIDDEN, 2 * INTERMEDIATE)),
        'wd': w(keys[5], (N_LAYERS, INTERMEDIATE, HIDDEN)),
    }


if __name__ == "__main__":
    key = jax.random.PRNGKey(0)
    params = init_params(key)

    B, S = 2, 16
    input_ids = jax.random.randint(jax.random.PRNGKey(1), (B, S), 0, VOCAB,
                                   dtype=jnp.int32)
    # second sequence has its last 4 positions padded out
    attention_mask = jnp.ones((B, S), jnp.int32).at[1, S - 4:].set(0)

    fwd = jax.jit(llama_forward)
    out = fwd(params, input_ids, attention_mask)
    logits = jax.block_until_ready(out['logits'])
    assert logits.shape == (B, S, VOCAB)
    assert bool(jnp.all(jnp.isfinite(logits)))
    print("KERNEL_OK")
</pallas_src>

<mosaic_0001>
module attributes {stable_mosaic.version = 11 : i64} {
  func.func @fused_llama_kernel(%arg0: i32, %arg1: memref<2x16xf32, #tpu.memory_space<vmem>>, %arg2: memref<32x128xf32, #tpu.memory_space<vmem>>, %arg3: memref<32x128xf32, #tpu.memory_space<vmem>>, %arg4: memref<32x256xf32, #tpu.memory_space<vmem>>, %arg5: memref<1x1x256xf32, #tpu.memory_space<vmem>>, %arg6: memref<1x256x768xbf16, #tpu.memory_space<vmem>>, %arg7: memref<1x256x256xbf16, #tpu.memory_space<vmem>>, %arg8: memref<1x1x256xf32, #tpu.memory_space<vmem>>, %arg9: memref<1x256x1024xbf16, #tpu.memory_space<vmem>>, %arg10: memref<1x512x256xbf16, #tpu.memory_space<vmem>>, %arg11: memref<1x256xf32, #tpu.memory_space<vmem>>, %arg12: memref<256x256xbf16, #tpu.memory_space<vmem>>, %arg13: memref<32x256xf32, #tpu.memory_space<vmem>>, %arg14: memref<32x256xf32, #tpu.memory_space<vmem>>, %arg15: memref<32x256xbf16, #tpu.memory_space<vmem>>, %arg16: memref<2x16x16xf32, #tpu.memory_space<vmem>>) attributes {dimension_semantics = [#tpu.dimension_semantics<arbitrary>], iteration_bounds = array<i64: 2>, scalar_prefetch = 0 : i64, scratch_operands = 3 : i64, tpu.core_type = #tpu.core_type<tc>, window_params = [{pipeline_mode = #tpu.pipeline_mode<synchronous>, transform_indices = @transform_0, window_bounds = array<i64: 2, 16>}, {pipeline_mode = #tpu.pipeline_mode<synchronous>, transform_indices = @transform_1, window_bounds = array<i64: 32, 128>}, {pipeline_mode = #tpu.pipeline_mode<synchronous>, transform_indices = @transform_2, window_bounds = array<i64: 32, 128>}, {pipeline_mode = #tpu.pipeline_mode<synchronous>, transform_indices = @transform_3, window_bounds = array<i64: 32, 256>}, {transform_indices = @transform_4, window_bounds = array<i64: 1, 1, 256>}, {transform_indices = @transform_5, window_bounds = array<i64: 1, 256, 768>}, {transform_indices = @transform_6, window_bounds = array<i64: 1, 256, 256>}, {transform_indices = @transform_7, window_bounds = array<i64: 1, 1, 256>}, {transform_indices = @transform_8, window_bounds = array<i64: 1, 256, 1024>}, {transform_indices = @transform_9, window_bounds = array<i64: 1, 512, 256>}, {pipeline_mode = #tpu.pipeline_mode<synchronous>, transform_indices = @transform_10, window_bounds = array<i64: 1, 256>}, {pipeline_mode = #tpu.pipeline_mode<synchronous>, transform_indices = @transform_11, window_bounds = array<i64: 256, 256>}, {pipeline_mode = #tpu.pipeline_mode<synchronous>, transform_indices = @transform_12, window_bounds = array<i64: 32, 256>}]} {
    %c0_i32 = arith.constant 0 : i32
    %0 = arith.cmpi eq, %arg0, %c0_i32 : i32
    %1 = arith.extui %0 : i1 to i32
    %c0_i32_0 = arith.constant 0 : i32
    %2 = arith.cmpi ne, %1, %c0_i32_0 : i32
    scf.if %2 {
      %c0_69 = arith.constant 0 : index
      %c0_70 = arith.constant 0 : index
      %169 = vector.load %arg4[%c0_69, %c0_70] : memref<32x256xf32, #tpu.memory_space<vmem>>, vector<32x256xf32>
      %c0_71 = arith.constant 0 : index
      %c0_72 = arith.constant 0 : index
      %170 = vector.load %arg14[%c0_71, %c0_72] : memref<32x256xf32, #tpu.memory_space<vmem>>, vector<32x256xf32>
      tpu.vector_store %arg14[%c0_71, %c0_72], %169 {strides = array<i32>} : memref<32x256xf32, #tpu.memory_space<vmem>>, vector<32x256xf32>,
      %171 = tpu.iota {dimensions = array<i32: 0>} : vector<16x16xi32>
      %172 = tpu.iota {dimensions = array<i32: 1>} : vector<16x16xi32>
      %173 = arith.cmpi sle, %172, %171 : vector<16x16xi32>
      %c0_73 = arith.constant 0 : index
      %c0_74 = arith.constant 0 : index
      %174 = vector.load %arg1[%c0_73, %c0_74] : memref<2x16xf32, #tpu.memory_space<vmem>>, vector<1x16xf32>
      %cst_75 = arith.constant 5.000000e-01 : f32
      %175 = vector.broadcast %cst_75 : f32 to vector<1x16xf32>
      %176 = arith.cmpf ogt, %174, %175 : vector<1x16xf32>
      %177 = vector.broadcast %176 : vector<1x16xi1> to vector<16x16xi1>
      %178 = arith.andi %173, %177 : vector<16x16xi1>
      %cst_76 = arith.constant 0.000000e+00 : f32
      %cst_77 = arith.constant -1.000000e+30 : f32
      %179 = vector.broadcast %cst_76 : f32 to vector<16x16xf32>
      %180 = vector.broadcast %cst_77 : f32 to vector<16x16xf32>
      %181 = arith.select %178, %179, %180 : vector<16x16xi1>, vector<16x16xf32>
      %c0_78 = arith.constant 0 : index
      %c0_79 = arith.constant 0 : index
      %c0_80 = arith.constant 0 : index
      %182 = vector.load %arg16[%c0_78, %c0_79, %c0_80] : memref<2x16x16xf32, #tpu.memory_space<vmem>>, vector<1x16x16xf32>
      %183 = vector.shape_cast %182 : vector<1x16x16xf32> to vector<16x16xf32>
      %184 = vector.shape_cast %181 : vector<16x16xf32> to vector<1x16x16xf32>
      tpu.vector_store %arg16[%c0_78, %c0_79, %c0_80], %184 {strides = array<i32>} : memref<2x16x16xf32, #tpu.memory_space<vmem>>, vector<1x16x16xf32>,
      %c1_81 = arith.constant 1 : index
      %c0_82 = arith.constant 0 : index
      %185 = vector.load %arg1[%c1_81, %c0_82] : memref<2x16xf32, #tpu.memory_space<vmem>>, vector<1x16xf32>
      %cst_83 = arith.constant 5.000000e-01 : f32
      %186 = vector.broadcast %cst_83 : f32 to vector<1x16xf32>
      %187 = arith.cmpf ogt, %185, %186 : vector<1x16xf32>
      %188 = vector.broadcast %187 : vector<1x16xi1> to vector<16x16xi1>
      %189 = arith.andi %173, %188 : vector<16x16xi1>
      %cst_84 = arith.constant 0.000000e+00 : f32
      %cst_85 = arith.constant -1.000000e+30 : f32
      %190 = vector.broadcast %cst_84 : f32 to vector<16x16xf32>
      %191 = vector.broadcast %cst_85 : f32 to vector<16x16xf32>
      %192 = arith.select %189, %190, %191 : vector<16x16xi1>, vector<16x16xf32>
      %c1_86 = arith.constant 1 : index
      %c0_87 = arith.constant 0 : index
      %c0_88 = arith.constant 0 : index
      %193 = vector.load %arg16[%c1_86, %c0_87, %c0_88] : memref<2x16x16xf32, #tpu.memory_space<vmem>>, vector<1x16x16xf32>
      %194 = vector.shape_cast %193 : vector<1x16x16xf32> to vector<16x16xf32>
      %195 = vector.shape_cast %192 : vector<16x16xf32> to vector<1x16x16xf32>
      tpu.vector_store %arg16[%c1_86, %c0_87, %c0_88], %195 {strides = array<i32>} : memref<2x16x16xf32, #tpu.memory_space<vmem>>, vector<1x16x16xf32>,
    } else {
    }
    %c0 = arith.constant 0 : index
    %c0_1 = arith.constant 0 : index
    %3 = vector.load %arg14[%c0, %c0_1] : memref<32x256xf32, #tpu.memory_space<vmem>>, vector<32x256xf32>
    %c0_2 = arith.constant 0 : index
    %c0_3 = arith.constant 0 : index
    %4 = vector.load %arg2[%c0_2, %c0_3] : memref<32x128xf32, #tpu.memory_space<vmem>>, vector<32x128xf32>
    %c0_4 = arith.constant 0 : index
    %c0_5 = arith.constant 0 : index
    %5 = vector.load %arg3[%c0_4, %c0_5] : memref<32x128xf32, #tpu.memory_space<vmem>>, vector<32x128xf32>
    %c0_6 = arith.constant 0 : index
    %c0_7 = arith.constant 0 : index
    %c0_8 = arith.constant 0 : index
    %6 = vector.load %arg5[%c0_6, %c0_7, %c0_8] : memref<1x1x256xf32, #tpu.memory_space<vmem>>, vector<1x1x256xf32>
    %7 = vector.shape_cast %6 : vector<1x1x256xf32> to vector<1x256xf32>
    %8 = arith.mulf %3, %3 : vector<32x256xf32>
    %cst = arith.constant dense<0.000000e+00> : vector<32xf32>
    %9 = vector.multi_reduction <add>, %8, %cst [1] : vector<32x256xf32> to vector<32xf32>
    %10 = vector.shape_cast %9 : vector<32xf32> to vector<32x1xf32>
    %cst_9 = arith.constant 2.560000e+02 : f32
    %11 = vector.broadcast %cst_9 : f32 to vector<32x1xf32>
    %12 = arith.divf %10, %11 : vector<32x1xf32>
    %cst_10 = arith.constant 9.99999997E-7 : f32
    %13 = vector.broadcast %cst_10 : f32 to vector<32x1xf32>
    %14 = arith.addf %12, %13 : vector<32x1xf32>
    %15 = math.rsqrt %14 : vector<32x1xf32>
    %16 = vector.broadcast %15 : vector<32x1xf32> to vector<32x256xf32>
    %17 = arith.mulf %3, %16 : vector<32x256xf32>
    %18 = vector.broadcast %7 : vector<1x256xf32> to vector<32x256xf32>
    %19 = arith.mulf %17, %18 : vector<32x256xf32>
    %20 = arith.truncf %19 : vector<32x256xf32> to vector<32x256xbf16>
    %c0_11 = arith.constant 0 : index
    %c0_12 = arith.constant 0 : index
    %c0_13 = arith.constant 0 : index
    %21 = vector.load %arg6[%c0_11, %c0_12, %c0_13] : memref<1x256x768xbf16, #tpu.memory_space<vmem>>, vector<1x256x768xbf16>
    %22 = vector.shape_cast %21 : vector<1x256x768xbf16> to vector<256x768xbf16>
    %cst_14 = arith.constant dense<0.000000e+00> : vector<32x768xf32>
    %23 = tpu.matmul %20, %22, %cst_14 {dimension_numbers = #tpu.dot_dimension_numbers<[1], [0], [0], [1], [0, 0, 1, 1], [], []>} : vector<32x256xbf16>, vector<256x768xbf16>, vector<32x768xf32> -> vector<32x768xf32>
    %24 = vector.extract_strided_slice %23 {offsets = [0, 0], sizes = [32, 128], strides = [1, 1]} : vector<32x768xf32> to vector<32x128xf32>
    %25 = vector.extract_strided_slice %23 {offsets = [0, 256], sizes = [32, 128], strides = [1, 1]} : vector<32x768xf32> to vector<32x128xf32>
    %26 = arith.mulf %24, %4 : vector<32x128xf32>
    %c64_i32 = arith.constant 64 : i32
    %27 = tpu.dynamic_rotate %24 by %c64_i32 dim 1 : vector<32x128xf32>, i32 -> vector<32x128xf32>
    %28 = arith.mulf %27, %5 : vector<32x128xf32>
    %29 = arith.addf %26, %28 : vector<32x128xf32>
    %30 = arith.mulf %25, %4 : vector<32x128xf32>
    %c64_i32_15 = arith.constant 64 : i32
    %31 = tpu.dynamic_rotate %25 by %c64_i32_15 dim 1 : vector<32x128xf32>, i32 -> vector<32x128xf32>
    %32 = arith.mulf %31, %5 : vector<32x128xf32>
    %33 = arith.addf %30, %32 : vector<32x128xf32>
    %34 = arith.truncf %29 : vector<32x128xf32> to vector<32x128xbf16>
    %35 = arith.truncf %33 : vector<32x128xf32> to vector<32x128xbf16>
    %36 = vector.extract_strided_slice %23 {offsets = [0, 128], sizes = [32, 128], strides = [1, 1]} : vector<32x768xf32> to vector<32x128xf32>
    %37 = vector.extract_strided_slice %23 {offsets = [0, 384], sizes = [32, 128], strides = [1, 1]} : vector<32x768xf32> to vector<32x128xf32>
    %38 = arith.mulf %36, %4 : vector<32x128xf32>
    %c64_i32_16 = arith.constant 64 : i32
    %39 = tpu.dynamic_rotate %36 by %c64_i32_16 dim 1 : vector<32x128xf32>, i32 -> vector<32x128xf32>
    %40 = arith.mulf %39, %5 : vector<32x128xf32>
    %41 = arith.addf %38, %40 : vector<32x128xf32>
    %42 = arith.mulf %37, %4 : vector<32x128xf32>
    %c64_i32_17 = arith.constant 64 : i32
    %43 = tpu.dynamic_rotate %37 by %c64_i32_17 dim 1 : vector<32x128xf32>, i32 -> vector<32x128xf32>
    %44 = arith.mulf %43, %5 : vector<32x128xf32>
    %45 = arith.addf %42, %44 : vector<32x128xf32>
    %46 = arith.truncf %41 : vector<32x128xf32> to vector<32x128xbf16>
    %47 = arith.truncf %45 : vector<32x128xf32> to vector<32x128xbf16>
    %c0_18 = arith.constant 0 : index
    %c0_19 = arith.constant 0 : index
    %c0_20 = arith.constant 0 : index
    %48 = vector.load %arg16[%c0_18, %c0_19, %c0_20] : memref<2x16x16xf32, #tpu.memory_space<vmem>>, vector<1x16x16xf32>
    %49 = vector.shape_cast %48 : vector<1x16x16xf32> to vector<16x16xf32>
    %50 = vector.extract_strided_slice %34 {offsets = [0, 0], sizes = [16, 128], strides = [1, 1]} : vector<32x128xbf16> to vector<16x128xbf16>
    %51 = vector.extract_strided_slice %35 {offsets = [0, 0], sizes = [16, 128], strides = [1, 1]} : vector<32x128xbf16> to vector<16x128xbf16>
    %52 = vector.extract_strided_slice %23 {offsets = [0, 512], sizes = [16, 128], strides = [1, 1]} : vector<32x768xf32> to vector<16x128xf32>
    %cst_21 = arith.constant dense<0.000000e+00> : vector<16x16xf32>
    %53 = tpu.matmul %50, %51, %cst_21 {dimension_numbers = #tpu.dot_dimension_numbers<[1], [1], [0], [0], [0, 0, 1, 0], [], []>} : vector<16x128xbf16>, vector<16x128xbf16>, vector<16x16xf32> -> vector<16x16xf32>
    %54 = arith.addf %53, %49 : vector<16x16xf32>
    %cst_22 = arith.constant dense<0xFF800000> : vector<16xf32>
    %55 = vector.multi_reduction <maximumf>, %54, %cst_22 [1] : vector<16x16xf32> to vector<16xf32>
    %56 = vector.shape_cast %55 : vector<16xf32> to vector<16x1xf32>
    %57 = vector.broadcast %56 : vector<16x1xf32> to vector<16x16xf32>
    %58 = arith.subf %54, %57 : vector<16x16xf32>
    %59 = math.exp %58 : vector<16x16xf32>
    %cst_23 = arith.constant dense<0.000000e+00> : vector<16xf32>
    %60 = vector.multi_reduction <add>, %59, %cst_23 [1] : vector<16x16xf32> to vector<16xf32>
    %61 = vector.shape_cast %60 : vector<16xf32> to vector<16x1xf32>
    %62 = vector.broadcast %61 : vector<16x1xf32> to vector<16x16xf32>
    %63 = arith.divf %59, %62 : vector<16x16xf32>
    %64 = arith.truncf %63 : vector<16x16xf32> to vector<16x16xbf16>
    %65 = arith.truncf %52 : vector<16x128xf32> to vector<16x128xbf16>
    %cst_24 = arith.constant dense<0.000000e+00> : vector<16x128xf32>
    %66 = tpu.matmul %64, %65, %cst_24 {dimension_numbers = #tpu.dot_dimension_numbers<[1], [0], [0], [1], [0, 0, 1, 1], [], []>} : vector<16x16xbf16>, vector<16x128xbf16>, vector<16x128xf32> -> vector<16x128xf32>
    %67 = arith.truncf %66 : vector<16x128xf32> to vector<16x128xbf16>
    %c0_25 = arith.constant 0 : index
    %c0_26 = arith.constant 0 : index
    %68 = vector.load %arg15[%c0_25, %c0_26] : memref<32x256xbf16, #tpu.memory_space<vmem>>, vector<16x128xbf16>
    tpu.vector_store %arg15[%c0_25, %c0_26], %67 {strides = array<i32>} : memref<32x256xbf16, #tpu.memory_space<vmem>>, vector<16x128xbf16>,
    %69 = vector.extract_strided_slice %46 {offsets = [0, 0], sizes = [16, 128], strides = [1, 1]} : vector<32x128xbf16> to vector<16x128xbf16>
    %70 = vector.extract_strided_slice %47 {offsets = [0, 0], sizes = [16, 128], strides = [1, 1]} : vector<32x128xbf16> to vector<16x128xbf16>
    %71 = vector.extract_strided_slice %23 {offsets = [0, 640], sizes = [16, 128], strides = [1, 1]} : vector<32x768xf32> to vector<16x128xf32>
    %cst_27 = arith.constant dense<0.000000e+00> : vector<16x16xf32>
    %72 = tpu.matmul %69, %70, %cst_27 {dimension_numbers = #tpu.dot_dimension_numbers<[1], [1], [0], [0], [0, 0, 1, 0], [], []>} : vector<16x128xbf16>, vector<16x128xbf16>, vector<16x16xf32> -> vector<16x16xf32>
    %73 = arith.addf %72, %49 : vector<16x16xf32>
    %cst_28 = arith.constant dense<0xFF800000> : vector<16xf32>
    %74 = vector.multi_reduction <maximumf>, %73, %cst_28 [1] : vector<16x16xf32> to vector<16xf32>
    %75 = vector.shape_cast %74 : vector<16xf32> to vector<16x1xf32>
    %76 = vector.broadcast %75 : vector<16x1xf32> to vector<16x16xf32>
    %77 = arith.subf %73, %76 : vector<16x16xf32>
    %78 = math.exp %77 : vector<16x16xf32>
    %cst_29 = arith.constant dense<0.000000e+00> : vector<16xf32>
    %79 = vector.multi_reduction <add>, %78, %cst_29 [1] : vector<16x16xf32> to vector<16xf32>
    %80 = vector.shape_cast %79 : vector<16xf32> to vector<16x1xf32>
    %81 = vector.broadcast %80 : vector<16x1xf32> to vector<16x16xf32>
    %82 = arith.divf %78, %81 : vector<16x16xf32>
    %83 = arith.truncf %82 : vector<16x16xf32> to vector<16x16xbf16>
    %84 = arith.truncf %71 : vector<16x128xf32> to vector<16x128xbf16>
    %cst_30 = arith.constant dense<0.000000e+00> : vector<16x128xf32>
    %85 = tpu.matmul %83, %84, %cst_30 {dimension_numbers = #tpu.dot_dimension_numbers<[1], [0], [0], [1], [0, 0, 1, 1], [], []>} : vector<16x16xbf16>, vector<16x128xbf16>, vector<16x128xf32> -> vector<16x128xf32>
    %86 = arith.truncf %85 : vector<16x128xf32> to vector<16x128xbf16>
    %c0_31 = arith.constant 0 : index
    %c128 = arith.constant 128 : index
    %87 = vector.load %arg15[%c0_31, %c128] : memref<32x256xbf16, #tpu.memory_space<vmem>>, vector<16x128xbf16>
    tpu.vector_store %arg15[%c0_31, %c128], %86 {strides = array<i32>} : memref<32x256xbf16, #tpu.memory_space<vmem>>, vector<16x128xbf16>,
    %c1 = arith.constant 1 : index
    %c0_32 = arith.constant 0 : index
    %c0_33 = arith.constant 0 : index
    %88 = vector.load %arg16[%c1, %c0_32, %c0_33] : memref<2x16x16xf32, #tpu.memory_space<vmem>>, vector<1x16x16xf32>
    %89 = vector.shape_cast %88 : vector<1x16x16xf32> to vector<16x16xf32>
    %90 = vector.extract_strided_slice %34 {offsets = [16, 0], sizes = [16, 128], strides = [1, 1]} : vector<32x128xbf16> to vector<16x128xbf16>
    %91 = vector.extract_strided_slice %35 {offsets = [16, 0], sizes = [16, 128], strides = [1, 1]} : vector<32x128xbf16> to vector<16x128xbf16>
    %92 = vector.extract_strided_slice %23 {offsets = [16, 512], sizes = [16, 128], strides = [1, 1]} : vector<32x768xf32> to vector<16x128xf32>
    %cst_34 = arith.constant dense<0.000000e+00> : vector<16x16xf32>
    %93 = tpu.matmul %90, %91, %cst_34 {dimension_numbers = #tpu.dot_dimension_numbers<[1], [1], [0], [0], [0, 0, 1, 0], [], []>} : vector<16x128xbf16>, vector<16x128xbf16>, vector<16x16xf32> -> vector<16x16xf32>
    %94 = arith.addf %93, %89 : vector<16x16xf32>
    %cst_35 = arith.constant dense<0xFF800000> : vector<16xf32>
    %95 = vector.multi_reduction <maximumf>, %94, %cst_35 [1] : vector<16x16xf32> to vector<16xf32>
    %96 = vector.shape_cast %95 : vector<16xf32> to vector<16x1xf32>
    %97 = vector.broadcast %96 : vector<16x1xf32> to vector<16x16xf32>
    %98 = arith.subf %94, %97 : vector<16x16xf32>
    %99 = math.exp %98 : vector<16x16xf32>
    %cst_36 = arith.constant dense<0.000000e+00> : vector<16xf32>
    %100 = vector.multi_reduction <add>, %99, %cst_36 [1] : vector<16x16xf32> to vector<16xf32>
    %101 = vector.shape_cast %100 : vector<16xf32> to vector<16x1xf32>
    %102 = vector.broadcast %101 : vector<16x1xf32> to vector<16x16xf32>
    %103 = arith.divf %99, %102 : vector<16x16xf32>
    %104 = arith.truncf %103 : vector<16x16xf32> to vector<16x16xbf16>
    %105 = arith.truncf %92 : vector<16x128xf32> to vector<16x128xbf16>
    %cst_37 = arith.constant dense<0.000000e+00> : vector<16x128xf32>
    %106 = tpu.matmul %104, %105, %cst_37 {dimension_numbers = #tpu.dot_dimension_numbers<[1], [0], [0], [1], [0, 0, 1, 1], [], []>} : vector<16x16xbf16>, vector<16x128xbf16>, vector<16x128xf32> -> vector<16x128xf32>
    %107 = arith.truncf %106 : vector<16x128xf32> to vector<16x128xbf16>
    %c16 = arith.constant 16 : index
    %c0_38 = arith.constant 0 : index
    %108 = vector.load %arg15[%c16, %c0_38] : memref<32x256xbf16, #tpu.memory_space<vmem>>, vector<16x128xbf16>
    tpu.vector_store %arg15[%c16, %c0_38], %107 {strides = array<i32>} : memref<32x256xbf16, #tpu.memory_space<vmem>>, vector<16x128xbf16>,
    %109 = vector.extract_strided_slice %46 {offsets = [16, 0], sizes = [16, 128], strides = [1, 1]} : vector<32x128xbf16> to vector<16x128xbf16>
    %110 = vector.extract_strided_slice %47 {offsets = [16, 0], sizes = [16, 128], strides = [1, 1]} : vector<32x128xbf16> to vector<16x128xbf16>
    %111 = vector.extract_strided_slice %23 {offsets = [16, 640], sizes = [16, 128], strides = [1, 1]} : vector<32x768xf32> to vector<16x128xf32>
    %cst_39 = arith.constant dense<0.000000e+00> : vector<16x16xf32>
    %112 = tpu.matmul %109, %110, %cst_39 {dimension_numbers = #tpu.dot_dimension_numbers<[1], [1], [0], [0], [0, 0, 1, 0], [], []>} : vector<16x128xbf16>, vector<16x128xbf16>, vector<16x16xf32> -> vector<16x16xf32>
    %113 = arith.addf %112, %89 : vector<16x16xf32>
    %cst_40 = arith.constant dense<0xFF800000> : vector<16xf32>
    %114 = vector.multi_reduction <maximumf>, %113, %cst_40 [1] : vector<16x16xf32> to vector<16xf32>
    %115 = vector.shape_cast %114 : vector<16xf32> to vector<16x1xf32>
    %116 = vector.broadcast %115 : vector<16x1xf32> to vector<16x16xf32>
    %117 = arith.subf %113, %116 : vector<16x16xf32>
    %118 = math.exp %117 : vector<16x16xf32>
    %cst_41 = arith.constant dense<0.000000e+00> : vector<16xf32>
    %119 = vector.multi_reduction <add>, %118, %cst_41 [1] : vector<16x16xf32> to vector<16xf32>
    %120 = vector.shape_cast %119 : vector<16xf32> to vector<16x1xf32>
    %121 = vector.broadcast %120 : vector<16x1xf32> to vector<16x16xf32>
    %122 = arith.divf %118, %121 : vector<16x16xf32>
    %123 = arith.truncf %122 : vector<16x16xf32> to vector<16x16xbf16>
    %124 = arith.truncf %111 : vector<16x128xf32> to vector<16x128xbf16>
    %cst_42 = arith.constant dense<0.000000e+00> : vector<16x128xf32>
    %125 = tpu.matmul %123, %124, %cst_42 {dimension_numbers = #tpu.dot_dimension_numbers<[1], [0], [0], [1], [0, 0, 1, 1], [], []>} : vector<16x16xbf16>, vector<16x128xbf16>, vector<16x128xf32> -> vector<16x128xf32>
    %126 = arith.truncf %125 : vector<16x128xf32> to vector<16x128xbf16>
    %c16_43 = arith.constant 16 : index
    %c128_44 = arith.constant 128 : index
    %127 = vector.load %arg15[%c16_43, %c128_44] : memref<32x256xbf16, #tpu.memory_space<vmem>>, vector<16x128xbf16>
    tpu.vector_store %arg15[%c16_43, %c128_44], %126 {strides = array<i32>} : memref<32x256xbf16, #tpu.memory_space<vmem>>, vector<16x128xbf16>,
    %c0_45 = arith.constant 0 : index
    %c0_46 = arith.constant 0 : index
    %128 = vector.load %arg15[%c0_45, %c0_46] : memref<32x256xbf16, #tpu.memory_space<vmem>>, vector<32x256xbf16>
    %c0_47 = arith.constant 0 : index
    %c0_48 = arith.constant 0 : index
    %c0_49 = arith.constant 0 : index
    %129 = vector.load %arg7[%c0_47, %c0_48, %c0_49] : memref<1x256x256xbf16, #tpu.memory_space<vmem>>, vector<1x256x256xbf16>
    %130 = vector.shape_cast %129 : vector<1x256x256xbf16> to vector<256x256xbf16>
    %cst_50 = arith.constant dense<0.000000e+00> : vector<32x256xf32>
    %131 = tpu.matmul %128, %130, %cst_50 {dimension_numbers = #tpu.dot_dimension_numbers<[1], [0], [0], [1], [0, 0, 1, 1], [], []>} : vector<32x256xbf16>, vector<256x256xbf16>, vector<32x256xf32> -> vector<32x256xf32>
    %132 = arith.addf %3, %131 : vector<32x256xf32>
    %c0_51 = arith.constant 0 : index
    %c0_52 = arith.constant 0 : index
    %c0_53 = arith.constant 0 : index
    %133 = vector.load %arg8[%c0_51, %c0_52, %c0_53] : memref<1x1x256xf32, #tpu.memory_space<vmem>>, vector<1x1x256xf32>
    %134 = vector.shape_cast %133 : vector<1x1x256xf32> to vector<1x256xf32>
    %135 = arith.mulf %132, %132 : vector<32x256xf32>
    %cst_54 = arith.constant dense<0.000000e+00> : vector<32xf32>
    %136 = vector.multi_reduction <add>, %135, %cst_54 [1] : vector<32x256xf32> to vector<32xf32>
    %137 = vector.shape_cast %136 : vector<32xf32> to vector<32x1xf32>
    %cst_55 = arith.constant 2.560000e+02 : f32
    %138 = vector.broadcast %cst_55 : f32 to vector<32x1xf32>
    %139 = arith.divf %137, %138 : vector<32x1xf32>
    %cst_56 = arith.constant 9.99999997E-7 : f32
    %140 = vector.broadcast %cst_56 : f32 to vector<32x1xf32>
    %141 = arith.addf %139, %140 : vector<32x1xf32>
    %142 = math.rsqrt %141 : vector<32x1xf32>
    %143 = vector.broadcast %142 : vector<32x1xf32> to vector<32x256xf32>
    %144 = arith.mulf %132, %143 : vector<32x256xf32>
    %145 = vector.broadcast %134 : vector<1x256xf32> to vector<32x256xf32>
    %146 = arith.mulf %144, %145 : vector<32x256xf32>
    %147 = arith.truncf %146 : vector<32x256xf32> to vector<32x256xbf16>
    %c0_57 = arith.constant 0 : index
    %c0_58 = arith.constant 0 : index
    %c0_59 = arith.constant 0 : index
    %148 = vector.load %arg9[%c0_57, %c0_58, %c0_59] : memref<1x256x1024xbf16, #tpu.memory_space<vmem>>, vector<1x256x1024xbf16>
    %149 = vector.shape_cast %148 : vector<1x256x1024xbf16> to vector<256x1024xbf16>
    %cst_60 = arith.constant dense<0.000000e+00> : vector<32x1024xf32>
    %150 = tpu.matmul %147, %149, %cst_60 {dimension_numbers = #tpu.dot_dimension_numbers<[1], [0], [0], [1], [0, 0, 1, 1], [], []>} : vector<32x256xbf16>, vector<256x1024xbf16>, vector<32x1024xf32> -> vector<32x1024xf32>
    %151 = vector.extract_strided_slice %150 {offsets = [0, 0], sizes = [32, 512], strides = [1, 1]} : vector<32x1024xf32> to vector<32x512xf32>
    %152 = vector.extract_strided_slice %150 {offsets = [0, 512], sizes = [32, 512], strides = [1, 1]} : vector<32x1024xf32> to vector<32x512xf32>
    %153 = arith.negf %151 : vector<32x512xf32>
    %154 = math.exp %153 : vector<32x512xf32>
    %cst_61 = arith.constant 1.000000e+00 : f32
    %155 = vector.broadcast %cst_61 : f32 to vector<32x512xf32>
    %156 = arith.addf %155, %154 : vector<32x512xf32>
    %157 = arith.divf %155, %156 : vector<32x512xf32>
    %158 = arith.mulf %151, %157 : vector<32x512xf32>
    %159 = arith.mulf %158, %152 : vector<32x512xf32>
    %160 = arith.truncf %159 : vector<32x512xf32> to vector<32x512xbf16>
    %c0_62 = arith.constant 0 : index
    %c0_63 = arith.constant 0 : index
    %c0_64 = arith.constant 0 : index
    %161 = vector.load %arg10[%c0_62, %c0_63, %c0_64] : memref<1x512x256xbf16, #tpu.memory_space<vmem>>, vector<1x512x256xbf16>
    %162 = vector.shape_cast %161 : vector<1x512x256xbf16> to vector<512x256xbf16>
    %cst_65 = arith.constant dense<0.000000e+00> : vector<32x256xf32>
    %163 = tpu.matmul %160, %162, %cst_65 {dimension_numbers = #tpu.dot_dimension_numbers<[1], [0], [0], [1], [0, 0, 1, 1], [], []>} : vector<32x512xbf16>, vector<512x256xbf16>, vector<32x256xf32> -> vector<32x256xf32>
    %164 = arith.addf %132, %163 : vector<32x256xf32>
    %c0_66 = arith.constant 0 : index
    %c0_67 = arith.constant 0 : index
    %165 = vector.load %arg14[%c0_66, %c0_67] : memref<32x256xf32, #tpu.memory_space<vmem>>, vector<32x256xf32>
    tpu.vector_store %arg14[%c0_66, %c0_67], %164 {strides = array<i32>} : memref<32x256xf32, #tpu.memory_space<vmem>>, vector<32x256xf32>,
    %c1_i32 = arith.constant 1 : i32
    %166 = arith.cmpi eq, %arg0, %c1_i32 : i32
    %167 = arith.extui %166 : i1 to i32
    %c0_i32_68 = arith.constant 0 : i32
    %168 = arith.cmpi ne, %167, %c0_i32_68 : i32
    scf.if %168 {
      %c0_69 = arith.constant 0 : index
      %c0_70 = arith.constant 0 : index
      %169 = vector.load %arg11[%c0_69, %c0_70] : memref<1x256xf32, #tpu.memory_space<vmem>>, vector<1x256xf32>
      %170 = arith.mulf %164, %164 : vector<32x256xf32>
      %cst_71 = arith.constant dense<0.000000e+00> : vector<32xf32>
      %171 = vector.multi_reduction <add>, %170, %cst_71 [1] : vector<32x256xf32> to vector<32xf32>
      %172 = vector.shape_cast %171 : vector<32xf32> to vector<32x1xf32>
      %cst_72 = arith.constant 2.560000e+02 : f32
      %173 = vector.broadcast %cst_72 : f32 to vector<32x1xf32>
      %174 = arith.divf %172, %173 : vector<32x1xf32>
      %cst_73 = arith.constant 9.99999997E-7 : f32
      %175 = vector.broadcast %cst_73 : f32 to vector<32x1xf32>
      %176 = arith.addf %174, %175 : vector<32x1xf32>
      %177 = math.rsqrt %176 : vector<32x1xf32>
      %178 = vector.broadcast %177 : vector<32x1xf32> to vector<32x256xf32>
      %179 = arith.mulf %164, %178 : vector<32x256xf32>
      %180 = vector.broadcast %169 : vector<1x256xf32> to vector<32x256xf32>
      %181 = arith.mulf %179, %180 : vector<32x256xf32>
      %182 = arith.truncf %181 : vector<32x256xf32> to vector<32x256xbf16>
      %c0_74 = arith.constant 0 : index
      %c0_75 = arith.constant 0 : index
      %183 = vector.load %arg12[%c0_74, %c0_75] : memref<256x256xbf16, #tpu.memory_space<vmem>>, vector<256x256xbf16>
      %cst_76 = arith.constant dense<0.000000e+00> : vector<32x256xf32>
      %184 = tpu.matmul %182, %183, %cst_76 {dimension_numbers = #tpu.dot_dimension_numbers<[1], [0], [0], [1], [0, 0, 1, 1], [], []>} : vector<32x256xbf16>, vector<256x256xbf16>, vector<32x256xf32> -> vector<32x256xf32>
      %c0_77 = arith.constant 0 : index
      %c0_78 = arith.constant 0 : index
      %185 = vector.load %arg13[%c0_77, %c0_78] : memref<32x256xf32, #tpu.memory_space<vmem>>, vector<32x256xf32>
      tpu.vector_store %arg13[%c0_77, %c0_78], %184 {strides = array<i32>} : memref<32x256xf32, #tpu.memory_space<vmem>>, vector<32x256xf32>,
    } else {
    }
    return
  }
  func.func @transform_0(%arg0: i32) -> (i32, i32) {
    %c0_i32 = arith.constant 0 : i32
    %c0_i32_0 = arith.constant 0 : i32
    %c0_i32_1 = arith.constant 0 : i32
    return %c0_i32, %c0_i32_0 : i32, i32
  }
  func.func @transform_1(%arg0: i32) -> (i32, i32) {
    %c0_i32 = arith.constant 0 : i32
    %c0_i32_0 = arith.constant 0 : i32
    %c0_i32_1 = arith.constant 0 : i32
    return %c0_i32, %c0_i32_0 : i32, i32
  }
  func.func @transform_2(%arg0: i32) -> (i32, i32) {
    %c0_i32 = arith.constant 0 : i32
    %c0_i32_0 = arith.constant 0 : i32
    %c0_i32_1 = arith.constant 0 : i32
    return %c0_i32, %c0_i32_0 : i32, i32
  }
  func.func @transform_3(%arg0: i32) -> (i32, i32) {
    %c0_i32 = arith.constant 0 : i32
    %c0_i32_0 = arith.constant 0 : i32
    %c0_i32_1 = arith.constant 0 : i32
    return %c0_i32, %c0_i32_0 : i32, i32
  }
  func.func @transform_4(%arg0: i32) -> (i32, i32, i32) {
    %c0_i32 = arith.constant 0 : i32
    %c0_i32_0 = arith.constant 0 : i32
    %c0_i32_1 = arith.constant 0 : i32
    return %arg0, %c0_i32, %c0_i32_0 : i32, i32, i32
  }
  func.func @transform_5(%arg0: i32) -> (i32, i32, i32) {
    %c0_i32 = arith.constant 0 : i32
    %c0_i32_0 = arith.constant 0 : i32
    %c0_i32_1 = arith.constant 0 : i32
    return %arg0, %c0_i32, %c0_i32_0 : i32, i32, i32
  }
  func.func @transform_6(%arg0: i32) -> (i32, i32, i32) {
    %c0_i32 = arith.constant 0 : i32
    %c0_i32_0 = arith.constant 0 : i32
    %c0_i32_1 = arith.constant 0 : i32
    return %arg0, %c0_i32, %c0_i32_0 : i32, i32, i32
  }
  func.func @transform_7(%arg0: i32) -> (i32, i32, i32) {
    %c0_i32 = arith.constant 0 : i32
    %c0_i32_0 = arith.constant 0 : i32
    %c0_i32_1 = arith.constant 0 : i32
    return %arg0, %c0_i32, %c0_i32_0 : i32, i32, i32
  }
  func.func @transform_8(%arg0: i32) -> (i32, i32, i32) {
    %c0_i32 = arith.constant 0 : i32
    %c0_i32_0 = arith.constant 0 : i32
    %c0_i32_1 = arith.constant 0 : i32
    return %arg0, %c0_i32, %c0_i32_0 : i32, i32, i32
  }
  func.func @transform_9(%arg0: i32) -> (i32, i32, i32) {
    %c0_i32 = arith.constant 0 : i32
    %c0_i32_0 = arith.constant 0 : i32
    %c0_i32_1 = arith.constant 0 : i32
    return %arg0, %c0_i32, %c0_i32_0 : i32, i32, i32
  }
  func.func @transform_10(%arg0: i32) -> (i32, i32) {
    %c0_i32 = arith.constant 0 : i32
    %c0_i32_0 = arith.constant 0 : i32
    %c0_i32_1 = arith.constant 0 : i32
    return %c0_i32, %c0_i32_0 : i32, i32
  }
  func.func @transform_11(%arg0: i32) -> (i32, i32) {
    %c0_i32 = arith.constant 0 : i32
    %c0_i32_0 = arith.constant 0 : i32
    %c0_i32_1 = arith.constant 0 : i32
    return %c0_i32, %c0_i32_0 : i32, i32
  }
  func.func @transform_12(%arg0: i32) -> (i32, i32) {
    %c0_i32 = arith.constant 0 : i32
    %c0_i32_0 = arith.constant 0 : i32
    %c0_i32_1 = arith.constant 0 : i32
    return %c0_i32, %c0_i32_0 : i32, i32
  }
}

</mosaic_0001>

<bundles_post_ra>
// kernel: llama_forward.1
= control target key start
LH: loop header
LB: loop body
LE: loop exit
PB: predicated region body
PF: predicated region fallthrough
CT: control target
= control target key end

     0   :  { %s9447_s0 = inlined_call_operand.vmem [shape: f32[2,16], index: 0, kind: input, shape index: {}]   ;;  %s9448_s1 = inlined_call_operand.vmem [shape: f32[32,128], index: 1, kind: input, shape index: {}]   ;;  %s9449_s2 = inlined_call_operand.vmem [shape: f32[32,128], index: 2, kind: input, shape index: {}]   ;;  %s9450_s3 = inlined_call_operand.vmem [shape: f32[32,256], index: 3, kind: input, shape index: {}]   ;;  %s9451_s4 = inlined_call_operand.vmem [shape: f32[2,1,256], index: 4, kind: input, shape index: {}]   ;;  %s9452_s5 = inlined_call_operand.hbm [shape: bf16[2,256,768], index: 5, kind: input, shape index: {}]   ;;  %s9453_s6 = inlined_call_operand.vmem [shape: bf16[2,256,256], index: 6, kind: input, shape index: {}]   ;;  %s9454_s7 = inlined_call_operand.vmem [shape: f32[2,1,256], index: 7, kind: input, shape index: {}]   ;;  %s9455_s8 = inlined_call_operand.hbm [shape: bf16[2,256,1024], index: 8, kind: input, shape index: {}]   ;;  %s9456_s9 = inlined_call_operand.hbm [shape: bf16[2,512,256], index: 9, kind: input, shape index: {}]   ;;  %s9457_s10 = inlined_call_operand.vmem [shape: f32[1,256], index: 10, kind: input, shape index: {}]   ;;  %s9458_s11 = inlined_call_operand.vmem [shape: bf16[256,256], index: 11, kind: input, shape index: {}]   ;;  %s9459_s12 = inlined_call_operand.hbm [shape: f32[32,256], index: 12, kind: output, shape index: {}]  }
   0x1   :  { %9476 = sst [smem:[#allocation28_spill]] %s9448_s1 }
   0x2   :  { %9477 = sst [smem:[#allocation29_spill]] %s9455_s8 }
   0x3   :  { %9478 = sst [smem:[#allocation30_spill]] %s9457_s10 }
   0x4   :  { %9479 = sst [smem:[#allocation31_spill]] %s9458_s11 }
   0x5   :  { %9480 = sst [smem:[#allocation32_spill]] %s9459_s12 }
   0x6   :  { %17 = vsyncpa [#allocation6], 0 }
   0x7   :  { %19 = vsyncpa [#allocation6 + $0x1], 0 }
   0x8   :  { %20 = vsyncpa [#allocation9], 0 }
   0x9   :  { %22 = vsyncpa [#allocation9 + $0x1], 0 }
   0xa   :  { %23 = vsyncpa [#allocation7], 0  ;;  %s7163_s21 = smov 0   ;;  %s7165_s22 = smov 0  }
   0xb   :  { %s7167_s23 = smov 0   ;;  %s7169_s24 = smov 0  }
   0xc LB: > { %9481 = sst [smem:[#allocation15_spill]] %s7079_s23  ;;  %s7182_s25 = sadd.s32 4294967295, %s7083_s24   ;;  %s7083_s24 = sphi %s7169_s24, %s9582_s24   ;;  %s7079_s23 = sphi %s7167_s23, %s9587_s23   ;;  %s7075_s22 = sphi %s7165_s22, %s9586_s22   ;;  %s7071_s21 = sphi %s7163_s21, %s9585_s21  }
   0xd   : > { %s7185_s26 = sadd.s32 1, %s7083_s24   ;;  %s146_s28 = sadd.s32 1, %s7079_s23 }
   0xe   : > { %9482 = sst [smem:[#allocation16_spill]] %s7185_s26  ;;  %s143_s27 = ssub.s32 %s7083_s24, %s7185_s26 }
   0xf   : > { %p144_p0 = scmp.eq.s32.totalorder %s143_s27, 0  ;;  %p153_p1 = scmp.ne.s32.totalorder %s7079_s23, %s7075_s22 }
  0x10   : > { %p154_p2 = scmp.eq.s32.totalorder %s7083_s24, 0  ;;  %p159_p3 = scmp.ne.s32.totalorder %s7075_s22, %s7071_s21 }
  0x11   : > { %s7195_s29 = scalar_select %p144_p0, %s7079_s23, %s146_s28  }
  0x12   : > { %p155_p4 = por %p154_p2, %p153_p1  ;;  %p160_p5 = scmp.eq.s32.totalorder %s7182_s25, 0 }
  0x13   : > { %9483 = sst [smem:[#allocation17_spill]] %s7195_s29  ;;  %p6745_p6 = scmp.lt.s32.totalorder %s7083_s24, 2 }
  0x14   : > { %p7199_p7 = por %p160_p5, %p159_p3  ;;  %s7204_s13 = sand.u32 1, %s7079_s23  }
  0x15   : > { %p7206_p8 = pnand %p6745_p6, %p155_p4  ;;  %s412_s15 = sand.u32 1, %s7083_s24  }
  0x16   : > { %s4900_s16 = sshll.u32 %s7204_s13, 10  ;;  %s6363_s17 = sshll.u32 %s7083_s24, 10 }
  0x17   : > { %s416_s18 = scalar_lea.vmem [#allocation8], %s4900_s16  ;;  %s9486_s8 = sld [smem:[#allocation29_spill]] }
  0x18   : > { %s424_s19 = sshll.u32 %s416_s18, 4  ;;  %s7216_s29 = scalar_lea.sflag [#allocation9], %s412_s15  ;;  %s425_s19 = int_to_ptr.vmem [resolvable:$true] %s424_s19 }
  0x19   : > { %p6927_p10 = pneg %p7206_p8 }
  0x1d   : > { %s421_s27 = scalar_lea.hbm %s9486_s8, %s6363_s17  ;;  %s6930_s20 = scalar_lea.hbm %s9486_s8, 2048 }
  0x1e   : > { %s422_s28 = sshll.u32 %s421_s27, 4  ;;  %s423_s28 = int_to_ptr.hbm [resolvable:$true] %s422_s28 }
  0x1f   : > { %s6923_s23 = sshra.s32 %s423_s28, 4  ;;  %s6924_s23 = int_to_ptr.hbm [resolvable:$true] %s6923_s23 }
  0x20   : > { %s6925_s26 = scalar_lea.hbm %s6924_s23, 1024  ;;  %p6931_p13 = scmp.lt.s32.totalorder %s6924_s23, %s9486_s8 }
  0x21   : > { %p6926_p9 = scmp.ne.s32.totalorder %s6924_s23, %s6925_s26  ;;  %p6932_p0 = scmp.lt.s32.totalorder %s6930_s20, %s6925_s26 }
  0x23   : > { %p6928_p11 = pnand %p6927_p10, %p6926_p9  ;;  %p6933_p1 = por %p6932_p0, %p6931_p13 }
  0x25   : > { %p6929_p12 = pneg %p6928_p11 }
  0x27   : > { %p6934_p2 = pnand %p6933_p1, %p6929_p12 }
  0x29   : > { %6937 = shalt.err (!%p6934_p2)
}
  0x2a   : > { %s7085_s15 = smov 512   ;;  %s7086_s27 = smov 32  }
  0x2b   : > { %6741 = dma.hbm_to_vmem [thread:$0]  (!%p7206_p8), %s423_s28, 16384, %s425_s19, %s7216_s29, %s7085_s15, %s7085_s15, %s7086_s27  }
  0x2c   : > { %p4906_p3 = scmp.ge.s32.totalorder %s7083_s24, 1  ;;  %p454_p4 = scmp.lt.s32.totalorder %s7083_s24, 3 }
  0x2d   : > { %s6722_s16 = smul.u32 768, %s7204_s13  ;;  %s376_s10 = scalar_lea.sflag [#allocation6], %s7204_s13 }
  0x2e   : > { %p7235_p5 = pnand %p4906_p3, %p454_p4  ;;  %s6723_s26 = smul.u32 768, %s7083_s24 }
  0x2f   : > { %s379_s21 = scalar_lea.vmem [#allocation5], %s6722_s16  ;;  %s6960_s11 = scalar_lea.hbm %s9452_s5, 1536 }
  0x30   : > { %s384_s17 = scalar_lea.hbm %s9452_s5, %s6723_s26  ;;  %s387_s8 = sshll.u32 %s379_s21, 4  ;;  %s388_s8 = int_to_ptr.vmem [resolvable:$true] %s387_s8 }
  0x31   : > { %s385_s12 = sshll.u32 %s384_s17, 4  ;;  %s386_s12 = int_to_ptr.hbm [resolvable:$true] %s385_s12 }
  0x32   : > { %s6953_s19 = sshra.s32 %s386_s12, 4  ;;  %s6954_s19 = int_to_ptr.hbm [resolvable:$true] %s6953_s19 }
  0x33   : > { %s6955_s28 = scalar_lea.hbm %s6954_s19, 768  ;;  %p6961_p12 = scmp.lt.s32.totalorder %s6954_s19, %s9452_s5 }
  0x34   : > { %p6956_p6 = scmp.ne.s32.totalorder %s6954_s19, %s6955_s28  ;;  %p6962_p13 = scmp.lt.s32.totalorder %s6960_s11, %s6955_s28 }
  0x36   : > { %p6958_p9 = pnand %p6956_p6, %p6927_p10  ;;  %p6963_p0 = por %p6962_p13, %p6961_p12 }
  0x38   : > { %p6959_p11 = pneg %p6958_p9 }
  0x3a   : > { %p6964_p1 = pnand %p6963_p0, %p6959_p11 }
  0x3c   : > { %6967 = shalt.err (!%p6964_p1)
}
  0x3d   : > { %s7087_s16 = smov 384   ;;  %s7088_s20 = smov 24  }
  0x3e   : > { %6738 = dma.hbm_to_vmem [thread:$0]  (!%p7206_p8), %s386_s12, 12288, %s388_s8, %s376_s10, %s7087_s16, %s7087_s16, %s7088_s20  }
  0x3f   : > { %s4903_s17 = sshll.u32 %s7204_s13, 9  ;;  %s6364_s21 = sshll.u32 %s7083_s24, 9 }
  0x40   : > { %s443_s1 = scalar_lea.hbm %s9456_s9, %s6364_s21  ;;  %s438_s19 = scalar_lea.vmem [#allocation10], %s4903_s17 }
  0x41   : > { %s444_s18 = sshll.u32 %s443_s1, 4  ;;  %s446_s11 = sshll.u32 %s438_s19, 4  ;;  %s445_s18 = int_to_ptr.hbm [resolvable:$true] %s444_s18  ;;  %s447_s11 = int_to_ptr.vmem [resolvable:$true] %s446_s11 }
  0x42   : > { %s6983_s28 = sshra.s32 %s445_s18, 4  ;;  %s6990_s12 = scalar_lea.hbm %s9456_s9, 1024  ;;  %s6984_s28 = int_to_ptr.hbm [resolvable:$true] %s6983_s28 }
  0x43   : > { %s6985_s26 = scalar_lea.hbm %s6984_s28, 512  ;;  %p6991_p6 = scmp.lt.s32.totalorder %s6984_s28, %s9456_s9 }
  0x44   : > { %p6986_p2 = scmp.ne.s32.totalorder %s6984_s28, %s6985_s26  ;;  %p6992_p9 = scmp.lt.s32.totalorder %s6990_s12, %s6985_s26 }
  0x46   : > { %p6988_p3 = pnand %p6986_p2, %p6927_p10  ;;  %p6993_p11 = por %p6992_p9, %p6991_p6 }
  0x48   : > { %p6989_p4 = pneg %p6988_p3 }
  0x4a   : > { %p6994_p12 = pnand %p6993_p11, %p6989_p4 }
  0x4c   : > { %6997 = shalt.err (!%p6994_p12)
}
  0x4d   : > { %s7089_s1 = smov 128   ;;  %s7090_s16 = smov 8  }
  0x4e   : > { %6744 = dma.hbm_to_vmem [thread:$0]  (!%p7206_p8), %s445_s18, 8192, %s447_s11, %s7216_s29, %s7089_s1, %s7089_s1, %s7090_s16  }
  0x4f   : > { %458 = sbr.rel (%p7235_p5) target bundleno = 2199 (0x897), region = 68 }
  0x54   : > { %s460_s20 = sand.u32 1, %s7075_s22  }
  0x55   : > { %s6724_s17 = smul.u32 768, %s460_s20  ;;  %s461_s21 = scalar_lea.sflag [#allocation6], %s460_s20 }
  0x57   : > { %s7275_s15 = scalar_lea.vmem [#allocation5], %s6724_s17 }
  0x58   : > { %7058 = dma.done.wait (%p7199_p7), %s461_s21, 12288  }
  0x59   : > { %7060 = vsyncadd (%p7199_p7), %s461_s21, 4294955008  ;;  %s470_s27 = sand.u32 1, %s7182_s25   ;;  %s4907_s14 = sshll.u32 %s460_s20, 10 }
  0x5a   : > { %s471_s29 = scalar_lea.sflag [#allocation9], %s470_s27  ;;  %s7282_s18 = scalar_lea.vmem [#allocation8], %s4907_s14 }
  0x5b   : > { %7062 = dma.done.wait (%p7199_p7), %s471_s29, 24576  }
  0x5c   : > { %7064 = vsyncadd (%p7199_p7), %s471_s29, 4294942720  ;;  %s4908_s23 = sshll.u32 %s460_s20, 9  ;;  %p544_p8 = scmp.lt.s32.totalorder %s7182_s25, 1 }
  0x5d   : > { %s7305_s20 = scalar_lea.vmem [#allocation10], %s4908_s23  ;;  %p4913_p7 = scmp.ne.s32.totalorder %s7182_s25, 0 }
  0x5e   : > { %s545_s19 = scalar_select %p544_p8, %s7182_s25, 1 }
  0x5f   : > { %561 = sbr.rel (%p4913_p7) target bundleno = 114 (0x72), region = 84 }
  0x60   : > { %s4909_s11 = sshll.u32 %s545_s19, 1  ;;  %s6365_s28 = sshll.u32 %s545_s19, 8 }
  0x61   : > { %s7293_s10 = scalar_lea.vmem %s9451_s4, %s4909_s11  ;;  %s7298_s13 = scalar_lea.vmem %s9453_s6, %s6365_s28 }
  0x62   : > { %s7303_s16 = scalar_lea.vmem %s9454_s7, %s4909_s11 }
  0x64   : > { %v562_v0 = vld [vmem:[%s9450_s3] sm:$0xff]  ;;  %v563_v1 = vld [vmem:[%s9450_s3 + $0x8] sm:$0xff]  ;;  %v564_v2 = vld [vmem:[%s9450_s3 + $0x10] sm:$0xff]  ;;  %v578_v3 = vlaneseq  ;;  %v7091_v14 = vmov 0   ;;  %vm594_vm5 = vcmask 130048  }
  0x65   : > { %570 = vst [vmem:[#allocation2 + $0x30] sm:$0xff] %v562_v0  ;;  %v565_v4 = vld [vmem:[%s9450_s3 + $0x18] sm:$0xff]  ;;  %v566_v5 = vld [vmem:[%s9450_s3 + $0x20] sm:$0xff]  ;;  %v567_v8 = vld [vmem:[%s9450_s3 + $0x28] sm:$0xff]  ;;  %v7092_v19 = vmov -1e+30  }
  0x66   : > { %571 = vst [vmem:[#allocation2] sm:$0xff] %v563_v1  ;;  %v579_v6 = vshrl.u32 %v578_v3, 7  ;;  %v582_v7 = vand.u32 127, %v578_v3  ;;  %v585_v9 = vld [vmem:[%s9447_s0] sm:$0x1]  ;;  %v568_v11 = vld [vmem:[%s9450_s3 + $0x30] sm:$0xff] }
  0x67   : > { %572 = vst [vmem:[#allocation2 + $0x18] sm:$0xff] %v564_v2  ;;  %v597_v10 = vld [vmem:[%s9447_s0 + $0x1] sm:$0x1]  ;;  %vm586_vm0 = vcmp.gt.f32.partialorder %v585_v9, 0.5  ;;  %v569_v13 = vld [vmem:[%s9450_s3 + $0x38] sm:$0xff] }
  0x68   : > { %573 = vst [vmem:[#allocation2 + $0x10] sm:$0xff] %v565_v4  ;;  %v580_v12 = vadd.s32 8, %v579_v6  ;;  %vm598_vm1 = vcmp.gt.f32.partialorder %v597_v10, 0.5  ;;  %v587_v15 = vsel %vm586_vm0, 1, %v7091_v14  ;;  %vm583_vm2 = vcmp.le.s32.totalorder %v582_v7, %v579_v6 }
  0x69   : > { %574 = vst [vmem:[#allocation2 + $0x8] sm:$0xff] %v566_v5  ;;  %v599_v16 = vsel %vm598_vm1, 1, %v7091_v14  ;;  %v588_v17 = vperm.slane %v587_v15, 0 }
  0x6a   : > { %575 = vst [vmem:[#allocation2 + $0x20] sm:$0xff] %v567_v8  ;;  %v600_v18 = vperm.slane %v599_v16, 0  ;;  %vm584_vm3 = vcmp.le.s32.totalorder %v582_v7, %v580_v12 }
  0x6b   : > { %576 = vst [vmem:[#allocation2 + $0x28] sm:$0xff] %v568_v11  ;;  %vm589_vm4 = vcmp.eq.s32.totalorder %v588_v17, 1 }
  0x6c   : > { %577 = vst [vmem:[#allocation2 + $0x38] sm:$0xff] %v569_v13  ;;  %vm601_vm6 = vcmp.eq.s32.totalorder %v600_v18, 1  ;;  %vm590_vm7 = vmand %vm583_vm2, %vm589_vm4 }
  0x6d   : > { %v592_v20 = vsel %vm590_vm7, 0.0, %v7092_v19  ;;  %vm591_vm8 = vmand %vm584_vm3, %vm589_vm4 }
  0x6e   : > { %595 = vst.msk [vmem:[#allocation4] sm:$0xff] %vm594_vm5, %v592_v20  ;;  %v593_v21 = vsel %vm591_vm8, 0.0, %v7092_v19  ;;  %vm602_vm9 = vmand %vm583_vm2, %vm601_vm6 }
  0x6f   : > { %596 = vst.msk [vmem:[#allocation4 + $0x8] sm:$0xff] %vm594_vm5, %v593_v21  ;;  %v604_v22 = vsel %vm602_vm9, 0.0, %v7092_v19  ;;  %vm603_vm10 = vmand %vm584_vm3, %vm601_vm6 }
  0x70   : > { %607 = vst.msk [vmem:[#allocation4 + $0x10] sm:$0xff] %vm594_vm5, %v604_v22  ;;  %v605_v23 = vsel %vm603_vm10, 0.0, %v7092_v19 }
  0x71   : > { %608 = vst.msk [vmem:[#allocation4 + $0x18] sm:$0xff] %vm594_vm5, %v605_v23 }
  0x72 PF: > { %v7340_v24 = vld [vmem:[#allocation2 + $0x8] sm:$0xff]  ;;  %v7342_v25 = vld [vmem:[#allocation2 + $0x20] sm:$0xff]  ;;  %v7344_v26 = vld [vmem:[#allocation2 + $0x30] sm:$0xff]  ;;  %v7093_v47 = vmov 256.0   ;;  %s9495_s28 = sld [smem:[#allocation28_spill]]  ;;  %vm1654_vm8 = vcmask 130048  }
  0x73   : > { %v630_v27 = vmul.f32 %v7340_v24, %v7340_v24  ;;  %v631_v28 = vmul.f32 %v7342_v25, %v7342_v25  ;;  %v7350_v29 = vld [vmem:[#allocation2] sm:$0xff]  ;;  %v626_v30 = vmul.f32 %v7344_v26, %v7344_v26  ;;  %v7356_v32 = vld [vmem:[#allocation2 + $0x28] sm:$0xff]  ;;  %v7358_v33 = vld [vmem:[#allocation2 + $0x38] sm:$0xff]  ;;  %6793 = vrcp.f32 %v7093_v47  ;;  %p6230_p10 = scmp.ne.s32.totalorder %s7182_s25, 1 }
  0x74   : > { %v627_v31 = vmul.f32 %v7350_v29, %v7350_v29  ;;  %v7360_v35 = vld [vmem:[#allocation2 + $0x18] sm:$0xff]  ;;  %v7362_v36 = vld [vmem:[#allocation2 + $0x10] sm:$0xff]  ;;  %v632_v38 = vmul.f32 %v7356_v32, %v7356_v32  ;;  %v633_v39 = vmul.f32 %v7358_v33, %v7358_v33  ;;  %v6411_v45 = vld [vmem:[%s7275_s15 + $0x164] sm:$0xf0]  ;;  %s9580_s14 = sld [smem:[#allocation30_spill]] (!%p6230_p10) }
  0x75   : > { %v640_v34 = vadd.f32 %v631_v28, %v630_v27  ;;  %v628_v40 = vmul.f32 %v7360_v35, %v7360_v35  ;;  %v629_v41 = vmul.f32 %v7362_v36, %v7362_v36  ;;  %v5084_v44 = vld [vmem:[%s7275_s15 + $0x150] sm:$0xf]  ;;  %v6459_v49 = vld [vmem:[%s7275_s15 + $0x2e4] sm:$0xf0]  ;;  %v6408_v50 = vld [vmem:[%s7275_s15 + $0x154] sm:$0xf] }
  0x76   : > { %v634_v37 = vadd.f32 %v627_v31, %v626_v30  ;;  %v643_v42 = vadd.f32 %v633_v39, %v632_v38  ;;  %v5276_v46 = vld [vmem:[%s7275_s15 + $0x2d0] sm:$0xf]  ;;  %v5085_v48 = vor.u32 %v6411_v45, %v5084_v44  ;;  %v5086_v51 = vld [vmem:[%s7275_s15 + $0x168] sm:$0xf0]  ;;  %v6456_v54 = vld [vmem:[%s7275_s15 + $0x2d4] sm:$0xf] }
  0x77   : > { %641 = vadd.xlane.f32.xlu1 %v640_v34  ;;  %v637_v43 = vadd.f32 %v629_v41, %v628_v40  ;;  %v5277_v52 = vor.u32 %v6459_v49, %v5276_v46  ;;  %v5089_v53 = vor.u32 %v6408_v50, %v5086_v51  ;;  %v5278_v55 = vld [vmem:[%s7275_s15 + $0x2e8] sm:$0xf0]  ;;  %v5060_v57 = vld [vmem:[%s7275_s15 + $0x120] sm:$0xf]  ;;  %v6405_v58 = vld [vmem:[%s7275_s15 + $0x134] sm:$0xf0] }
  0x78   : > { %635 = vadd.xlane.f32.xlu0 %v634_v37  ;;  %1302 = vmatpush.bf16.msra.mxu0 %v5085_v48  ;;  %v5281_v56 = vor.u32 %v6456_v54, %v5278_v55  ;;  %v5252_v59 = vld [vmem:[%s7275_s15 + $0x2a0] sm:$0xf]  ;;  %v5061_v60 = vor.u32 %v6405_v58, %v5060_v57  ;;  %v6453_v61 = vld [vmem:[%s7275_s15 + $0x2b4] sm:$0xf0]  ;;  %v6402_v62 = vld [vmem:[%s7275_s15 + $0x124] sm:$0xf] }
  0x79   : > { %1321 = vmatpush.bf16.msra.mxu1 %v5277_v52  ;;  %1340 = vmatpush.bf16.msra.mxu2 %v5089_v53  ;;  %v5062_v63 = vld [vmem:[%s7275_s15 + $0x138] sm:$0xf0]  ;;  %v5253_v0 = vor.u32 %v6453_v61, %v5252_v59  ;;  %v6450_v2 = vld [vmem:[%s7275_s15 + $0x2a4] sm:$0xf]  ;;  %v7388_v4 = vpop.eup %6793  ;;  %v5036_v6 = vld [vmem:[%s7275_s15 + $0xf0] sm:$0xf] }
  0x7a   : > { %1359 = vmatpush.bf16.msra.mxu3 %v5281_v56  ;;  %v5065_v1 = vor.u32 %v6402_v62, %v5062_v63  ;;  %v5254_v3 = vld [vmem:[%s7275_s15 + $0x2b8] sm:$0xf0]  ;;  %v6399_v7 = vld [vmem:[%s7275_s15 + $0x104] sm:$0xf0]  ;;  %v5228_v8 = vld [vmem:[%s7275_s15 + $0x270] sm:$0xf]  ;;  %vm651_vm11 = vweird.f32 %v7388_v4 }
  0x7b   : > { %v5257_v5 = vor.u32 %v6450_v2, %v5254_v3  ;;  %v5037_v9 = vor.u32 %v6399_v7, %v5036_v6  ;;  %v6447_v10 = vld [vmem:[%s7275_s15 + $0x284] sm:$0xf0]  ;;  %v6396_v11 = vld [vmem:[%s7275_s15 + $0xf4] sm:$0xf]  ;;  %v5038_v12 = vld [vmem:[%s7275_s15 + $0x108] sm:$0xf0] }
  0x7c   : > { %1303 = vmatpush.bf16.msra.mxu0 %v5061_v60  ;;  %v647_v13 = vmul.f32 256.0, %v7388_v4  ;;  %v5229_v14 = vor.u32 %v6447_v10, %v5228_v8  ;;  %v5041_v15 = vor.u32 %v6396_v11, %v5038_v12  ;;  %v6444_v16 = vld [vmem:[%s7275_s15 + $0x274] sm:$0xf]  ;;  %v5230_v17 = vld [vmem:[%s7275_s15 + $0x288] sm:$0xf0] }
  0x7d   : > { %1322 = vmatpush.bf16.msra.mxu1 %v5253_v0  ;;  %1341 = vmatpush.bf16.msra.mxu2 %v5065_v1  ;;  %v5233_v18 = vor.u32 %v6444_v16, %v5230_v17  ;;  %v5012_v19 = vld [vmem:[%s7275_s15 + $0xc0] sm:$0xf]  ;;  %v6393_v20 = vld [vmem:[%s7275_s15 + $0xd4] sm:$0xf0]  ;;  %v6390_v27 = vld [vmem:[%s7275_s15 + $0xc4] sm:$0xf] }
  0x7e   : > { %1360 = vmatpush.bf16.msra.mxu3 %v5257_v5  ;;  %v5204_v21 = vld [vmem:[%s7275_s15 + $0x240] sm:$0xf]  ;;  %v5013_v22 = vor.u32 %v6393_v20, %v5012_v19  ;;  %v6441_v23 = vld [vmem:[%s7275_s15 + $0x254] sm:$0xf0]  ;;  %v5014_v28 = vld [vmem:[%s7275_s15 + $0xd8] sm:$0xf0] }
  0x7f   : > { %644 = vadd.xlane.f32.xlu1 %v643_v42  ;;  %v648_v30 = vsub.f32 1.0, %v647_v13  ;;  %v5205_v31 = vor.u32 %v6441_v23, %v5204_v21  ;;  %v5017_v34 = vor.u32 %v6390_v27, %v5014_v28  ;;  %v6438_v37 = vld [vmem:[%s7275_s15 + $0x244] sm:$0xf]  ;;  %v5206_v38 = vld [vmem:[%s7275_s15 + $0x258] sm:$0xf0] }
  0x80   : > { %638 = vadd.xlane.f32.xlu0 %v637_v43  ;;  %1304 = vmatpush.bf16.msra.mxu0 %v5037_v9  ;;  %v5209_v39 = vor.u32 %v6438_v37, %v5206_v38  ;;  %v4988_v40 = vld [vmem:[%s7275_s15 + $0x90] sm:$0xf]  ;;  %v6387_v41 = vld [vmem:[%s7275_s15 + $0xa4] sm:$0xf0]  ;;  %v6384_v45 = vld [vmem:[%s7275_s15 + $0x94] sm:$0xf] }
  0x81   : > { %1323 = vmatpush.bf16.msra.mxu1 %v5229_v14  ;;  %1342 = vmatpush.bf16.msra.mxu2 %v5041_v15  ;;  %v5180_v42 = vld [vmem:[%s7275_s15 + $0x210] sm:$0xf]  ;;  %v4989_v43 = vor.u32 %v6387_v41, %v4988_v40  ;;  %v6435_v44 = vld [vmem:[%s7275_s15 + $0x224] sm:$0xf0]  ;;  %v4990_v46 = vld [vmem:[%s7275_s15 + $0xa8] sm:$0xf0]  ;;  %v649_v47 = vmul.f32 %v7388_v4, %v648_v30 }
  0x82   : > { %1361 = vmatpush.bf16.msra.mxu3 %v5233_v18  ;;  %v5181_v48 = vor.u32 %v6435_v44, %v5180_v42  ;;  %v4993_v49 = vor.u32 %v6384_v45, %v4990_v46  ;;  %v6432_v50 = vld [vmem:[%s7275_s15 + $0x214] sm:$0xf]  ;;  %v5182_v51 = vld [vmem:[%s7275_s15 + $0x228] sm:$0xf0]  ;;  %v4964_v53 = vld [vmem:[%s7275_s15 + $0x60] sm:$0xf] }
  0x83   : > { %v5185_v52 = vor.u32 %v6432_v50, %v5182_v51  ;;  %v6381_v54 = vld [vmem:[%s7275_s15 + $0x74] sm:$0xf0]  ;;  %v5156_v55 = vld [vmem:[%s7275_s15 + $0x1e0] sm:$0xf]  ;;  %v6378_v58 = vld [vmem:[%s7275_s15 + $0x64] sm:$0xf]  ;;  %v650_v60 = vadd.f32 %v7388_v4, %v649_v47 }
  0x84   : > { %1305 = vmatpush.bf16.msra.mxu0 %v5013_v22  ;;  %v4965_v56 = vor.u32 %v6381_v54, %v4964_v53  ;;  %v6429_v57 = vld [vmem:[%s7275_s15 + $0x1f4] sm:$0xf0]  ;;  %v4966_v59 = vld [vmem:[%s7275_s15 + $0x78] sm:$0xf0]  ;;  %v6426_v63 = vld [vmem:[%s7275_s15 + $0x1e4] sm:$0xf] }
  0x85   : > { %1324 = vmatpush.bf16.msra.mxu1 %v5205_v31  ;;  %1343 = vmatpush.bf16.msra.mxu2 %v5017_v34  ;;  %v5157_v61 = vor.u32 %v6429_v57, %v5156_v55  ;;  %v4969_v62 = vor.u32 %v6378_v58, %v4966_v59  ;;  %v5158_v0 = vld [vmem:[%s7275_s15 + $0x1f8] sm:$0xf0]  ;;  %v4940_v2 = vld [vmem:[%s7275_s15 + $0x30] sm:$0xf]  ;;  %v6375_v3 = vld [vmem:[%s7275_s15 + $0x44] sm:$0xf0]  ;;  %v7433_v10 = vsel %vm651_vm11, %v7388_v4, %v650_v60 }
  0x86   : > { %1362 = vmatpush.bf16.msra.mxu3 %v5209_v39  ;;  %v5161_v1 = vor.u32 %v6426_v63, %v5158_v0  ;;  %v5132_v5 = vld [vmem:[%s7275_s15 + $0x1b0] sm:$0xf]  ;;  %v4941_v6 = vor.u32 %v6375_v3, %v4940_v2  ;;  %v6423_v7 = vld [vmem:[%s7275_s15 + $0x1c4] sm:$0xf0]  ;;  %v6372_v8 = vld [vmem:[%s7275_s15 + $0x34] sm:$0xf] }
  0x87   : > { %v4942_v9 = vld [vmem:[%s7275_s15 + $0x48] sm:$0xf0]  ;;  %9488 = vst [vmem:[#allocation18_spill] sm:$0xff] %v7433_v10  ;;  %v5133_v11 = vor.u32 %v6423_v7, %v5132_v5  ;;  %v6420_v13 = vld [vmem:[%s7275_s15 + $0x1b4] sm:$0xf] }
  0x88   : > { %1306 = vmatpush.bf16.msra.mxu0 %v4989_v43  ;;  %v4945_v12 = vor.u32 %v6372_v8, %v4942_v9  ;;  %v5134_v14 = vld [vmem:[%s7275_s15 + $0x1c8] sm:$0xf0]  ;;  %v4916_v17 = vld [vmem:[%s7275_s15] sm:$0xf]  ;;  %v6369_v18 = vld [vmem:[%s7275_s15 + $0x14] sm:$0xf0] }
  0x89   : > { %1325 = vmatpush.bf16.msra.mxu1 %v5181_v48  ;;  %1344 = vmatpush.bf16.msra.mxu2 %v4993_v49  ;;  %v5137_v15 = vor.u32 %v6420_v13, %v5134_v14  ;;  %v5108_v19 = vld [vmem:[%s7275_s15 + $0x180] sm:$0xf]  ;;  %v4917_v21 = vor.u32 %v6369_v18, %v4916_v17  ;;  %v6417_v22 = vld [vmem:[%s7275_s15 + $0x194] sm:$0xf0]  ;;  %v6366_v23 = vld [vmem:[%s7275_s15 + $0x4] sm:$0xf] }
  0x8a   : > { %1363 = vmatpush.bf16.msra.mxu3 %v5185_v52  ;;  %v4918_v27 = vld [vmem:[%s7275_s15 + $0x18] sm:$0xf0]  ;;  %v5109_v30 = vor.u32 %v6417_v22, %v5108_v19  ;;  %v6414_v34 = vld [vmem:[%s7275_s15 + $0x184] sm:$0xf]  ;;  %v5092_v41 = vld [vmem:[%s7275_s15 + $0x158] sm:$0xf] }
  0x8b   : > { %v4921_v31 = vor.u32 %v6366_v23, %v4918_v27  ;;  %v5110_v37 = vld [vmem:[%s7275_s15 + $0x198] sm:$0xf0]  ;;  %v6412_v42 = vld [vmem:[%s7275_s15 + $0x16c] sm:$0xf0]  ;;  %v5284_v43 = vld [vmem:[%s7275_s15 + $0x2d8] sm:$0xf] }
  0x8c   : > { %1307 = vmatpush.bf16.msra.mxu0 %v4965_v56  ;;  %v5113_v38 = vor.u32 %v6414_v34, %v5110_v37  ;;  %v5093_v44 = vor.u32 %v6412_v42, %v5092_v41  ;;  %v6460_v45 = vld [vmem:[%s7275_s15 + $0x2ec] sm:$0xf0]  ;;  %v6409_v46 = vld [vmem:[%s7275_s15 + $0x15c] sm:$0xf]  ;;  %v5094_v47 = vld [vmem:[%s7275_s15 + $0x170] sm:$0xf0] }
  0x8d   : > { %1326 = vmatpush.bf16.msra.mxu1 %v5157_v61  ;;  %1345 = vmatpush.bf16.msra.mxu2 %v4969_v62  ;;  %v5285_v48 = vor.u32 %v6460_v45, %v5284_v43  ;;  %v5097_v49 = vor.u32 %v6409_v46, %v5094_v47  ;;  %v6457_v50 = vld [vmem:[%s7275_s15 + $0x2dc] sm:$0xf]  ;;  %v5286_v51 = vld [vmem:[%s7275_s15 + $0x2f0] sm:$0xf0]  ;;  %v5068_v52 = vld [vmem:[%s7275_s15 + $0x128] sm:$0xf] }
  0x8e   : > { %1364 = vmatpush.bf16.msra.mxu3 %v5161_v1  ;;  %v5289_v54 = vor.u32 %v6457_v50, %v5286_v51  ;;  %v6406_v55 = vld [vmem:[%s7275_s15 + $0x13c] sm:$0xf0]  ;;  %v5260_v56 = vld [vmem:[%s7275_s15 + $0x2a8] sm:$0xf]  ;;  %v6403_v62 = vld [vmem:[%s7275_s15 + $0x12c] sm:$0xf] }
  0x8f   : > { %v6454_v57 = vld [vmem:[%s7275_s15 + $0x2bc] sm:$0xf0]  ;;  %v5069_v60 = vor.u32 %v6406_v55, %v5068_v52  ;;  %v5070_v63 = vld [vmem:[%s7275_s15 + $0x140] sm:$0xf0]  ;;  %v6451_v0 = vld [vmem:[%s7275_s15 + $0x2ac] sm:$0xf] }
  0x90   : > { %1308 = vmatpush.bf16.msra.mxu0 %v4941_v6  ;;  %v5261_v61 = vor.u32 %v6454_v57, %v5260_v56  ;;  %v5073_v2 = vor.u32 %v6403_v62, %v5070_v63  ;;  %v5262_v3 = vld [vmem:[%s7275_s15 + $0x2c0] sm:$0xf0]  ;;  %v5044_v5 = vld [vmem:[%s7275_s15 + $0xf8] sm:$0xf]  ;;  %v6400_v6 = vld [vmem:[%s7275_s15 + $0x10c] sm:$0xf0] }
  0x91   : > { %1327 = vmatpush.bf16.msra.mxu1 %v5133_v11  ;;  %1346 = vmatpush.bf16.msra.mxu2 %v4945_v12  ;;  %v5265_v8 = vor.u32 %v6451_v0, %v5262_v3  ;;  %v5236_v9 = vld [vmem:[%s7275_s15 + $0x278] sm:$0xf]  ;;  %v6448_v11 = vld [vmem:[%s7275_s15 + $0x28c] sm:$0xf0]  ;;  %v5045_v14 = vor.u32 %v6400_v6, %v5044_v5  ;;  %v6445_v19 = vld [vmem:[%s7275_s15 + $0x27c] sm:$0xf] }
  0x92   : > { %1365 = vmatpush.bf16.msra.mxu3 %v5137_v15  ;;  %v6397_v15 = vld [vmem:[%s7275_s15 + $0xfc] sm:$0xf]  ;;  %v5237_v18 = vor.u32 %v6448_v11, %v5236_v9  ;;  %v6394_v22 = vld [vmem:[%s7275_s15 + $0xdc] sm:$0xf0]  ;;  %v6391_v34 = vld [vmem:[%s7275_s15 + $0xcc] sm:$0xf] }
  0x93   : > { %v6439_v41 = vld [vmem:[%s7275_s15 + $0x24c] sm:$0xf]  ;;  %v5214_v45 = vld [vmem:[%s7275_s15 + $0x260] sm:$0xf0]  ;;  %v625_v52 = vld [vmem:[%s7293_s10] sm:$0x3] }
  0x94   : > { %1309 = vmatpush.bf16.msra.mxu0 %v4917_v21  ;;  %v5020_v21 = vld [vmem:[%s7275_s15 + $0xc8] sm:$0xf]  ;;  %v5217_v47 = vor.u32 %v6439_v41, %v5214_v45  ;;  %v6388_v55 = vld [vmem:[%s7275_s15 + $0xac] sm:$0xf0]  ;;  %v6385_v63 = vld [vmem:[%s7275_s15 + $0x9c] sm:$0xf] }
  0x95   : > { %1328 = vmatpush.bf16.msra.mxu1 %v5109_v30  ;;  %1347 = vmatpush.bf16.msra.mxu2 %v4921_v31  ;;  %v5212_v30 = vld [vmem:[%s7275_s15 + $0x248] sm:$0xf]  ;;  %v6442_v31 = vld [vmem:[%s7275_s15 + $0x25c] sm:$0xf0]  ;;  %v5021_v37 = vor.u32 %v6394_v22, %v5020_v21  ;;  %v4998_v0 = vld [vmem:[%s7275_s15 + $0xb0] sm:$0xf0] }
  0x96   : > { %1366 = vmatpush.bf16.msra.mxu3 %v5113_v38  ;;  %v5022_v38 = vld [vmem:[%s7275_s15 + $0xe0] sm:$0xf0]  ;;  %v5213_v43 = vor.u32 %v6442_v31, %v5212_v30  ;;  %v5190_v5 = vld [vmem:[%s7275_s15 + $0x230] sm:$0xf0]  ;;  %v4972_v6 = vld [vmem:[%s7275_s15 + $0x68] sm:$0xf]  ;;  %v5001_v11 = vor.u32 %v6385_v63, %v4998_v0 }
  0x97   : > { %v4974_v22 = vld [vmem:[%s7275_s15 + $0x80] sm:$0xf0]  ;;  %v4948_v31 = vld [vmem:[%s7275_s15 + $0x38] sm:$0xf] }
  0x98   : > { %1378 = vmatpush.bf16.msrb.mxu0 %v5093_v44  ;;  %v5025_v44 = vor.u32 %v6391_v34, %v5022_v38  ;;  %v5166_v30 = vld [vmem:[%s7275_s15 + $0x200] sm:$0xf0]  ;;  %v6376_v34 = vld [vmem:[%s7275_s15 + $0x4c] sm:$0xf0] }
  0x99   : > { %1397 = vmatpush.bf16.msrb.mxu1 %v5285_v48  ;;  %1416 = vmatpush.bf16.msrb.mxu2 %v5097_v49  ;;  %v4949_v41 = vor.u32 %v6376_v34, %v4948_v31  ;;  %v4926_v63 = vld [vmem:[%s7275_s15 + $0x20] sm:$0xf0]  ;;  %v6407_v34 = vld [vmem:[%s7275_s15 + $0x144] sm:$0xf0] }
  0x9a   : > { %1435 = vmatpush.bf16.msrb.mxu3 %v5289_v54  ;;  %v4996_v54 = vld [vmem:[%s7275_s15 + $0x98] sm:$0xf]  ;;  %v6410_v21 = vld [vmem:[%s7275_s15 + $0x164] sm:$0xf] }
  0x9c   : > { %1379 = vmatpush.bf16.msrb.mxu0 %v5069_v60  ;;  %v6436_v60 = vld [vmem:[%s7275_s15 + $0x22c] sm:$0xf0] }
  0x9d   : > { %1398 = vmatpush.bf16.msrb.mxu1 %v5261_v61  ;;  %1417 = vmatpush.bf16.msrb.mxu2 %v5073_v2  ;;  %v7523_v2 = vperm.slane %v625_v52, 0 }
  0x9e   : > { %1436 = vmatpush.bf16.msrb.mxu3 %v5265_v8  ;;  %v7529_v8 = vperm.slane %v625_v52, 1  ;;  %v5142_v52 = vld [vmem:[%s7275_s15 + $0x1d0] sm:$0xf0] }
  0xa0   : > { %1380 = vmatpush.bf16.msrb.mxu0 %v5045_v14  ;;  %v6382_v14 = vld [vmem:[%s7275_s15 + $0x7c] sm:$0xf0] }
  0xa1   : > { %1399 = vmatpush.bf16.msrb.mxu1 %v5237_v18  ;;  %v6430_v18 = vld [vmem:[%s7275_s15 + $0x1fc] sm:$0xf0] }
  0xa4   : > { %1381 = vmatpush.bf16.msrb.mxu0 %v5021_v37 }
  0xa5   : > { %1400 = vmatpush.bf16.msrb.mxu1 %v5213_v43  ;;  %v6424_v43 = vld [vmem:[%s7275_s15 + $0x1cc] sm:$0xf0] }
  0xea   : > { %v642_v16 = vpop.xlane.xlu1 %641 }
  0xeb   : > { %v655_v4 = vmul.f32 %v7433_v10, %v642_v16  ;;  %v636_v20 = vpop.xlane.xlu0 %635  ;;  %v5046_v16 = vld [vmem:[%s7275_s15 + $0x110] sm:$0xf0] }
  0xec   : > { %v653_v28 = vmul.f32 %v7433_v10, %v636_v20  ;;  %v5049_v20 = vor.u32 %v6397_v15, %v5046_v16  ;;  %v5164_v15 = vld [vmem:[%s7275_s15 + $0x1e8] sm:$0xf] }
  0xed   : > { %v7447_v39 = vadd.f32 1e-06, %v655_v4  ;;  %v5238_v4 = vld [vmem:[%s7275_s15 + $0x290] sm:$0xf0] }
  0xee   : > { %v7449_v40 = vadd.f32 1e-06, %v653_v28  ;;  %v5241_v28 = vor.u32 %v6445_v19, %v5238_v4  ;;  %1418 = vmatpush.bf16.msrb.mxu2 %v5049_v20  ;;  %v6379_v19 = vld [vmem:[%s7275_s15 + $0x6c] sm:$0xf] }
  0xef   : > { %vm687_vm2 = vweird.f32 %v7447_v39 }
  0xf0   : > { %6795 = vrsqrt.f32 %v7449_v40  ;;  %1437 = vmatpush.bf16.msrb.mxu3 %v5241_v28  ;;  %vm667_vm13 = vweird.f32 %v7449_v40  ;;  %v4977_v28 = vor.u32 %v6379_v19, %v4974_v22 }
  0xf1   : > { %6797 = vrsqrt.f32 %v7447_v39 }
  0xf2   : > { %v645_v53 = vpop.xlane.xlu1 %644  ;;  %1419 = vmatpush.bf16.msrb.mxu2 %v5025_v44  ;;  %v6373_v44 = vld [vmem:[%s7275_s15 + $0x3c] sm:$0xf] }
  0xf3   : > { %v656_v58 = vmul.f32 %v7433_v10, %v645_v53  ;;  %v639_v59 = vpop.xlane.xlu0 %638 }
  0xf4   : > { %v654_v1 = vmul.f32 %v7433_v10, %v639_v59  ;;  %1438 = vmatpush.bf16.msrb.mxu3 %v5217_v47  ;;  %v5188_v59 = vld [vmem:[%s7275_s15 + $0x218] sm:$0xf] }
  0xf5   : > { %v7473_v7 = vadd.f32 1e-06, %v656_v58  ;;  %v4997_v58 = vor.u32 %v6388_v55, %v4996_v54  ;;  %v5189_v3 = vor.u32 %v6436_v60, %v5188_v59  ;;  %v6370_v55 = vld [vmem:[%s7275_s15 + $0x1c] sm:$0xf0]  ;;  %v5116_v60 = vld [vmem:[%s7275_s15 + $0x188] sm:$0xf] }
  0xf6   : > { %v7477_v12 = vpop.eup %6795  ;;  %v7479_v13 = vadd.f32 1e-06, %v654_v1  ;;  %v6433_v1 = vld [vmem:[%s7275_s15 + $0x21c] sm:$0xf]  ;;  %1420 = vmatpush.bf16.msrb.mxu2 %v5001_v11 }
  0xf7   : > { %v662_v17 = vmul.f32 %v7477_v12, %v7449_v40  ;;  %6799 = vrsqrt.f32 %v7473_v7  ;;  %v7491_v23 = vpop.eup %6797  ;;  %vm668_vm12 = vweird.f32 %v7477_v12  ;;  %1382 = vmatpush.bf16.msrb.mxu0 %v4997_v58  ;;  %1401 = vmatpush.bf16.msrb.mxu1 %v5189_v3  ;;  %vm697_vm4 = vweird.f32 %v7473_v7  ;;  %v6415_v3 = vld [vmem:[%s7275_s15 + $0x18c] sm:$0xf] }
  0xf8   : > { %6801 = vrsqrt.f32 %v7479_v13  ;;  %v682_v46 = vmul.f32 %v7491_v23, %v7447_v39  ;;  %vm669_vm15 = vmor %vm667_vm13, %vm668_vm12  ;;  %vm677_vm0 = vweird.f32 %v7479_v13  ;;  %vm688_vm3 = vweird.f32 %v7491_v23 }
  0xf9   : > { %v663_v27 = vmul.f32 %v7477_v12, %v662_v17  ;;  %v5193_v17 = vor.u32 %v6433_v1, %v5190_v5  ;;  %v5118_v5 = vld [vmem:[%s7275_s15 + $0x1a0] sm:$0xf0]  ;;  %vm7590_vm6 = vmor %vm687_vm2, %vm688_vm3 }
  0xfa   : > { %v683_v56 = vmul.f32 %v7491_v23, %v682_v46  ;;  %1421 = vmatpush.bf16.msrb.mxu2 %v4977_v28  ;;  %v5294_v28 = vld [vmem:[%s7275_s15 + $0x2f8] sm:$0xf0] }
  0xfb   : > { %v664_v42 = vmul.f32 0.5, %v663_v27  ;;  %v6427_v27 = vld [vmem:[%s7275_s15 + $0x1ec] sm:$0xf]  ;;  %1439 = vmatpush.bf16.msrb.mxu3 %v5193_v17  ;;  %v6413_v17 = vld [vmem:[%s7275_s15 + $0x174] sm:$0xf0] }
  0xfc   : > { %v7535_v40 = vmul.f32 0.5, %v683_v56  ;;  %v5169_v38 = vor.u32 %v6427_v27, %v5166_v30  ;;  %v6458_v27 = vld [vmem:[%s7275_s15 + $0x2e4] sm:$0xf]  ;;  %v5076_v30 = vld [vmem:[%s7275_s15 + $0x130] sm:$0xf] }
  0xfd   : > { %v7502_v48 = vpop.eup %6799  ;;  %v665_v49 = vsub.f32 1.5, %v664_v42  ;;  %v5140_v42 = vld [vmem:[%s7275_s15 + $0x1b8] sm:$0xf]  ;;  %v5297_v31 = vor.u32 %v6458_v27, %v5294_v28 }
  0xfe   : > { %v7504_v50 = vpop.eup %6801  ;;  %v692_v51 = vmul.f32 %v7502_v48, %v7473_v7  ;;  %v5141_v47 = vor.u32 %v6424_v43, %v5140_v42  ;;  %vm698_vm5 = vweird.f32 %v7502_v48  ;;  %v5100_v7 = vld [vmem:[%s7275_s15 + $0x160] sm:$0xf]  ;;  %v5077_v42 = vor.u32 %v6407_v34, %v5076_v30  ;;  %v6404_v43 = vld [vmem:[%s7275_s15 + $0x134] sm:$0xf]  ;;  %v6383_v30 = vld [vmem:[%s7275_s15 + $0x84] sm:$0xf0] }
  0xff   : > { %v672_v53 = vmul.f32 %v7504_v50, %v7479_v13  ;;  %v666_v57 = vmul.f32 %v7477_v12, %v665_v49  ;;  %vm678_vm14 = vweird.f32 %v7504_v50  ;;  %v5165_v13 = vor.u32 %v6430_v18, %v5164_v15  ;;  %v4950_v49 = vld [vmem:[%s7275_s15 + $0x50] sm:$0xf0]  ;;  %1440 = vmatpush.bf16.msrb.mxu3 %v5169_v38  ;;  %vm7598_vm7 = vmor %vm697_vm4, %vm698_vm5  ;;  %v5292_v18 = vld [vmem:[%s7275_s15 + $0x2e0] sm:$0xf] }
 0x100   : > { %v693_v61 = vmul.f32 %v7502_v48, %v692_v51  ;;  %vm7545_vm1 = vmor %vm677_vm0, %vm678_vm14  ;;  %v6421_v51 = vld [vmem:[%s7275_s15 + $0x1bc] sm:$0xf]  ;;  %v6455_v38 = vld [vmem:[%s7275_s15 + $0x2c4] sm:$0xf0] }
 0x101   : > { %v673_v62 = vmul.f32 %v7504_v50, %v672_v53  ;;  %v670_v16 = vsel %vm669_vm15, %v7477_v12, %v666_v57  ;;  %v4973_v12 = vor.u32 %v6382_v14, %v4972_v6  ;;  %1402 = vmatpush.bf16.msrb.mxu1 %v5165_v13  ;;  %v685_v53 = vsub.f32 1.5, %v7535_v40  ;;  %v6431_v34 = vld [vmem:[%s7275_s15 + $0x204] sm:$0xf0] }
 0x102   : > { %v7541_v4 = vmul.f32 0.5, %v693_v61  ;;  %v701_v45 = vmul.f32 %v670_v16, %v7344_v26  ;;  %v702_v46 = vmul.f32 %v670_v16, %v7350_v29  ;;  %v4953_v26 = vor.u32 %v6373_v44, %v4950_v49  ;;  %v4924_v29 = vld [vmem:[%s7275_s15 + $0x8] sm:$0xf]  ;;  %v6418_v61 = vld [vmem:[%s7275_s15 + $0x19c] sm:$0xf0] }
 0x103   : > { %v674_v9 = vmul.f32 0.5, %v673_v62  ;;  %1383 = vmatpush.bf16.msrb.mxu0 %v4973_v12  ;;  %v5145_v59 = vor.u32 %v6421_v51, %v5142_v52  ;;  %v6367_v62 = vld [vmem:[%s7275_s15 + $0xc] sm:$0xf]  ;;  %v5117_v39 = vor.u32 %v6418_v61, %v5116_v60  ;;  %v5121_v16 = vor.u32 %v6415_v3, %v5118_v5  ;;  %v5102_v12 = vld [vmem:[%s7275_s15 + $0x178] sm:$0xf0] }
 0x104   : > { %v695_v56 = vsub.f32 1.5, %v7541_v4  ;;  %v714_v0 = vmul.f32 %v7523_v2, %v701_v45  ;;  %1422 = vmatpush.bf16.msrb.mxu2 %v4953_v26  ;;  %v4929_v15 = vor.u32 %v6367_v62, %v4926_v63  ;;  %v686_v19 = vmul.f32 %v7491_v23, %v685_v53  ;;  %v5078_v44 = vld [vmem:[%s7275_s15 + $0x148] sm:$0xf0]  ;;  %v6452_v45 = vld [vmem:[%s7275_s15 + $0x2b4] sm:$0xf] }
 0x105   : > { %v675_v20 = vsub.f32 1.5, %v674_v9  ;;  %1403 = vmatpush.bf16.msrb.mxu1 %v5141_v47  ;;  %1441 = vmatpush.bf16.msrb.mxu3 %v5145_v59  ;;  %v5101_v4 = vor.u32 %v6413_v17, %v5100_v7  ;;  %v5105_v22 = vor.u32 %v6410_v21, %v5102_v12  ;;  %v5270_v49 = vld [vmem:[%s7275_s15 + $0x2c8] sm:$0xf0]  ;;  %v5052_v51 = vld [vmem:[%s7275_s15 + $0x100] sm:$0xf] }
 0x106   : > { %v696_v40 = vmul.f32 %v7502_v48, %v695_v56  ;;  %v6401_v52 = vld [vmem:[%s7275_s15 + $0x114] sm:$0xf0]  ;;  %v5273_v53 = vor.u32 %v6452_v45, %v5270_v49  ;;  %v5054_v56 = vld [vmem:[%s7275_s15 + $0x118] sm:$0xf0]  ;;  %v5030_v3 = vld [vmem:[%s7275_s15 + $0xe8] sm:$0xf0] }
 0x107   : > { %v676_v37 = vmul.f32 %v7504_v50, %v675_v20  ;;  %1384 = vmatpush.bf16.msrb.mxu0 %v4949_v41  ;;  %v6461_v20 = vld [vmem:[%s7275_s15 + $0x2f4] sm:$0xf0]  ;;  %v5053_v60 = vor.u32 %v6401_v52, %v5052_v51  ;;  %v6440_v9 = vld [vmem:[%s7275_s15 + $0x254] sm:$0xf]  ;;  %v5006_v21 = vld [vmem:[%s7275_s15 + $0xb8] sm:$0xf0] }
 0x108   : > { %v5293_v13 = vor.u32 %v6461_v20, %v5292_v18  ;;  %1423 = vmatpush.bf16.msrb.mxu2 %v4929_v15  ;;  %v700_v41 = vsel %vm7598_vm7, %v7502_v48, %v696_v40  ;;  %v5081_v48 = vor.u32 %v6404_v43, %v5078_v44  ;;  %v6449_v26 = vld [vmem:[%s7275_s15 + $0x294] sm:$0xf0]  ;;  %v5196_v18 = vld [vmem:[%s7275_s15 + $0x220] sm:$0xf]  ;;  %v6386_v20 = vld [vmem:[%s7275_s15 + $0xa4] sm:$0xf] }
 0x109   : > { %v680_v54 = vsel %vm7545_vm1, %v7504_v50, %v676_v37  ;;  %v4925_v50 = vor.u32 %v6370_v55, %v4924_v29  ;;  %1404 = vmatpush.bf16.msrb.mxu1 %v5117_v39  ;;  %v5268_v37 = vld [vmem:[%s7275_s15 + $0x2b0] sm:$0xf]  ;;  %1442 = vmatpush.bf16.msrb.mxu3 %v5121_v16  ;;  %v6398_v29 = vld [vmem:[%s7275_s15 + $0x104] sm:$0xf]  ;;  %v707_v55 = vmul.f32 %v700_v41, %v7356_v32  ;;  %v5222_v39 = vld [vmem:[%s7275_s15 + $0x268] sm:$0xf0] }
 0x10a   : > { %v703_v57 = vmul.f32 %v680_v54, %v7360_v35  ;;  %v704_v58 = vmul.f32 %v680_v54, %v7362_v36  ;;  %v715_v35 = vmul.f32 %v7529_v8, %v702_v46  ;;  %v690_v46 = vsel %vm7590_vm6, %v7491_v23, %v686_v19  ;;  %v5244_v54 = vld [vmem:[%s7275_s15 + $0x280] sm:$0xf]  ;;  %v5028_v32 = vld [vmem:[%s7275_s15 + $0xd0] sm:$0xf]  ;;  %v6389_v17 = vld [vmem:[%s7275_s15 + $0xb4] sm:$0xf0] }
 0x10b   : > { %1385 = vmatpush.bf16.msrb.mxu0 %v4925_v50  ;;  %v5269_v47 = vor.u32 %v6455_v38, %v5268_v37  ;;  %v708_v23 = vmul.f32 %v700_v41, %v7358_v33  ;;  %v705_v59 = vmul.f32 %v690_v46, %v7340_v24  ;;  %v706_v50 = vmul.f32 %v690_v46, %v7342_v25  ;;  %v6395_v33 = vld [vmem:[%s7275_s15 + $0xe4] sm:$0xf0]  ;;  %v6392_v25 = vld [vmem:[%s7275_s15 + $0xd4] sm:$0xf]  ;;  %v6434_v12 = vld [vmem:[%s7275_s15 + $0x224] sm:$0xf] }
 0x10c   : > { %v716_v36 = vmul.f32 %v7523_v2, %v703_v57  ;;  %v717_v1 = vmul.f32 %v7529_v8, %v704_v58  ;;  %v6446_v57 = vld [vmem:[%s7275_s15 + $0x284] sm:$0xf]  ;;  %v5246_v58 = vld [vmem:[%s7275_s15 + $0x298] sm:$0xf0]  ;;  %v5245_v61 = vor.u32 %v6449_v26, %v5244_v54  ;;  %v5057_v62 = vor.u32 %v6398_v29, %v5054_v56  ;;  %v6380_v41 = vld [vmem:[%s7275_s15 + $0x74] sm:$0xf] }
 0x10d   : > { %v5249_v63 = vor.u32 %v6446_v57, %v5246_v58  ;;  %v721_v24 = vmul.f32 %v7529_v8, %v708_v23  ;;  %v718_v5 = vmul.f32 %v7523_v2, %v705_v59  ;;  %v719_v6 = vmul.f32 %v7529_v8, %v706_v50  ;;  %v5004_v8 = vld [vmem:[%s7275_s15 + $0xa0] sm:$0xf]  ;;  %v6428_v43 = vld [vmem:[%s7275_s15 + $0x1f4] sm:$0xf]  ;;  %v5174_v44 = vld [vmem:[%s7275_s15 + $0x208] sm:$0xf0] }
 0x10e   : > { %v7602_v11 = vpack.c.bf16 %v716_v36, %v714_v0  ;;  %v7604_v14 = vpack.c.bf16 %v717_v1, %v715_v35  ;;  %v720_v0 = vmul.f32 %v7523_v2, %v707_v55  ;;  %v5220_v35 = vld [vmem:[%s7275_s15 + $0x250] sm:$0xf]  ;;  %v5029_v36 = vor.u32 %v6395_v33, %v5028_v32  ;;  %v6443_v1 = vld [vmem:[%s7275_s15 + $0x264] sm:$0xf0]  ;;  %v4956_v45 = vld [vmem:[%s7275_s15 + $0x40] sm:$0xf] }
 0x10f   : > { %v7660_v40 = vpack.c.bf16 %v721_v24, %v719_v6  ;;  %v5221_v16 = vor.u32 %v6443_v1, %v5220_v35  ;;  %v5033_v7 = vor.u32 %v6392_v25, %v5030_v3  ;;  %v5225_v2 = vor.u32 %v6440_v9, %v5222_v39  ;;  %v6377_v46 = vld [vmem:[%s7275_s15 + $0x54] sm:$0xf0]  ;;  %v5148_v49 = vld [vmem:[%s7275_s15 + $0x1c0] sm:$0xf]  ;;  %v6374_v54 = vld [vmem:[%s7275_s15 + $0x44] sm:$0xf] }
 0x110   : > { %1310 = vmatmul.bf16.vlgmr.msra.gmra.mxu0 %v7602_v11  ;;  %1329 = vmatmul.bf16.vlgmr.msra.gmra.mxu1 %v7604_v14  ;;  %v7658_v15 = vpack.c.bf16 %v720_v0, %v718_v5  ;;  %v5005_v19 = vor.u32 %v6389_v17, %v5004_v8  ;;  %v5009_v28 = vor.u32 %v6386_v20, %v5006_v21  ;;  %v6425_v51 = vld [vmem:[%s7275_s15 + $0x1d4] sm:$0xf0]  ;;  %v4958_v26 = vld [vmem:[%s7275_s15 + $0x58] sm:$0xf0]  ;;  %v6422_v29 = vld [vmem:[%s7275_s15 + $0x1c4] sm:$0xf] }
 0x111   : > { %1348 = vmatmul.bf16.vlgmr.msra.gmra.mxu2 %v7602_v11  ;;  %1367 = vmatmul.bf16.vlgmr.msra.gmra.mxu3 %v7604_v14  ;;  %v5177_v52 = vor.u32 %v6428_v43, %v5174_v44  ;;  %v5150_v55 = vld [vmem:[%s7275_s15 + $0x1d8] sm:$0xf0]  ;;  %v4932_v23 = vld [vmem:[%s7275_s15 + $0x10] sm:$0xf]  ;;  %v6371_v56 = vld [vmem:[%s7275_s15 + $0x24] sm:$0xf0]  ;;  %v5149_v57 = vor.u32 %v6425_v51, %v5148_v49  ;;  %v4961_v58 = vor.u32 %v6374_v54, %v4958_v26 }
 0x112   : > { %1454 = vmatpush.bf16.msra.mxu0 %v5101_v4  ;;  %1473 = vmatpush.bf16.msra.mxu1 %v5293_v13  ;;  %v6437_v4 = vld [vmem:[%s7275_s15 + $0x234] sm:$0xf0]  ;;  %v5198_v13 = vld [vmem:[%s7275_s15 + $0x238] sm:$0xf0]  ;;  %v5124_v59 = vld [vmem:[%s7275_s15 + $0x190] sm:$0xf]  ;;  %v4933_v50 = vor.u32 %v6371_v56, %v4932_v23 }
 0x113   : > { %1492 = vmatpush.bf16.msra.mxu2 %v5105_v22  ;;  %1511 = vmatpush.bf16.msra.mxu3 %v5297_v31  ;;  %v4980_v22 = vld [vmem:[%s7275_s15 + $0x70] sm:$0xf]  ;;  %v5197_v27 = vor.u32 %v6437_v4, %v5196_v18  ;;  %v5201_v37 = vor.u32 %v6434_v12, %v5198_v13  ;;  %v4934_v32 = vld [vmem:[%s7275_s15 + $0x28] sm:$0xf0]  ;;  %v6416_v33 = vld [vmem:[%s7275_s15 + $0x194] sm:$0xf] }
 0x114   : > { %v5172_v31 = vld [vmem:[%s7275_s15 + $0x1f0] sm:$0xf]  ;;  %v4981_v38 = vor.u32 %v6383_v30, %v4980_v22 }
 0x116   : > { %1455 = vmatpush.bf16.msra.mxu0 %v5077_v42  ;;  %1474 = vmatpush.bf16.msra.mxu1 %v5269_v47  ;;  %v4982_v42 = vld [vmem:[%s7275_s15 + $0x88] sm:$0xf0]  ;;  %v5173_v47 = vor.u32 %v6431_v34, %v5172_v31 }
 0x117   : > { %1493 = vmatpush.bf16.msra.mxu2 %v5081_v48  ;;  %1512 = vmatpush.bf16.msra.mxu3 %v5273_v53  ;;  %v4985_v48 = vor.u32 %v6380_v41, %v4982_v42  ;;  %v4957_v53 = vor.u32 %v6377_v46, %v4956_v45 }
 0x11a   : > { %1456 = vmatpush.bf16.msra.mxu0 %v5053_v60  ;;  %1475 = vmatpush.bf16.msra.mxu1 %v5245_v61  ;;  %v5153_v60 = vor.u32 %v6422_v29, %v5150_v55  ;;  %v6419_v61 = vld [vmem:[%s7275_s15 + $0x1a4] sm:$0xf0] }
 0x11b   : > { %1494 = vmatpush.bf16.msra.mxu2 %v5057_v62  ;;  %1513 = vmatpush.bf16.msra.mxu3 %v5249_v63  ;;  %v6368_v62 = vld [vmem:[%s7275_s15 + $0x14] sm:$0xf]  ;;  %v5126_v63 = vld [vmem:[%s7275_s15 + $0x1a8] sm:$0xf0]  ;;  %v5125_v0 = vor.u32 %v6419_v61, %v5124_v59  ;;  %s7094_s15 = smov 64  }
 0x11c   : > { %v4937_v24 = vor.u32 %v6368_v62, %v4934_v32  ;;  %v5129_v35 = vor.u32 %v6416_v33, %v5126_v63 }
 0x11e   : > { %1457 = vmatpush.bf16.msra.mxu0 %v5029_v36  ;;  %1476 = vmatpush.bf16.msra.mxu1 %v5221_v16 }
 0x11f   : > { %1495 = vmatpush.bf16.msra.mxu2 %v5033_v7  ;;  %1514 = vmatpush.bf16.msra.mxu3 %v5225_v2 }
 0x120   : > { %1315 = vmatmul.bf16.gmra.mxu0 %v7658_v15  ;;  %1334 = vmatmul.bf16.gmra.mxu1 %v7660_v40 }
 0x121   : > { %1353 = vmatmul.bf16.gmra.mxu2 %v7658_v15  ;;  %1372 = vmatmul.bf16.gmra.mxu3 %v7660_v40 }
 0x122   : > { %1458 = vmatpush.bf16.msra.mxu0 %v5005_v19  ;;  %1477 = vmatpush.bf16.msra.mxu1 %v5197_v27 }
 0x123   : > { %1496 = vmatpush.bf16.msra.mxu2 %v5009_v28  ;;  %1515 = vmatpush.bf16.msra.mxu3 %v5201_v37 }
 0x126   : > { %1459 = vmatpush.bf16.msra.mxu0 %v4981_v38  ;;  %1478 = vmatpush.bf16.msra.mxu1 %v5173_v47 }
 0x127   : > { %1497 = vmatpush.bf16.msra.mxu2 %v4985_v48  ;;  %1516 = vmatpush.bf16.msra.mxu3 %v5177_v52 }
 0x12a   : > { %1460 = vmatpush.bf16.msra.mxu0 %v4957_v53  ;;  %1479 = vmatpush.bf16.msra.mxu1 %v5149_v57 }
 0x12b   : > { %1498 = vmatpush.bf16.msra.mxu2 %v4961_v58  ;;  %1517 = vmatpush.bf16.msra.mxu3 %v5153_v60 }
 0x12e   : > { %1461 = vmatpush.bf16.msra.mxu0 %v4933_v50  ;;  %1480 = vmatpush.bf16.msra.mxu1 %v5125_v0 }
 0x12f   : > { %1499 = vmatpush.bf16.msra.mxu2 %v4937_v24  ;;  %1518 = vmatpush.bf16.msra.mxu3 %v5129_v35 }
 0x130   : > { %1386 = vmatmul.bf16.vlgmr.msrb.gmra.mxu0 %v7602_v11  ;;  %1405 = vmatmul.bf16.vlgmr.msrb.gmra.mxu1 %v7604_v14 }
 0x131   : > { %1424 = vmatmul.bf16.vlgmr.msrb.gmra.mxu2 %v7602_v11  ;;  %1443 = vmatmul.bf16.vlgmr.msrb.gmra.mxu3 %v7604_v14 }
 0x140   : > { %1391 = vmatmul.bf16.gmra.mxu0 %v7658_v15  ;;  %1410 = vmatmul.bf16.gmra.mxu1 %v7660_v40 }
 0x141   : > { %1429 = vmatmul.bf16.gmra.mxu2 %v7658_v15  ;;  %1448 = vmatmul.bf16.gmra.mxu3 %v7660_v40 }
 0x150   : > { %1462 = vmatmul.bf16.vlgmr.msra.gmra.mxu0 %v7602_v11  ;;  %1481 = vmatmul.bf16.vlgmr.msra.gmra.mxu1 %v7604_v14 }
 0x151   : > { %1500 = vmatmul.bf16.vlgmr.msra.gmra.mxu2 %v7602_v11  ;;  %1519 = vmatmul.bf16.vlgmr.msra.gmra.mxu3 %v7604_v14 }
 0x160   : > { %1467 = vmatmul.bf16.gmra.mxu0 %v7658_v15  ;;  %1486 = vmatmul.bf16.gmra.mxu1 %v7660_v40 }
 0x161   : > { %1505 = vmatmul.bf16.gmra.mxu2 %v7658_v15  ;;  %1524 = vmatmul.bf16.gmra.mxu3 %v7660_v40 }
 0x18d   : > { %v1311_v36 = vpop.f32.mrf.mxu0  ;;  %v1330_v1 = vpop.f32.mrf.mxu1 }
 0x18e   : > { %v7714_v25 = vadd.f32 %v1330_v1, %v1311_v36 }
 0x194   : > { %v1349_v3 = vpop.f32.mrf.mxu2  ;;  %v1368_v5 = vpop.f32.mrf.mxu3 }
 0x195   : > { %v7716_v6 = vadd.f32 %v1368_v5, %v1349_v3  ;;  %v1313_v9 = vpop.f32.mrf.mxu0  ;;  %v1332_v11 = vpop.f32.mrf.mxu1 }
 0x196   : > { %v7726_v17 = vadd.f32 %v1332_v11, %v1313_v9 }
 0x197   : > { %1582 = vrot.lane.b32.xlu0 %v7716_v6, %s7094_s15 }
 0x19c   : > { %v1351_v14 = vpop.f32.mrf.mxu2  ;;  %v1370_v39 = vpop.f32.mrf.mxu3 }
 0x19d   : > { %v7720_v16 = vadd.f32 %v1370_v39, %v1351_v14  ;;  %v1316_v15 = vpop.f32.mrf.mxu0  ;;  %v1335_v40 = vpop.f32.mrf.mxu1 }
 0x19e   : > { %v7722_v7 = vadd.f32 %v1335_v40, %v1316_v15 }
 0x19f   : > { %1584 = vrot.lane.b32.xlu1 %v7720_v16, %s7094_s15 }
 0x1a4   : > { %v1354_v2 = vpop.f32.mrf.mxu2  ;;  %v1373_v8 = vpop.f32.mrf.mxu3 }
 0x1a5   : > { %v1318_v18 = vpop.f32.mrf.mxu0  ;;  %v1337_v19 = vpop.f32.mrf.mxu1  ;;  %v7760_v23 = vadd.f32 %v1373_v8, %v1354_v2 }
 0x1a6   : > { %v7746_v48 = vadd.f32 %v1337_v19, %v1318_v18  ;;  %v621_v19 = vld [vmem:[%s9449_s2] sm:$0xff] }
 0x1a7   : > { %1536 = vrot.lane.b32.xlu1 %v7726_v17, %s7094_s15 }
 0x1ac   : > { %v1356_v4 = vpop.f32.mrf.mxu2  ;;  %v1375_v20 = vpop.f32.mrf.mxu3 }
 0x1ad   : > { %v1387_v21 = vpop.f32.mrf.mxu0  ;;  %v1406_v12 = vpop.f32.mrf.mxu1  ;;  %v7770_v35 = vadd.f32 %v1375_v20, %v1356_v4 }
 0x1ae   : > { %v7730_v13 = vadd.f32 %v1406_v12, %v1387_v21  ;;  %v617_v12 = vld [vmem:[%s9495_s28] sm:$0xff] }
 0x1b0   : > { %1554 = vrot.lane.b32.xlu2 %v7730_v13, %s7094_s15 }
 0x1b4   : > { %v1425_v22 = vpop.f32.mrf.mxu2  ;;  %v1444_v27 = vpop.f32.mrf.mxu3 }
 0x1b5   : > { %v1389_v28 = vpop.f32.mrf.mxu0  ;;  %v1408_v30 = vpop.f32.mrf.mxu1  ;;  %v7734_v31 = vadd.f32 %v1444_v27, %v1425_v22  ;;  %v1578_v22 = vmul.f32 %v7716_v6, %v617_v12  ;;  %v622_v27 = vld [vmem:[%s9449_s2 + $0x8] sm:$0xff]  ;;  %v1550_v6 = vmul.f32 %v7730_v13, %v617_v12 }
 0x1b6   : > { %v7738_v42 = vadd.f32 %v1408_v30, %v1389_v28  ;;  %v618_v30 = vld [vmem:[%s9495_s28 + $0x8] sm:$0xff] }
 0x1b8   : > { %1602 = vrot.lane.b32.xlu2 %v7734_v31, %s7094_s15 }
 0x1bc   : > { %v1427_v34 = vpop.f32.mrf.mxu2  ;;  %v1446_v37 = vpop.f32.mrf.mxu3 }
 0x1bd   : > { %v1392_v38 = vpop.f32.mrf.mxu0  ;;  %v1411_v41 = vpop.f32.mrf.mxu1  ;;  %v7748_v49 = vadd.f32 %v1446_v37, %v1427_v34  ;;  %v1579_v37 = vmul.f32 %v7720_v16, %v618_v30  ;;  %v1598_v16 = vmul.f32 %v7734_v31, %v617_v12 }
 0x1be   : > { %v7740_v43 = vadd.f32 %v1411_v41, %v1392_v38 }
 0x1bf   : > { %v1599_v13 = vmul.f32 %v7748_v49, %v618_v30 }
 0x1c0   : > { %1556 = vrot.lane.b32.xlu2 %v7738_v42, %s7094_s15  ;;  %1558 = vrot.lane.b32.xlu1 %v7740_v43, %s7094_s15 }
 0x1c4   : > { %v1430_v44 = vpop.f32.mrf.mxu2  ;;  %v1449_v45 = vpop.f32.mrf.mxu3 }
 0x1c5   : > { %v1394_v46 = vpop.f32.mrf.mxu0  ;;  %v1413_v47 = vpop.f32.mrf.mxu1  ;;  %v7762_v58 = vadd.f32 %v1449_v45, %v1430_v44 }
 0x1c6   : > { %v7768_v32 = vadd.f32 %v1413_v47, %v1394_v46 }
 0x1c8   : > { %1604 = vrot.lane.b32.xlu2 %v7748_v49, %s7094_s15  ;;  %1540 = vrot.lane.b32.xlu1 %v7746_v48, %s7094_s15 }
 0x1cc   : > { %v1432_v51 = vpop.f32.mrf.mxu2  ;;  %v1451_v52 = vpop.f32.mrf.mxu3 }
 0x1cd   : > { %v7754_v53 = vadd.f32 %v1451_v52, %v1432_v51  ;;  %v1463_v54 = vpop.f32.mrf.mxu0  ;;  %v1482_v26 = vpop.f32.mrf.mxu1 }
 0x1ce   : > { %v1483_v59 = vadd.f32 %v1482_v26, %v1463_v54 }
 0x1cf   : > { %1608 = vrot.lane.b32.xlu0 %v7754_v53, %s7094_s15 }
 0x1d0   : > { %1534 = vrot.lane.b32.xlu2 %v7714_v25, %s7094_s15 }
 0x1d4   : > { %v1501_v29 = vpop.f32.mrf.mxu2  ;;  %v1520_v55 = vpop.f32.mrf.mxu3 }
 0x1d5   : > { %v1465_v56 = vpop.f32.mrf.mxu0  ;;  %v1484_v57 = vpop.f32.mrf.mxu1  ;;  %v1521_v33 = vadd.f32 %v1520_v55, %v1501_v29  ;;  %v1551_v55 = vmul.f32 %v7738_v42, %v618_v30  ;;  %v1531_v42 = vmul.f32 %v7726_v17, %v618_v30  ;;  %v623_v17 = vld [vmem:[%s9449_s2 + $0x10] sm:$0xff]  ;;  %v624_v30 = vld [vmem:[%s9449_s2 + $0x18] sm:$0xff] }
 0x1d6   : > { %v1485_v60 = vadd.f32 %v1484_v57, %v1465_v56 }
 0x1d7   : > { %1586 = vrot.lane.b32.xlu0 %v7760_v23, %s7094_s15 }
 0x1d8   : > { %v1704_v50 = vpack.c.bf16 %v1485_v60, %v1483_v59  ;;  %1606 = vrot.lane.b32.xlu2 %v7762_v58, %s7094_s15 }
 0x1da   : > { %1715 = vmatpush.bf16.msrb.mxu1 %v1704_v50 }
 0x1dc   : > { %v1503_v61 = vpop.f32.mrf.mxu2  ;;  %v1522_v62 = vpop.f32.mrf.mxu3 }
 0x1dd   : > { %v1523_v63 = vadd.f32 %v1522_v62, %v1503_v61  ;;  %v1468_v0 = vpop.f32.mrf.mxu0  ;;  %v1487_v24 = vpop.f32.mrf.mxu1 }
 0x1de   : > { %v1488_v11 = vadd.f32 %v1487_v24, %v1468_v0 }
 0x1df   : > { %v1801_v36 = vpack.c.bf16 %v1523_v63, %v1521_v33  ;;  %1560 = vrot.lane.b32.xlu0 %v7768_v32, %s7094_s15 }
 0x1e0   : > { %1588 = vrot.lane.b32.xlu2 %v7770_v35, %s7094_s15 }
 0x1e1   : > { %1812 = vmatpush.bf16.msrb.mxu3 %v1801_v36 }
 0x1e4   : > { %v1506_v1 = vpop.f32.mrf.mxu2  ;;  %v1525_v3 = vpop.f32.mrf.mxu3 }
 0x1e5   : > { %v1470_v5 = vpop.f32.mrf.mxu0  ;;  %v1489_v9 = vpop.f32.mrf.mxu1  ;;  %v1526_v2 = vadd.f32 %v1525_v3, %v1506_v1 }
 0x1e6   : > { %v1490_v14 = vadd.f32 %v1489_v9, %v1470_v5 }
 0x1e8   : > { %v1901_v39 = vpack.c.bf16 %v1490_v14, %v1488_v11  ;;  %1538 = vrot.lane.b32.xlu2 %v7722_v7, %s7094_s15 }
 0x1ea   : > { %1912 = vmatpush.bf16.msra.mxu1 %v1901_v39 }
 0x1ec   : > { %v1508_v15 = vpop.f32.mrf.mxu2  ;;  %v1527_v40 = vpop.f32.mrf.mxu3 }
 0x1ed   : > { %v1528_v8 = vadd.f32 %v1527_v40, %v1508_v15  ;;  %v1530_v15 = vmul.f32 %v7714_v25, %v617_v12  ;;  %v619_v25 = vld [vmem:[%s9495_s28 + $0x10] sm:$0xff] }
 0x1ef   : > { %v1998_v18 = vpack.c.bf16 %v1528_v8, %v1526_v2 }
 0x1f1   : > { %2009 = vmatpush.bf16.msra.mxu3 %v1998_v18 }
 0x209   : > { %v1583_v4 = vpop.permute.xlu0 %1582 }
 0x20a   : > { %v1555_v20 = vpop.permute.xlu2 %1554  ;;  %v1590_v21 = vmul.f32 %v1583_v4, %v621_v19 }
 0x20b   : > { %v1562_v46 = vmul.f32 %v1555_v20, %v621_v19 }
 0x20c   : > { %v1594_v28 = vadd.f32 %v1590_v21, %v1578_v22 }
 0x20d   : > { %v1566_v54 = vadd.f32 %v1562_v46, %v1550_v6 }
 0x20e   : > { %v1618_v44 = vpack.c.bf16 %v1594_v28, %v1594_v28  ;;  %v620_v28 = vld [vmem:[%s9495_s28 + $0x18] sm:$0xff] }
 0x20f   : > { %v1574_v57 = vpack.c.bf16 %v1566_v54, %v1566_v54 }
 0x210   : > { %v1728_v51 = vunpack.c.l.b16 %v1618_v44 }
 0x211   : > { %v1585_v34 = vpop.permute.xlu1 %1584  ;;  %v1636_v61 = vunpack.c.l.b16 %v1574_v57 }
 0x212   : > { %v1591_v38 = vmul.f32 %v1585_v34, %v622_v27  ;;  %v1603_v41 = vpop.permute.xlu2 %1602 }
 0x213   : > { %v1610_v59 = vmul.f32 %v1603_v41, %v621_v19 }
 0x214   : > { %v1595_v45 = vadd.f32 %v1591_v38, %v1579_v37  ;;  %v1601_v38 = vmul.f32 %v7754_v53, %v620_v28  ;;  %v1552_v53 = vmul.f32 %v7740_v43, %v619_v25  ;;  %v1533_v43 = vmul.f32 %v7746_v48, %v620_v28 }
 0x215   : > { %v1614_v62 = vadd.f32 %v1610_v59, %v1598_v16 }
 0x216   : > { %v1619_v47 = vpack.c.bf16 %v1595_v45, %v1595_v45 }
 0x217   : > { %v1622_v1 = vpack.c.bf16 %v1614_v62, %v1614_v62 }
 0x218   : > { %v1729_v52 = vunpack.c.l.b16 %v1619_v47  ;;  %v1581_v47 = vmul.f32 %v7770_v35, %v620_v28 }
 0x219   : > { %v1537_v63 = vpop.permute.xlu1 %1536  ;;  %v1734_v11 = vunpack.c.l.b16 %v1622_v1 }
 0x21a   : > { %v1730_v26 = vpack.c.b16 %v1729_v52, %v1728_v51  ;;  %v1557_v29 = vpop.permute.xlu2 %1556  ;;  %v1543_v3 = vmul.f32 %v1537_v63, %v622_v27 }
 0x21b   : > { %v1563_v56 = vmul.f32 %v1557_v29, %v622_v27  ;;  %v1580_v29 = vmul.f32 %v7760_v23, %v619_v25 }
 0x21c   : > { %v1547_v14 = vadd.f32 %v1543_v3, %v1531_v42 }
 0x21d   : > { %v1567_v60 = vadd.f32 %v1563_v56, %v1551_v55 }
 0x21e   : > { %v1571_v8 = vpack.c.bf16 %v1547_v14, %v1547_v14 }
 0x21f   : > { %v1575_v50 = vpack.c.bf16 %v1567_v60, %v1567_v60 }
 0x220   : > { %v1631_v4 = vunpack.c.l.b16 %v1571_v8 }
 0x221   : > { %v1637_v33 = vunpack.c.l.b16 %v1575_v50 }
 0x222   : > { %v1605_v0 = vpop.permute.xlu2 %1604 }
 0x223   : > { %v1638_v24 = vpack.c.b16 %v1637_v33, %v1636_v61  ;;  %v1611_v36 = vmul.f32 %v1605_v0, %v622_v27 }
 0x225   : > { %v1615_v5 = vadd.f32 %v1611_v36, %v1599_v13  ;;  %1647 = vmatpush.bf16.xpose.msrb.mxu0 %v1638_v24  ;;  %v1553_v13 = vmul.f32 %v7768_v32, %v620_v28  ;;  %v1532_v36 = vmul.f32 %v7722_v7, %v619_v25  ;;  %v1626_v7 = vld [vmem:[#allocation4] sm:$0xff] }
 0x227   : > { %v1623_v9 = vpack.c.bf16 %v1615_v5, %v1615_v5 }
 0x229   : > { %v1735_v31 = vunpack.c.l.b16 %v1623_v9 }
 0x22a   : > { %v1535_v39 = vpop.permute.xlu2 %1534 }
 0x22b   : > { %v1736_v40 = vpack.c.b16 %v1735_v31, %v1734_v11  ;;  %v1542_v2 = vmul.f32 %v1535_v39, %v621_v19  ;;  %v1600_v19 = vmul.f32 %v7762_v58, %v619_v25 }
 0x22d   : > { %v1546_v18 = vadd.f32 %v1542_v2, %v1530_v15  ;;  %1745 = vmatpush.bf16.xpose.msrb.mxu2 %v1736_v40 }
 0x22f   : > { %v1570_v49 = vpack.c.bf16 %v1546_v18, %v1546_v18 }
 0x231   : > { %v1630_v20 = vunpack.c.l.b16 %v1570_v49 }
 0x232   : > { %v1607_v22 = vpop.permute.xlu2 %1606  ;;  %v1559_v58 = vpop.permute.xlu1 %1558 }
 0x233   : > { %v1632_v21 = vpack.c.b16 %v1631_v4, %v1630_v20  ;;  %v1612_v27 = vmul.f32 %v1607_v22, %v623_v17  ;;  %v1564_v57 = vmul.f32 %v1559_v58, %v623_v17  ;;  %v1627_v22 = vld [vmem:[#allocation4 + $0x8] sm:$0xff] }
 0x234   : > { %1746 = vmatmul.bf16.vlgmr.msrb.gmra.mxu2 %v1730_v26 }
 0x235   : > { %1648 = vmatmul.bf16.vlgmr.msrb.gmra.mxu0 %v1632_v21  ;;  %v1616_v12 = vadd.f32 %v1612_v27, %v1600_v19  ;;  %v1568_v61 = vadd.f32 %v1564_v57, %v1552_v53 }
 0x237   : > { %v1624_v44 = vpack.c.bf16 %v1616_v12, %v1616_v12  ;;  %v1576_v3 = vpack.c.bf16 %v1568_v61, %v1568_v61 }
 0x239   : > { %v1931_v51 = vunpack.c.l.b16 %v1624_v44  ;;  %v1834_v14 = vunpack.c.l.b16 %v1576_v3 }
 0x23a   : > { %v1589_v34 = vpop.permute.xlu2 %1588  ;;  %v1541_v62 = vpop.permute.xlu1 %1540 }
 0x23b   : > { %v1593_v45 = vmul.f32 %v1589_v34, %v624_v30  ;;  %v1545_v1 = vmul.f32 %v1541_v62, %v624_v30 }
 0x23d   : > { %v1597_v52 = vadd.f32 %v1593_v45, %v1581_v47  ;;  %v1549_v11 = vadd.f32 %v1545_v1, %v1533_v43 }
 0x23f   : > { %v1621_v59 = vpack.c.bf16 %v1597_v52, %v1597_v52  ;;  %v1573_v40 = vpack.c.bf16 %v1549_v11, %v1549_v11 }
 0x241   : > { %v1609_v37 = vpop.permute.xlu0 %1608  ;;  %v1926_v35 = vunpack.c.l.b16 %v1621_v59  ;;  %v1829_v2 = vunpack.c.l.b16 %v1573_v40 }
 0x242   : > { %v1613_v41 = vmul.f32 %v1609_v37, %v624_v30  ;;  %v1539_v16 = vpop.permute.xlu2 %1538 }
 0x243   : > { %v1544_v63 = vmul.f32 %v1539_v16, %v623_v17 }
 0x244   : > { %v1617_v46 = vadd.f32 %v1613_v41, %v1601_v38  ;;  %v1825_v41 = vld [vmem:[#allocation4 + $0x18] sm:$0xff] }
 0x245   : > { %v1548_v42 = vadd.f32 %v1544_v63, %v1532_v36 }
 0x246   : > { %v1625_v6 = vpack.c.bf16 %v1617_v46, %v1617_v46 }
 0x247   : > { %v1572_v39 = vpack.c.bf16 %v1548_v42, %v1548_v42 }
 0x248   : > { %v1932_v54 = vunpack.c.l.b16 %v1625_v6 }
 0x249   : > { %v1587_v26 = vpop.permute.xlu0 %1586  ;;  %v1828_v32 = vunpack.c.l.b16 %v1572_v39 }
 0x24a   : > { %v1933_v55 = vpack.c.b16 %v1932_v54, %v1931_v51  ;;  %v1592_v56 = vmul.f32 %v1587_v26, %v623_v17 }
 0x24b   : > { %v1830_v8 = vpack.c.b16 %v1829_v2, %v1828_v32 }
 0x24c   : > { %v1596_v60 = vadd.f32 %v1592_v56, %v1580_v29  ;;  %1942 = vmatpush.bf16.xpose.msra.mxu2 %v1933_v55 }
 0x24e   : > { %v1620_v50 = vpack.c.bf16 %v1596_v60, %v1596_v60 }
 0x250   : > { %v1925_v33 = vunpack.c.l.b16 %v1620_v50 }
 0x251   : > { %v1561_v0 = vpop.permute.xlu0 %1560 }
 0x252   : > { %v1927_v24 = vpack.c.b16 %v1926_v35, %v1925_v33  ;;  %v1565_v23 = vmul.f32 %v1561_v0, %v624_v30  ;;  %v1824_v30 = vld [vmem:[#allocation4 + $0x10] sm:$0xff] }
 0x254   : > { %v1569_v5 = vadd.f32 %v1565_v23, %v1553_v13  ;;  %1943 = vmatmul.bf16.vlgmr.msra.gmra.mxu2 %v1927_v24 }
 0x256   : > { %v1577_v9 = vpack.c.bf16 %v1569_v5, %v1569_v5 }
 0x258   : > { %v1835_v31 = vunpack.c.l.b16 %v1577_v9 }
 0x25a   : > { %v1836_v15 = vpack.c.b16 %v1835_v31, %v1834_v14 }
 0x25c   : > { %1845 = vmatpush.bf16.xpose.msra.mxu0 %v1836_v15 }
 0x263   : > { %1846 = vmatmul.bf16.vlgmr.msra.gmra.mxu0 %v1830_v8 }
 0x2b2   : > { %v1649_v18 = vpop.f32.mrf.mxu0 }
 0x2b3   : > { %v1650_v49 = vadd.f32 %v1649_v18, %v1626_v7 }
 0x2b5   : > { %v1655_v4 = vsel %vm1654_vm8, %v1650_v49, -inf }
 0x2b6   : > { %1656 = vmax.xlane.f32.xlu1 %v1655_v4 }
 0x2b7   : > { %v1747_v48 = vpop.f32.mrf.mxu2 }
 0x2b8   : > { %v1748_v20 = vadd.f32 %v1747_v48, %v1626_v7 }
 0x2ba   : > { %v1752_v21 = vsel %vm1654_vm8, %v1748_v20, -inf  ;;  %v1651_v17 = vpop.f32.mrf.mxu0 }
 0x2bb   : > { %1753 = vmax.xlane.f32.xlu0 %v1752_v21  ;;  %v1652_v27 = vadd.f32 %v1651_v17, %v1627_v22 }
 0x2bd   : > { %v1658_v28 = vsel %vm1654_vm8, %v1652_v27, -inf }
 0x2bf   : > { %v1749_v25 = vpop.f32.mrf.mxu2 }
 0x2c0   : > { %v1750_v19 = vadd.f32 %v1749_v25, %v1627_v22 }
 0x2c2   : > { %v1755_v12 = vsel %vm1654_vm8, %v1750_v19, -inf }
 0x2c3   : > { %1756 = vmax.xlane.f32.xlu2 %v1755_v12  ;;  %1659 = vmax.xlane.f32.xlu0 %v1658_v28 }
 0x2d7   : > { %v1944_v34 = vpop.f32.mrf.mxu2 }
 0x2d8   : > { %v1945_v37 = vadd.f32 %v1944_v34, %v1824_v30 }
 0x2da   : > { %v1949_v38 = vsel %vm1654_vm8, %v1945_v37, -inf }
 0x2db   : > { %1950 = vmax.xlane.f32.xlu2 %v1949_v38 }
 0x2df   : > { %v1946_v44 = vpop.f32.mrf.mxu2 }
 0x2e0   : > { %v1947_v45 = vadd.f32 %v1946_v44, %v1825_v41  ;;  %v1847_v46 = vpop.f32.mrf.mxu0 }
 0x2e1   : > { %v1848_v47 = vadd.f32 %v1847_v46, %v1824_v30 }
 0x2e2   : > { %v1952_v58 = vsel %vm1654_vm8, %v1947_v45, -inf }
 0x2e3   : > { %1953 = vmax.xlane.f32.xlu1 %v1952_v58  ;;  %v1852_v6 = vsel %vm1654_vm8, %v1848_v47, -inf }
 0x2e4   : > { %1853 = vmax.xlane.f32.xlu0 %v1852_v6 }
 0x2e8   : > { %v1849_v51 = vpop.f32.mrf.mxu0 }
 0x2e9   : > { %v1850_v52 = vadd.f32 %v1849_v51, %v1825_v41 }
 0x2eb   : > { %v1855_v54 = vsel %vm1654_vm8, %v1850_v52, -inf }
 0x2ec   : > { %1856 = vmax.xlane.f32.xlu2 %v1855_v54 }
 0x329   : > { %v1657_v26 = vpop.xlane.xlu1 %1656 }
 0x32a   : > { %v1661_v29 = vsub.f32 %v1650_v49, %v1657_v26 }
 0x32c   : > { %v1663_v55 = vmul.f32 1.442695, %v1661_v29 }
 0x32e   : > { %6803 = vpow2.f32 %v1663_v55  ;;  %v1754_v56 = vpop.xlane.xlu0 %1753 }
 0x32f   : > { %v1758_v57 = vsub.f32 %v1748_v20, %v1754_v56 }
 0x331   : > { %v1760_v59 = vmul.f32 1.442695, %v1758_v57 }
 0x333   : > { %6805 = vpow2.f32 %v1760_v59 }
 0x334   : > { %v7826_v60 = vpop.eup %6803 }
 0x335   : > { %v1667_v53 = vsel %vm1654_vm8, %v7826_v60, 0.0 }
 0x336   : > { %v1757_v16 = vpop.xlane.xlu2 %1756  ;;  %v1660_v50 = vpop.xlane.xlu0 %1659  ;;  %1668 = vadd.xlane.f32.xlu2 %v1667_v53 }
 0x337   : > { %v1759_v61 = vsub.f32 %v1750_v19, %v1757_v16  ;;  %v1662_v35 = vsub.f32 %v1652_v27, %v1660_v50 }
 0x339   : > { %v7830_v62 = vpop.eup %6805  ;;  %v1762_v33 = vmul.f32 1.442695, %v1759_v61  ;;  %v1665_v63 = vmul.f32 1.442695, %v1662_v35 }
 0x33a   : > { %v1764_v0 = vsel %vm1654_vm8, %v7830_v62, 0.0 }
 0x33b   : > { %6807 = vpow2.f32 %v1762_v33  ;;  %1765 = vadd.xlane.f32.xlu1 %v1764_v0 }
 0x33c   : > { %6809 = vpow2.f32 %v1665_v63 }
 0x341   : > { %v7834_v13 = vpop.eup %6807 }
 0x342   : > { %v7836_v24 = vpop.eup %6809  ;;  %v1767_v23 = vsel %vm1654_vm8, %v7834_v13, 0.0 }
 0x343   : > { %v1670_v36 = vsel %vm1654_vm8, %v7836_v24, 0.0  ;;  %1768 = vadd.xlane.f32.xlu0 %v1767_v23 }
 0x344   : > { %1671 = vadd.xlane.f32.xlu1 %v1670_v36 }
 0x34e   : > { %v1951_v1 = vpop.xlane.xlu2 %1950 }
 0x34f   : > { %v1955_v3 = vsub.f32 %v1945_v37, %v1951_v1 }
 0x351   : > { %v1957_v5 = vmul.f32 1.442695, %v1955_v3 }
 0x353   : > { %6811 = vpow2.f32 %v1957_v5 }
 0x356   : > { %v1954_v43 = vpop.xlane.xlu1 %1953 }
 0x357   : > { %v1956_v42 = vsub.f32 %v1947_v45, %v1954_v43  ;;  %v1854_v9 = vpop.xlane.xlu0 %1853 }
 0x358   : > { %v1858_v11 = vsub.f32 %v1848_v47, %v1854_v9 }
 0x359   : > { %v7842_v14 = vpop.eup %6811  ;;  %v1959_v31 = vmul.f32 1.442695, %v1956_v42 }
 0x35a   : > { %v1860_v39 = vmul.f32 1.442695, %v1858_v11  ;;  %v1961_v15 = vsel %vm1654_vm8, %v7842_v14, 0.0 }
 0x35b   : > { %6813 = vpow2.f32 %v1959_v31  ;;  %1962 = vadd.xlane.f32.xlu0 %v1961_v15 }
 0x35c   : > { %6815 = vpow2.f32 %v1860_v39 }
 0x35f   : > { %v1857_v40 = vpop.xlane.xlu2 %1856 }
 0x360   : > { %v1859_v32 = vsub.f32 %v1850_v52, %v1857_v40  ;;  %v6476_v52 = vld [vmem:[%s7298_s13 + $0x54] sm:$0xf] }
 0x361   : > { %v7846_v2 = vpop.eup %6813 }
 0x362   : > { %v7848_v8 = vpop.eup %6815  ;;  %v1862_v7 = vmul.f32 1.442695, %v1859_v32  ;;  %v1964_v18 = vsel %vm1654_vm8, %v7846_v2, 0.0 }
 0x363   : > { %1965 = vadd.xlane.f32.xlu2 %v1964_v18  ;;  %v1864_v49 = vsel %vm1654_vm8, %v7848_v8, 0.0 }
 0x364   : > { %6817 = vpow2.f32 %v1862_v7  ;;  %1865 = vadd.xlane.f32.xlu1 %v1864_v49 }
 0x36a   : > { %v7854_v4 = vpop.eup %6817 }
 0x36b   : > { %v1867_v48 = vsel %vm1654_vm8, %v7854_v4, 0.0 }
 0x36c   : > { %1868 = vadd.xlane.f32.xlu0 %v1867_v48 }
 0x3a9   : > { %v1669_v20 = vpop.xlane.xlu2 %1668 }
 0x3aa   : > { %6819 = vrcp.f32 %v1669_v20  ;;  %v1682_v38 = vand.u32 2147483647, %v1669_v20  ;;  %vm1678_vm9 = vweird.f32 %v1669_v20  ;;  %v1684_v6 = vand.u32 2147483648, %v1669_v20 }
 0x3ac   : > { %vm7858_vm12 = vcmp.eq.f32.partialorder %v1682_v38, 8.507059e+37  ;;  %v1685_v0 = vor.u32 1.1754944e-38, %v1684_v6 }
 0x3ae   : > { %v1766_v21 = vpop.xlane.xlu1 %1765 }
 0x3af   : > { %6821 = vrcp.f32 %v1766_v21  ;;  %v1781_v44 = vand.u32 2147483648, %v1766_v21  ;;  %vm1775_vm13 = vweird.f32 %v1766_v21  ;;  %v1779_v54 = vand.u32 2147483647, %v1766_v21 }
 0x3b0   : > { %v6820_v22 = vpop.eup %6819 }
 0x3b1   : > { %v1674_v17 = vmul.f32 %v6820_v22, %v1669_v20  ;;  %vm1679_vm11 = vweird.f32 %v6820_v22  ;;  %v1782_v55 = vor.u32 1.1754944e-38, %v1781_v44  ;;  %vm1780_vm2 = vcmp.eq.f32.partialorder %v1779_v54, 8.507059e+37  ;;  %v6496_v44 = vld [vmem:[%s7298_s13 + $0xf4] sm:$0xf]  ;;  %v5362_v54 = vld [vmem:[%s7298_s13 + $0x58] sm:$0xf0] }
 0x3b2   : > { %vm7867_vm15 = vmor %vm1678_vm9, %vm1679_vm11 }
 0x3b3   : > { %v1675_v12 = vsub.f32 1.0, %v1674_v17 }
 0x3b5   : > { %v6822_v27 = vpop.eup %6821  ;;  %v1676_v37 = vmul.f32 %v6820_v22, %v1675_v12  ;;  %v6478_v12 = vld [vmem:[%s7298_s13 + $0x64] sm:$0xf] }
 0x3b6   : > { %v1771_v25 = vmul.f32 %v6822_v27, %v1766_v21  ;;  %v1769_v19 = vpop.xlane.xlu0 %1768  ;;  %vm1776_vm10 = vweird.f32 %v6822_v27  ;;  %v6480_v21 = vld [vmem:[%s7298_s13 + $0x74] sm:$0xf] }
 0x3b7   : > { %v1672_v28 = vpop.xlane.xlu1 %1671  ;;  %6823 = vrcp.f32 %v1769_v19  ;;  %v1677_v58 = vadd.f32 %v6820_v22, %v1676_v37  ;;  %vm7862_vm14 = vmor %vm1775_vm13, %vm1776_vm10  ;;  %v1794_v57 = vand.u32 2147483647, %v1769_v19  ;;  %v1796_v59 = vand.u32 2147483648, %v1769_v19 }
 0x3b8   : > { %v1772_v30 = vsub.f32 1.0, %v1771_v25  ;;  %6825 = vrcp.f32 %v1672_v28  ;;  %v1699_v50 = vand.u32 2147483648, %v1672_v28  ;;  %v1697_v63 = vand.u32 2147483647, %v1672_v28  ;;  %v6479_v25 = vld [vmem:[%s7298_s13 + $0x64] sm:$0xf0] }
 0x3b9   : > { %v1681_v35 = vsel %vm7867_vm15, %v6820_v22, %v1677_v58  ;;  %vm1790_vm3 = vweird.f32 %v1769_v19  ;;  %vm1693_vm4 = vweird.f32 %v1672_v28  ;;  %v1797_v3 = vor.u32 1.1754944e-38, %v1796_v59  ;;  %v5378_v22 = vld [vmem:[%s7298_s13 + $0x78] sm:$0xf0]  ;;  %v5360_v58 = vld [vmem:[%s7298_s13 + $0x50] sm:$0xf] }
 0x3ba   : > { %v1773_v34 = vmul.f32 %v6822_v27, %v1772_v30  ;;  %v1686_v5 = vsel %vm7858_vm12, %v1685_v0, %v1681_v35  ;;  %v1700_v43 = vor.u32 1.1754944e-38, %v1699_v50  ;;  %vm1795_vm7 = vcmp.eq.f32.partialorder %v1794_v57, 8.507059e+37 }
 0x3bb   : > { %vm1698_vm9 = vcmp.eq.f32.partialorder %v1697_v63, 8.507059e+37  ;;  %v1687_v40 = vmul.f32 %v7826_v60, %v1686_v5  ;;  %v6481_v60 = vld [vmem:[%s7298_s13 + $0x74] sm:$0xf0]  ;;  %v5381_v30 = vor.u32 %v6480_v21, %v5378_v22  ;;  %v5365_v50 = vor.u32 %v6476_v52, %v5362_v54  ;;  %v5426_v52 = vld [vmem:[%s7298_s13 + $0xd8] sm:$0xf0] }
 0x3bc   : > { %v1774_v46 = vadd.f32 %v6822_v27, %v1773_v34  ;;  %v5440_v34 = vld [vmem:[%s7298_s13 + $0xf0] sm:$0xf] }
 0x3bd   : > { %v6824_v41 = vpop.eup %6823  ;;  %2274 = vmatpush.bf16.msrb.mxu2 %v5381_v30  ;;  %v6494_v30 = vld [vmem:[%s7298_s13 + $0xe4] sm:$0xf] }
 0x3be   : > { %v6826_v45 = vpop.eup %6825  ;;  %v1786_v47 = vmul.f32 %v6824_v41, %v1769_v19  ;;  %v1778_v16 = vsel %vm7862_vm14, %v6822_v27, %v1774_v46  ;;  %vm1791_vm0 = vweird.f32 %v6824_v41  ;;  %v5368_v27 = vld [vmem:[%s7298_s13 + $0x60] sm:$0xf] }
 0x3bf   : > { %v1689_v51 = vmul.f32 %v6826_v45, %v1672_v28  ;;  %vm1694_vm1 = vweird.f32 %v6826_v45  ;;  %v1783_v36 = vsel %vm1780_vm2, %v1782_v55, %v1778_v16  ;;  %vm1792_vm5 = vmor %vm1790_vm3, %vm1791_vm0  ;;  %v5370_v28 = vld [vmem:[%s7298_s13 + $0x68] sm:$0xf0]  ;;  %v5369_v38 = vor.u32 %v6479_v25, %v5368_v27 }
 0x3c0   : > { %v1787_v26 = vsub.f32 1.0, %v1786_v47  ;;  %vm1695_vm6 = vmor %vm1693_vm4, %vm1694_vm1  ;;  %v1784_v31 = vmul.f32 %v7830_v62, %v1783_v36  ;;  %v5442_v47 = vld [vmem:[%s7298_s13 + $0xf8] sm:$0xf0] }
 0x3c1   : > { %v1690_v56 = vsub.f32 1.0, %v1689_v51  ;;  %v5445_v6 = vor.u32 %v6496_v44, %v5442_v47  ;;  %v6477_v51 = vld [vmem:[%s7298_s13 + $0x54] sm:$0xf0]  ;;  %v6475_v44 = vld [vmem:[%s7298_s13 + $0x44] sm:$0xf0] }
 0x3c2   : > { %v1788_v61 = vmul.f32 %v6824_v41, %v1787_v26  ;;  %v5361_v29 = vor.u32 %v6477_v51, %v5360_v58  ;;  %v5424_v47 = vld [vmem:[%s7298_s13 + $0xd0] sm:$0xf]  ;;  %v6493_v58 = vld [vmem:[%s7298_s13 + $0xd4] sm:$0xf0] }
 0x3c3   : > { %v1691_v33 = vmul.f32 %v6826_v45, %v1690_v56  ;;  %v5425_v51 = vor.u32 %v6493_v58, %v5424_v47 }
 0x3c4   : > { %v1789_v23 = vadd.f32 %v6824_v41, %v1788_v61 }
 0x3c5   : > { %v1692_v1 = vadd.f32 %v6826_v45, %v1691_v33 }
 0x3c6   : > { %v1793_v42 = vsel %vm1792_vm5, %v6824_v41, %v1789_v23  ;;  %v6497_v41 = vld [vmem:[%s7298_s13 + $0xf4] sm:$0xf0] }
 0x3c7   : > { %v1696_v9 = vsel %vm1695_vm6, %v6826_v45, %v1692_v1  ;;  %v1798_v11 = vsel %vm1795_vm7, %v1797_v3, %v1793_v42  ;;  %v5373_v45 = vor.u32 %v6478_v12, %v5370_v28  ;;  %v5441_v46 = vor.u32 %v6497_v41, %v5440_v34  ;;  %v5432_v12 = vld [vmem:[%s7298_s13 + $0xe0] sm:$0xf]  ;;  %v6495_v28 = vld [vmem:[%s7298_s13 + $0xe4] sm:$0xf0] }
 0x3c8   : > { %v1701_v39 = vsel %vm1698_vm9, %v1700_v43, %v1696_v9  ;;  %v1799_v15 = vmul.f32 %v7834_v13, %v1798_v11  ;;  %v5376_v13 = vld [vmem:[%s7298_s13 + $0x70] sm:$0xf]  ;;  %v5433_v34 = vor.u32 %v6495_v28, %v5432_v12  ;;  %v5352_v41 = vld [vmem:[%s7298_s13 + $0x40] sm:$0xf]  ;;  %v6484_v12 = vld [vmem:[%s7298_s13 + $0x94] sm:$0xf] }
 0x3c9   : > { %v1702_v32 = vmul.f32 %v7836_v24, %v1701_v39  ;;  %v5377_v20 = vor.u32 %v6481_v60, %v5376_v13  ;;  %2275 = vmatpush.bf16.msrb.mxu2 %v5373_v45  ;;  %v5354_v45 = vld [vmem:[%s7298_s13 + $0x48] sm:$0xf0]  ;;  %v5394_v28 = vld [vmem:[%s7298_s13 + $0x98] sm:$0xf0] }
 0x3ca   : > { %v1800_v7 = vpack.c.bf16 %v1799_v15, %v1784_v31 }
 0x3cb   : > { %v1703_v18 = vpack.c.bf16 %v1702_v32, %v1687_v40  ;;  %2236 = vmatpush.bf16.msrb.mxu0 %v5377_v20 }
 0x3cc   : > { %5299 = vmatmul.msk.bf16.vlgmr.msrb.gmra.mxu3 %vm1654_vm8, %v1800_v7 }
 0x3cd   : > { %5298 = vmatmul.msk.bf16.vlgmr.msrb.gmra.mxu1 %vm1654_vm8, %v1703_v18  ;;  %2293 = vmatpush.bf16.msrb.mxu3 %v5445_v6  ;;  %v6492_v6 = vld [vmem:[%s7298_s13 + $0xd4] sm:$0xf] }
 0x3ce   : > { %v7883_v49 = vpop.xlane.xlu0 %1962  ;;  %2255 = vmatpush.bf16.msrb.mxu1 %v5441_v46  ;;  %2276 = vmatpush.bf16.msrb.mxu2 %v5365_v50  ;;  %v5429_v54 = vor.u32 %v6492_v6, %v5426_v52  ;;  %v6490_v50 = vld [vmem:[%s7298_s13 + $0xc4] sm:$0xf] }
 0x3cf   : > { %6827 = vrcp.f32 %v7883_v49  ;;  %2237 = vmatpush.bf16.msrb.mxu0 %v5369_v38  ;;  %v1978_v59 = vand.u32 2147483648, %v7883_v49  ;;  %vm1972_vm11 = vweird.f32 %v7883_v49  ;;  %v1976_v61 = vand.u32 2147483647, %v7883_v49 }
 0x3d1   : > { %v1979_v1 = vor.u32 1.1754944e-38, %v1978_v59  ;;  %vm1977_vm14 = vcmp.eq.f32.partialorder %v1976_v61, 8.507059e+37 }
 0x3d2   : > { %2256 = vmatpush.bf16.msrb.mxu1 %v5433_v34  ;;  %v5384_v34 = vld [vmem:[%s7298_s13 + $0x80] sm:$0xf] }
 0x3d3   : > { %2238 = vmatpush.bf16.msrb.mxu0 %v5361_v29  ;;  %v6473_v29 = vld [vmem:[%s7298_s13 + $0x34] sm:$0xf0] }
 0x3d5   : > { %v7886_v62 = vpop.eup %6827 }
 0x3d6   : > { %v1968_v24 = vmul.f32 %v7886_v62, %v7883_v49  ;;  %v7892_v48 = vpop.xlane.xlu2 %1965  ;;  %vm1973_vm10 = vweird.f32 %v7886_v62  ;;  %2257 = vmatpush.bf16.msrb.mxu1 %v5425_v51 }
 0x3d7   : > { %6829 = vrcp.f32 %v7892_v48  ;;  %v7897_v17 = vpop.xlane.xlu1 %1865  ;;  %vm1974_vm12 = vmor %vm1972_vm11, %vm1973_vm10  ;;  %v1993_v33 = vand.u32 2147483648, %v7892_v48  ;;  %v1991_v36 = vand.u32 2147483647, %v7892_v48  ;;  %vm1987_vm15 = vweird.f32 %v7892_v48 }
 0x3d8   : > { %v1969_v19 = vsub.f32 1.0, %v1968_v24  ;;  %6831 = vrcp.f32 %v7897_v17  ;;  %v1881_v7 = vand.u32 2147483648, %v7897_v17  ;;  %vm1875_vm3 = vweird.f32 %v7897_v17 }
 0x3d9   : > { %v1994_v42 = vor.u32 1.1754944e-38, %v1993_v33  ;;  %vm1992_vm1 = vcmp.eq.f32.partialorder %v1991_v36, 8.507059e+37  ;;  %v1879_v18 = vand.u32 2147483647, %v7897_v17 }
 0x3da   : > { %v1970_v37 = vmul.f32 %v7886_v62, %v1969_v19  ;;  %v1882_v20 = vor.u32 1.1754944e-38, %v1881_v7  ;;  %v5330_v7 = vld [vmem:[%s7298_s13 + $0x18] sm:$0xf0] }
 0x3db   : > { %vm1880_vm6 = vcmp.eq.f32.partialorder %v1879_v18, 8.507059e+37 }
 0x3dc   : > { %v1971_v56 = vadd.f32 %v7886_v62, %v1970_v37  ;;  %v5434_v37 = vld [vmem:[%s7298_s13 + $0xe8] sm:$0xf0] }
 0x3dd   : > { %v6830_v26 = vpop.eup %6829  ;;  %v5437_v38 = vor.u32 %v6494_v30, %v5434_v37  ;;  %v5397_v30 = vor.u32 %v6484_v12, %v5394_v28  ;;  %v6483_v37 = vld [vmem:[%s7298_s13 + $0x84] sm:$0xf0] }
 0x3de   : > { %v6832_v55 = vpop.eup %6831  ;;  %v1983_v57 = vmul.f32 %v6830_v26, %v7892_v48  ;;  %v1975_v0 = vsel %vm1974_vm12, %v7886_v62, %v1971_v56  ;;  %vm1988_vm13 = vweird.f32 %v6830_v26 }
 0x3df   : > { %v1871_v53 = vmul.f32 %v6832_v55, %v7897_v17  ;;  %v1869_v16 = vpop.xlane.xlu0 %1868  ;;  %v1980_v43 = vsel %vm1977_vm14, %v1979_v1, %v1975_v0  ;;  %vm1989_vm0 = vmor %vm1987_vm15, %vm1988_vm13  ;;  %vm1876_vm2 = vweird.f32 %v6832_v55  ;;  %2294 = vmatpush.bf16.msrb.mxu3 %v5437_v38  ;;  %v6471_v0 = vld [vmem:[%s7298_s13 + $0x24] sm:$0xf0]  ;;  %v5338_v1 = vld [vmem:[%s7298_s13 + $0x28] sm:$0xf0] }
 0x3e0   : > { %v1984_v35 = vsub.f32 1.0, %v1983_v57  ;;  %6833 = vrcp.f32 %v1869_v16  ;;  %v1981_v40 = vmul.f32 %v7842_v14, %v1980_v43  ;;  %vm1877_vm4 = vmor %vm1875_vm3, %vm1876_vm2  ;;  %v1896_v62 = vand.u32 2147483648, %v1869_v16  ;;  %v5346_v57 = vld [vmem:[%s7298_s13 + $0x38] sm:$0xf0]  ;;  %v6489_v43 = vld [vmem:[%s7298_s13 + $0xb4] sm:$0xf0] }
 0x3e1   : > { %v1872_v63 = vsub.f32 1.0, %v1871_v53  ;;  %v1894_v48 = vand.u32 2147483647, %v1869_v16  ;;  %vm1890_vm7 = vweird.f32 %v1869_v16  ;;  %v5416_v53 = vld [vmem:[%s7298_s13 + $0xc0] sm:$0xf] }
 0x3e2   : > { %v1985_v23 = vmul.f32 %v6830_v26, %v1984_v35  ;;  %v1897_v21 = vor.u32 1.1754944e-38, %v1896_v62  ;;  %v5418_v35 = vld [vmem:[%s7298_s13 + $0xc8] sm:$0xf0]  ;;  %v6487_v62 = vld [vmem:[%s7298_s13 + $0xa4] sm:$0xf0] }
 0x3e3   : > { %v1873_v3 = vmul.f32 %v6832_v55, %v1872_v63  ;;  %vm1895_vm10 = vcmp.eq.f32.partialorder %v1894_v48, 8.507059e+37  ;;  %2295 = vmatpush.bf16.msrb.mxu3 %v5429_v54  ;;  %v5421_v33 = vor.u32 %v6490_v50, %v5418_v35  ;;  %v5336_v63 = vld [vmem:[%s7298_s13 + $0x20] sm:$0xf]  ;;  %v6482_v38 = vld [vmem:[%s7298_s13 + $0x84] sm:$0xf] }
 0x3e4   : > { %v1986_v5 = vadd.f32 %v6830_v26, %v1985_v23  ;;  %v6470_v23 = vld [vmem:[%s7298_s13 + $0x24] sm:$0xf]  ;;  %v5337_v36 = vor.u32 %v6471_v0, %v5336_v63 }
 0x3e5   : > { %v1874_v39 = vadd.f32 %v6832_v55, %v1873_v3  ;;  %v5341_v3 = vor.u32 %v6470_v23, %v5338_v1 }
 0x3e6   : > { %v6834_v9 = vpop.eup %6833  ;;  %v1990_v11 = vsel %vm1989_vm0, %v6830_v26, %v1986_v5  ;;  %v5344_v26 = vld [vmem:[%s7298_s13 + $0x30] sm:$0xf] }
 0x3e7   : > { %v1995_v31 = vsel %vm1992_vm1, %v1994_v42, %v1990_v11  ;;  %v1886_v15 = vmul.f32 %v6834_v9, %v1869_v16  ;;  %v1878_v60 = vsel %vm1877_vm4, %v6832_v55, %v1874_v39  ;;  %vm1891_vm5 = vweird.f32 %v6834_v9  ;;  %v6472_v55 = vld [vmem:[%s7298_s13 + $0x34] sm:$0xf]  ;;  %v6491_v16 = vld [vmem:[%s7298_s13 + $0xc4] sm:$0xf0]  ;;  %2296 = vmatpush.bf16.msrb.mxu3 %v5421_v33  ;;  %v5408_v5 = vld [vmem:[%s7298_s13 + $0xb0] sm:$0xf] }
 0x3e8   : > { %v1996_v32 = vmul.f32 %v7846_v2, %v1995_v31  ;;  %v1883_v2 = vsel %vm1880_vm6, %v1882_v20, %v1878_v60  ;;  %vm1892_vm9 = vmor %vm1890_vm7, %vm1891_vm5  ;;  %v5345_v56 = vor.u32 %v6473_v29, %v5344_v26  ;;  %v5349_v59 = vor.u32 %v6472_v55, %v5346_v57  ;;  %v6488_v42 = vld [vmem:[%s7298_s13 + $0xb4] sm:$0xf]  ;;  %v5410_v11 = vld [vmem:[%s7298_s13 + $0xb8] sm:$0xf0] }
 0x3e9   : > { %v1887_v49 = vsub.f32 1.0, %v1886_v15  ;;  %v1884_v27 = vmul.f32 %v7848_v8, %v1883_v2  ;;  %v6474_v8 = vld [vmem:[%s7298_s13 + $0x44] sm:$0xf]  ;;  %v5417_v61 = vor.u32 %v6491_v16, %v5416_v53  ;;  %v5413_v31 = vor.u32 %v6488_v42, %v5410_v11  ;;  %v5328_v39 = vld [vmem:[%s7298_s13 + $0x10] sm:$0xf] }
 0x3ea   : > { %v1997_v13 = vpack.c.bf16 %v1996_v32, %v1981_v40  ;;  %v5357_v46 = vor.u32 %v6474_v8, %v5354_v45  ;;  %v6469_v15 = vld [vmem:[%s7298_s13 + $0x14] sm:$0xf0]  ;;  %v6468_v40 = vld [vmem:[%s7298_s13 + $0x14] sm:$0xf]  ;;  %v5320_v20 = vld [vmem:[%s7298_s13] sm:$0xf] }
 0x3eb   : > { %v1888_v24 = vmul.f32 %v6834_v9, %v1887_v49  ;;  %2258 = vmatpush.bf16.msrb.mxu1 %v5417_v61  ;;  %v5329_v32 = vor.u32 %v6469_v15, %v5328_v39  ;;  %2297 = vmatpush.bf16.msrb.mxu3 %v5413_v31  ;;  %v5333_v18 = vor.u32 %v6468_v40, %v5330_v7  ;;  %v5400_v49 = vld [vmem:[%s7298_s13 + $0xa0] sm:$0xf]  ;;  %v6466_v2 = vld [vmem:[%s7298_s13 + $0x4] sm:$0xf]  ;;  %v6907_v39 = vld [vmem:[#allocation2 + $0x30] sm:$0xff] }
 0x3ec   : > { %5301 = vmatmul.msk.bf16.vlgmr.msra.gmra.mxu3 %vm1654_vm8, %v1997_v13  ;;  %2277 = vmatpush.bf16.msrb.mxu2 %v5357_v46  ;;  %v6486_v13 = vld [vmem:[%s7298_s13 + $0xa4] sm:$0xf]  ;;  %v5401_v60 = vor.u32 %v6487_v62, %v5400_v49 }
 0x3ed   : > { %v1889_v14 = vadd.f32 %v6834_v9, %v1888_v24  ;;  %v5402_v24 = vld [vmem:[%s7298_s13 + $0xa8] sm:$0xf0]  ;;  %v6908_v7 = vld [vmem:[#allocation2] sm:$0xff] }
 0x3ee   : > { %v5405_v48 = vor.u32 %v6486_v13, %v5402_v24 }
 0x3ef   : > { %v1893_v22 = vsel %vm1892_vm9, %v6834_v9, %v1889_v14  ;;  %v5409_v9 = vor.u32 %v6489_v43, %v5408_v5  ;;  %v6467_v14 = vld [vmem:[%s7298_s13 + $0x4] sm:$0xf0] }
 0x3f0   : > { %v1898_v17 = vsel %vm1895_vm10, %v1897_v21, %v1893_v22  ;;  %2278 = vmatpush.bf16.msrb.mxu2 %v5349_v59  ;;  %v5321_v21 = vor.u32 %v6467_v14, %v5320_v20  ;;  %v5322_v22 = vld [vmem:[%s7298_s13 + $0x8] sm:$0xf0]  ;;  %2298 = vmatpush.bf16.msrb.mxu3 %v5405_v48  ;;  %v6909_v14 = vld [vmem:[#allocation2 + $0x18] sm:$0xff] }
 0x3f1   : > { %v1899_v25 = vmul.f32 %v7854_v4, %v1898_v17  ;;  %v5353_v4 = vor.u32 %v6475_v44, %v5352_v41  ;;  %2259 = vmatpush.bf16.msrb.mxu1 %v5409_v9  ;;  %v5392_v17 = vld [vmem:[%s7298_s13 + $0x90] sm:$0xf]  ;;  %v5385_v41 = vor.u32 %v6483_v37, %v5384_v34  ;;  %v5386_v44 = vld [vmem:[%s7298_s13 + $0x88] sm:$0xf0] }
 0x3f2   : > { %v5389_v8 = vor.u32 %v6482_v38, %v5386_v44  ;;  %v6911_v38 = vld [vmem:[#allocation2 + $0x8] sm:$0xff] }
 0x3f3   : > { %v1900_v19 = vpack.c.bf16 %v1899_v25, %v1884_v27  ;;  %2239 = vmatpush.bf16.msrb.mxu0 %v5353_v4  ;;  %v6485_v27 = vld [vmem:[%s7298_s13 + $0x94] sm:$0xf0]  ;;  %v5325_v25 = vor.u32 %v6466_v2, %v5322_v22  ;;  %v6910_v22 = vld [vmem:[#allocation2 + $0x10] sm:$0xff] }
 0x3f4   : > { %2279 = vmatpush.bf16.msrb.mxu2 %v5341_v3  ;;  %2299 = vmatpush.bf16.msrb.mxu3 %v5397_v30 }
 0x3f5   : > { %5300 = vmatmul.msk.bf16.vlgmr.msra.gmra.mxu1 %vm1654_vm8, %v1900_v19  ;;  %v5393_v19 = vor.u32 %v6485_v27, %v5392_v17 }
 0x3f6   : > { %2260 = vmatpush.bf16.msrb.mxu1 %v5401_v60 }
 0x3f7   : > { %2240 = vmatpush.bf16.msrb.mxu0 %v5345_v56 }
 0x3f8   : > { %2280 = vmatpush.bf16.msrb.mxu2 %v5333_v18  ;;  %2300 = vmatpush.bf16.msrb.mxu3 %v5389_v8 }
 0x3fa   : > { %2261 = vmatpush.bf16.msrb.mxu1 %v5393_v19 }
 0x3fb   : > { %2241 = vmatpush.bf16.msrb.mxu0 %v5337_v36 }
 0x3fc   : > { %2281 = vmatpush.bf16.msrb.mxu2 %v5325_v25 }
 0x3fe   : > { %2262 = vmatpush.bf16.msrb.mxu1 %v5385_v41 }
 0x3ff   : > { %2242 = vmatpush.bf16.msrb.mxu0 %v5329_v32 }
 0x403   : > { %2243 = vmatpush.bf16.msrb.mxu0 %v5321_v21 }
 0x44a   : > { %v1717_v4 = vpop.f32.mrf.mxu1 }
 0x44b   : > { %v1722_v45 = vpack.c.bf16 %v1717_v4, %v1717_v4  ;;  %v6912_v4 = vld [vmem:[#allocation2 + $0x20] sm:$0xff] }
 0x44d   : > { %1724 = vst [vmem:[#allocation3] sm:$0xf] %v1722_v45 }
 0x44f   : > { %v1814_v46 = vpop.f32.mrf.mxu3 }
 0x450   : > { %v1819_v47 = vpack.c.bf16 %v1814_v46, %v1814_v46 }
 0x452   : > { %1821 = vst [vmem:[#allocation3 + $0x4] sm:$0xf] %v1819_v47  ;;  %v1719_v58 = vpop.f32.mrf.mxu1 }
 0x453   : > { %v1723_v6 = vpack.c.bf16 %v1719_v58, %v1719_v58 }
 0x454   : > { %v5304_v54 = vld [vmem:[#allocation3] sm:$0xf] }
 0x455   : > { %1725 = vst [vmem:[#allocation3 + $0x8] sm:$0xf] %v1723_v6 }
 0x457   : > { %v1816_v51 = vpop.f32.mrf.mxu3 }
 0x458   : > { %v1820_v52 = vpack.c.bf16 %v1816_v51, %v1816_v51 }
 0x459   : > { %v6462_v55 = vld [vmem:[#allocation3 + $0x4] sm:$0xf] }
 0x45a   : > { %1822 = vst [vmem:[#allocation3 + $0xc] sm:$0xf] %v1820_v52 }
 0x45c   : > { %v6463_v26 = vld [vmem:[#allocation3 + $0x4] sm:$0xf0] }
 0x45d   : > { %v5305_v29 = vor.u32 %v6463_v26, %v5304_v54  ;;  %v6913_v26 = vld [vmem:[#allocation2 + $0x28] sm:$0xff] }
 0x45f   : > { %2244 = vmatmul.bf16.vlgmr.msrb.gmra.mxu0 %v5305_v29  ;;  %2282 = vmatmul.bf16.vlgmr.msrb.gmra.mxu2 %v5305_v29 }
 0x461   : > { %v5306_v56 = vld [vmem:[#allocation3 + $0x8] sm:$0xf0] }
 0x462   : > { %v5309_v57 = vor.u32 %v6462_v55, %v5306_v56  ;;  %v6914_v56 = vld [vmem:[#allocation2 + $0x38] sm:$0xff] }
 0x464   : > { %2263 = vmatmul.bf16.vlgmr.msrb.gmra.mxu1 %v5309_v57  ;;  %2301 = vmatmul.bf16.vlgmr.msrb.gmra.mxu3 %v5309_v57 }
 0x46f   : > { %v2011_v59 = vpop.f32.mrf.mxu3 }
 0x470   : > { %v2016_v53 = vpack.c.bf16 %v2011_v59, %v2011_v59 }
 0x472   : > { %2018 = vst [vmem:[#allocation3 + $0x14] sm:$0xf] %v2016_v53  ;;  %v1914_v16 = vpop.f32.mrf.mxu1 }
 0x473   : > { %v1919_v50 = vpack.c.bf16 %v1914_v16, %v1914_v16 }
 0x475   : > { %1921 = vst [vmem:[#allocation3 + $0x10] sm:$0xf] %v1919_v50  ;;  %v5672_v50 = vld [vmem:[%s7282_s18 + $0x1c0] sm:$0xf] }
 0x477   : > { %v2013_v61 = vpop.f32.mrf.mxu3 }
 0x478   : > { %v2017_v35 = vpack.c.bf16 %v2013_v61, %v2013_v61  ;;  %v6558_v61 = vld [vmem:[%s7282_s18 + $0x1dc] sm:$0xf0] }
 0x479   : > { %v6464_v0 = vld [vmem:[#allocation3 + $0x14] sm:$0xf] }
 0x47a   : > { %2019 = vst [vmem:[#allocation3 + $0x1c] sm:$0xf] %v2017_v35  ;;  %v1916_v33 = vpop.f32.mrf.mxu1  ;;  %v5928_v35 = vld [vmem:[%s7282_s18 + $0x3c0] sm:$0xf] }
 0x47b   : > { %v1920_v63 = vpack.c.bf16 %v1916_v33, %v1916_v33  ;;  %v5673_v33 = vor.u32 %v6558_v61, %v5672_v50 }
 0x47c   : > { %v5312_v1 = vld [vmem:[#allocation3 + $0x10] sm:$0xf] }
 0x47d   : > { %1922 = vst [vmem:[#allocation3 + $0x18] sm:$0xf] %v1920_v63  ;;  %v6622_v63 = vld [vmem:[%s7282_s18 + $0x3dc] sm:$0xf0]  ;;  %3182 = vmatpush.bf16.msra.mxu0 %v5673_v33  ;;  %v5802_v33 = vld [vmem:[%s7282_s18 + $0x2e0] sm:$0xf0] }
 0x481   : > { %v5314_v23 = vld [vmem:[#allocation3 + $0x18] sm:$0xf0] }
 0x482   : > { %v5317_v36 = vor.u32 %v6464_v0, %v5314_v23  ;;  %v6554_v0 = vld [vmem:[%s7282_s18 + $0x1c4] sm:$0xf] }
 0x483   : > { %v5674_v23 = vld [vmem:[%s7282_s18 + $0x1e0] sm:$0xf0] }
 0x484   : > { %2268 = vmatmul.bf16.gmra.mxu1 %v5317_v36  ;;  %2306 = vmatmul.bf16.gmra.mxu3 %v5317_v36  ;;  %v6465_v3 = vld [vmem:[#allocation3 + $0x14] sm:$0xf0]  ;;  %v5929_v36 = vor.u32 %v6622_v63, %v5928_v35  ;;  %v6586_v35 = vld [vmem:[%s7282_s18 + $0x2c4] sm:$0xf] }
 0x485   : > { %v5313_v5 = vor.u32 %v6465_v3, %v5312_v1  ;;  %v5677_v1 = vor.u32 %v6554_v0, %v5674_v23  ;;  %v6618_v3 = vld [vmem:[%s7282_s18 + $0x3c4] sm:$0xf]  ;;  %v5805_v63 = vor.u32 %v6586_v35, %v5802_v33  ;;  %v5512_v0 = vld [vmem:[%s7282_s18 + $0x80] sm:$0xf]  ;;  %v5680_v33 = vld [vmem:[%s7282_s18 + $0x1c8] sm:$0xf] }
 0x486   : > { %3201 = vmatpush.bf16.msra.mxu1 %v5929_v36  ;;  %v6518_v23 = vld [vmem:[%s7282_s18 + $0x9c] sm:$0xf0] }
 0x487   : > { %2249 = vmatmul.bf16.gmra.mxu0 %v5313_v5  ;;  %2287 = vmatmul.bf16.gmra.mxu2 %v5313_v5  ;;  %v5930_v5 = vld [vmem:[%s7282_s18 + $0x3e0] sm:$0xf0]  ;;  %v5768_v36 = vld [vmem:[%s7282_s18 + $0x280] sm:$0xf] }
 0x488   : > { %3220 = vmatpush.bf16.msra.mxu2 %v5677_v1  ;;  %v5513_v1 = vor.u32 %v6518_v23, %v5512_v0  ;;  %v5936_v0 = vld [vmem:[%s7282_s18 + $0x3c8] sm:$0xf] }
 0x4dc   : > { %v2245_v43 = vpop.f32.mrf.mxu0 }
 0x4e1   : > { %v2264_v42 = vpop.f32.mrf.mxu1 }
 0x4e2   : > { %v2265_v9 = vadd.f32 %v2264_v42, %v2245_v43  ;;  %v2283_v11 = vpop.f32.mrf.mxu2  ;;  %v5933_v43 = vor.u32 %v6618_v3, %v5930_v5  ;;  %v5640_v42 = vld [vmem:[%s7282_s18 + $0x180] sm:$0xf]  ;;  %v6514_v5 = vld [vmem:[%s7282_s18 + $0x84] sm:$0xf] }
 0x4e3   : > { %v6582_v3 = vld [vmem:[%s7282_s18 + $0x29c] sm:$0xf0] }
 0x4e4   : > { %v7981_v15 = vadd.f32 %v6907_v39, %v2265_v9  ;;  %v2247_v49 = vpop.f32.mrf.mxu0  ;;  %v6550_v9 = vld [vmem:[%s7282_s18 + $0x19c] sm:$0xf0]  ;;  %3239 = vmatpush.bf16.msra.mxu3 %v5933_v43  ;;  %v5514_v43 = vld [vmem:[%s7282_s18 + $0xa0] sm:$0xf0] }
 0x4e5   : > { %v6614_v39 = vld [vmem:[%s7282_s18 + $0x39c] sm:$0xf0] }
 0x4e6   : > { %9502 = vst [vmem:[#allocation19_spill] sm:$0xff] %v7981_v15  ;;  %v2321_v13 = vmul.f32 %v7981_v15, %v7981_v15 }
 0x4e7   : > { %v2302_v31 = vpop.f32.mrf.mxu3 }
 0x4e8   : > { %v2303_v40 = vadd.f32 %v2302_v31, %v2283_v11  ;;  %v5896_v11 = vld [vmem:[%s7282_s18 + $0x380] sm:$0xf]  ;;  %v5641_v31 = vor.u32 %v6550_v9, %v5640_v42  ;;  %v5769_v42 = vor.u32 %v6582_v3, %v5768_v36  ;;  %v5517_v9 = vor.u32 %v6514_v5, %v5514_v43  ;;  %v6623_v5 = vld [vmem:[%s7282_s18 + $0x3e4] sm:$0xf0]  ;;  %v6555_v43 = vld [vmem:[%s7282_s18 + $0x1cc] sm:$0xf] }
 0x4e9   : > { %v2266_v32 = vpop.f32.mrf.mxu1 }
 0x4ea   : > { %v7983_v18 = vadd.f32 %v6908_v7, %v2303_v40  ;;  %v2267_v62 = vadd.f32 %v2266_v32, %v2247_v49  ;;  %v2285_v48 = vpop.f32.mrf.mxu2  ;;  %v6546_v40 = vld [vmem:[%s7282_s18 + $0x184] sm:$0xf]  ;;  %v5897_v7 = vor.u32 %v6614_v39, %v5896_v11  ;;  %3183 = vmatpush.bf16.msra.mxu0 %v5641_v31 }
 0x4eb   : > { %v5642_v32 = vld [vmem:[%s7282_s18 + $0x1a0] sm:$0xf0] }
 0x4ec   : > { %9503 = vst [vmem:[#allocation20_spill] sm:$0xff] %v7983_v18  ;;  %v2322_v60 = vmul.f32 %v7983_v18, %v7983_v18  ;;  %v7989_v2 = vadd.f32 %v6909_v14, %v2267_v62  ;;  %v5645_v49 = vor.u32 %v6546_v40, %v5642_v32  ;;  %v6610_v62 = vld [vmem:[%s7282_s18 + $0x384] sm:$0xf]  ;;  %3202 = vmatpush.bf16.msra.mxu1 %v5897_v7  ;;  %v5480_v40 = vld [vmem:[%s7282_s18 + $0x40] sm:$0xf] }
 0x4ed   : > { %v6578_v11 = vld [vmem:[%s7282_s18 + $0x284] sm:$0xf]  ;;  %v6510_v32 = vld [vmem:[%s7282_s18 + $0x5c] sm:$0xf0] }
 0x4ee   : > { %v2329_v24 = vadd.f32 %v2322_v60, %v2321_v13  ;;  %9504 = vst [vmem:[#allocation21_spill] sm:$0xff] %v7989_v2  ;;  %v2323_v27 = vmul.f32 %v7989_v2, %v7989_v2  ;;  %v5898_v13 = vld [vmem:[%s7282_s18 + $0x3a0] sm:$0xf0]  ;;  %3221 = vmatpush.bf16.msra.mxu2 %v5645_v49  ;;  %v5736_v7 = vld [vmem:[%s7282_s18 + $0x240] sm:$0xf]  ;;  %v5481_v49 = vor.u32 %v6510_v32, %v5480_v40 }
 0x4ef   : > { %v2304_v20 = vpop.f32.mrf.mxu3  ;;  %v5901_v60 = vor.u32 %v6610_v62, %v5898_v13  ;;  %v5770_v31 = vld [vmem:[%s7282_s18 + $0x2a0] sm:$0xf0]  ;;  %v6574_v62 = vld [vmem:[%s7282_s18 + $0x25c] sm:$0xf0] }
 0x4f0   : > { %v2305_v21 = vadd.f32 %v2304_v20, %v2285_v48  ;;  %2330 = vadd.xlane.f32.xlu2 %v2329_v24  ;;  %v5608_v24 = vld [vmem:[%s7282_s18 + $0x140] sm:$0xf]  ;;  %v5773_v39 = vor.u32 %v6578_v11, %v5770_v31  ;;  %v6506_v13 = vld [vmem:[%s7282_s18 + $0x44] sm:$0xf]  ;;  %v6619_v11 = vld [vmem:[%s7282_s18 + $0x3cc] sm:$0xf] }
 0x4f1   : > { %v6542_v48 = vld [vmem:[%s7282_s18 + $0x15c] sm:$0xf0]  ;;  %3240 = vmatpush.bf16.msra.mxu3 %v5901_v60  ;;  %v5482_v60 = vld [vmem:[%s7282_s18 + $0x60] sm:$0xf0]  ;;  %v5938_v31 = vld [vmem:[%s7282_s18 + $0x3e8] sm:$0xf0] }
 0x4f2   : > { %v7991_v17 = vadd.f32 %v6910_v22, %v2305_v21  ;;  %v5864_v20 = vld [vmem:[%s7282_s18 + $0x340] sm:$0xf]  ;;  %v5609_v14 = vor.u32 %v6542_v48, %v5608_v24  ;;  %v6538_v22 = vld [vmem:[%s7282_s18 + $0x144] sm:$0xf]  ;;  %v5737_v24 = vor.u32 %v6574_v62, %v5736_v7  ;;  %v5485_v48 = vor.u32 %v6506_v13, %v5482_v60  ;;  %v6551_v62 = vld [vmem:[%s7282_s18 + $0x1a4] sm:$0xf0] }
 0x4f3   : > { %v6606_v21 = vld [vmem:[%s7282_s18 + $0x35c] sm:$0xf0]  ;;  %v5941_v32 = vor.u32 %v6619_v11, %v5938_v31  ;;  %v5904_v13 = vld [vmem:[%s7282_s18 + $0x388] sm:$0xf]  ;;  %v5842_v11 = vld [vmem:[%s7282_s18 + $0x328] sm:$0xf0] }
 0x4f4   : > { %9505 = vst [vmem:[#allocation22_spill] sm:$0xff] %v7991_v17  ;;  %v2324_v25 = vmul.f32 %v7991_v17, %v7991_v17  ;;  %3184 = vmatpush.bf16.msra.mxu0 %v5609_v14  ;;  %v5738_v14 = vld [vmem:[%s7282_s18 + $0x260] sm:$0xf0] }
 0x4f6   : > { %v2332_v19 = vadd.f32 %v2324_v25, %v2323_v27  ;;  %v5610_v27 = vld [vmem:[%s7282_s18 + $0x160] sm:$0xf0]  ;;  %v5865_v25 = vor.u32 %v6606_v21, %v5864_v20 }
 0x4f7   : > { %v6570_v20 = vld [vmem:[%s7282_s18 + $0x244] sm:$0xf] }
 0x4f8   : > { %2333 = vadd.xlane.f32.xlu1 %v2332_v19  ;;  %v5613_v19 = vor.u32 %v6538_v22, %v5610_v27  ;;  %3203 = vmatpush.bf16.msra.mxu1 %v5865_v25  ;;  %v5741_v22 = vor.u32 %v6570_v20, %v5738_v14  ;;  %v5448_v25 = vld [vmem:[%s7282_s18] sm:$0xf]  ;;  %v6615_v20 = vld [vmem:[%s7282_s18 + $0x3a4] sm:$0xf0]  ;;  %v6547_v14 = vld [vmem:[%s7282_s18 + $0x18c] sm:$0xf] }
 0x4fa   : > { %3222 = vmatpush.bf16.msra.mxu2 %v5613_v19  ;;  %v6502_v19 = vld [vmem:[%s7282_s18 + $0x1c] sm:$0xf0] }
 0x501   : > { %v2269_v12 = vpop.f32.mrf.mxu1 }
 0x504   : > { %v2250_v28 = vpop.f32.mrf.mxu0 }
 0x505   : > { %v2270_v30 = vadd.f32 %v2269_v12, %v2250_v28  ;;  %v6602_v12 = vld [vmem:[%s7282_s18 + $0x344] sm:$0xf] }
 0x506   : > { %v5866_v28 = vld [vmem:[%s7282_s18 + $0x360] sm:$0xf0] }
 0x507   : > { %v2307_v34 = vpop.f32.mrf.mxu3  ;;  %v7997_v41 = vadd.f32 %v6911_v38, %v2270_v30  ;;  %v5869_v30 = vor.u32 %v6602_v12, %v5866_v28  ;;  %v5832_v38 = vld [vmem:[%s7282_s18 + $0x300] sm:$0xf]  ;;  %v5449_v28 = vor.u32 %v6502_v19, %v5448_v25  ;;  %v6611_v25 = vld [vmem:[%s7282_s18 + $0x38c] sm:$0xf] }
 0x508   : > { %v5704_v12 = vld [vmem:[%s7282_s18 + $0x200] sm:$0xf]  ;;  %v5906_v19 = vld [vmem:[%s7282_s18 + $0x3a8] sm:$0xf0] }
 0x509   : > { %9506 = vst [vmem:[#allocation23_spill] sm:$0xff] %v7997_v41  ;;  %v2271_v46 = vpop.f32.mrf.mxu1  ;;  %v2325_v58 = vmul.f32 %v7997_v41, %v7997_v41  ;;  %3241 = vmatpush.bf16.msra.mxu3 %v5869_v30  ;;  %v6566_v30 = vld [vmem:[%s7282_s18 + $0x21c] sm:$0xf0] }
 0x50a   : > { %v2288_v37 = vpop.f32.mrf.mxu2 }
 0x50b   : > { %v2308_v44 = vadd.f32 %v2307_v34, %v2288_v37  ;;  %v5576_v34 = vld [vmem:[%s7282_s18 + $0x100] sm:$0xf] }
 0x50c   : > { %v2252_v8 = vpop.f32.mrf.mxu0  ;;  %v6534_v37 = vld [vmem:[%s7282_s18 + $0x11c] sm:$0xf0] }
 0x50d   : > { %v7999_v45 = vadd.f32 %v6912_v4, %v2308_v44  ;;  %v2272_v47 = vadd.f32 %v2271_v46, %v2252_v8  ;;  %v5577_v44 = vor.u32 %v6534_v37, %v5576_v34  ;;  %v6598_v8 = vld [vmem:[%s7282_s18 + $0x31c] sm:$0xf0]  ;;  %v6530_v4 = vld [vmem:[%s7282_s18 + $0x104] sm:$0xf] }
 0x50e   : > { %v5578_v46 = vld [vmem:[%s7282_s18 + $0x120] sm:$0xf0] }
 0x50f   : > { %9507 = vst [vmem:[#allocation24_spill] sm:$0xff] %v7999_v45  ;;  %v2326_v6 = vmul.f32 %v7999_v45, %v7999_v45  ;;  %v2309_v52 = vpop.f32.mrf.mxu3  ;;  %v8005_v29 = vadd.f32 %v6913_v26, %v2272_v47  ;;  %v5833_v47 = vor.u32 %v6598_v8, %v5832_v38  ;;  %3185 = vmatpush.bf16.msra.mxu0 %v5577_v44  ;;  %v6526_v26 = vld [vmem:[%s7282_s18 + $0xdc] sm:$0xf0]  ;;  %v6498_v34 = vld [vmem:[%s7282_s18 + $0x4] sm:$0xf] }
 0x510   : > { %v5450_v37 = vld [vmem:[%s7282_s18 + $0x20] sm:$0xf0]  ;;  %v5705_v44 = vor.u32 %v6566_v30, %v5704_v12 }
 0x511   : > { %v2335_v51 = vadd.f32 %v2326_v6, %v2325_v58  ;;  %9508 = vst [vmem:[#allocation25_spill] sm:$0xff] %v8005_v29  ;;  %v2327_v59 = vmul.f32 %v8005_v29, %v8005_v29  ;;  %v5581_v58 = vor.u32 %v6530_v4, %v5578_v46  ;;  %v6594_v6 = vld [vmem:[%s7282_s18 + $0x304] sm:$0xf]  ;;  %3204 = vmatpush.bf16.msra.mxu1 %v5833_v47 }
 0x512   : > { %v2290_v54 = vpop.f32.mrf.mxu2  ;;  %v5453_v8 = vor.u32 %v6498_v34, %v5450_v37  ;;  %v6562_v4 = vld [vmem:[%s7282_s18 + $0x204] sm:$0xf]  ;;  %v5616_v37 = vld [vmem:[%s7282_s18 + $0x148] sm:$0xf] }
 0x513   : > { %v2310_v55 = vadd.f32 %v2309_v52, %v2290_v54  ;;  %2336 = vadd.xlane.f32.xlu0 %v2335_v51  ;;  %v5834_v51 = vld [vmem:[%s7282_s18 + $0x320] sm:$0xf0]  ;;  %3223 = vmatpush.bf16.msra.mxu2 %v5581_v58  ;;  %v5544_v54 = vld [vmem:[%s7282_s18 + $0xc0] sm:$0xf] }
 0x514   : > { %v5837_v52 = vor.u32 %v6594_v6, %v5834_v51  ;;  %v5706_v46 = vld [vmem:[%s7282_s18 + $0x220] sm:$0xf0] }
 0x515   : > { %v8007_v57 = vadd.f32 %v6914_v56, %v2310_v55  ;;  %v5800_v55 = vld [vmem:[%s7282_s18 + $0x2c0] sm:$0xf]  ;;  %v5545_v56 = vor.u32 %v6526_v26, %v5544_v54  ;;  %v5709_v47 = vor.u32 %v6562_v4, %v5706_v46 }
 0x516   : > { %3242 = vmatpush.bf16.msra.mxu3 %v5837_v52 }
 0x517   : > { %9509 = vst [vmem:[#allocation26_spill] sm:$0xff] %v8007_v57  ;;  %v2328_v53 = vmul.f32 %v8007_v57, %v8007_v57  ;;  %3186 = vmatpush.bf16.msra.mxu0 %v5545_v56 }
 0x519   : > { %v2338_v16 = vadd.f32 %v2328_v53, %v2327_v59  ;;  %v6590_v59 = vld [vmem:[%s7282_s18 + $0x2dc] sm:$0xf0]  ;;  %v6522_v53 = vld [vmem:[%s7282_s18 + $0xc4] sm:$0xf] }
 0x51a   : > { %v5801_v50 = vor.u32 %v6590_v59, %v5800_v55  ;;  %3243 = vmatpush.bf16.msra.mxu3 %v5805_v63  ;;  %v6559_v63 = vld [vmem:[%s7282_s18 + $0x1e4] sm:$0xf0] }
 0x51b   : > { %2339 = vadd.xlane.f32.xlu2 %v2338_v16  ;;  %v5546_v16 = vld [vmem:[%s7282_s18 + $0xe0] sm:$0xf0]  ;;  %3187 = vmatpush.bf16.msra.mxu0 %v5513_v1  ;;  %v5681_v3 = vor.u32 %v6559_v63, %v5680_v33  ;;  %v6535_v33 = vld [vmem:[%s7282_s18 + $0x124] sm:$0xf0] }
 0x51c   : > { %v5549_v61 = vor.u32 %v6522_v53, %v5546_v16  ;;  %3205 = vmatpush.bf16.msra.mxu1 %v5801_v50  ;;  %v2320_v53 = vld [vmem:[%s7303_s16] sm:$0x3]  ;;  %v5840_v63 = vld [vmem:[%s7282_s18 + $0x308] sm:$0xf]  ;;  %s9578_s16 = sld [smem:[#allocation31_spill]] (!%p6230_p10) }
 0x51d   : > { %v8085_v23 = vperm.slane %v2320_v53, 1 }
 0x51e   : > { %3224 = vmatpush.bf16.msra.mxu2 %v5549_v61  ;;  %3244 = vmatpush.bf16.msra.mxu3 %v5773_v39  ;;  %v8080_v61 = vperm.slane %v2320_v53, 0 }
 0x51f   : > { %3188 = vmatpush.bf16.msra.mxu0 %v5481_v49  ;;  %v5648_v49 = vld [vmem:[%s7282_s18 + $0x188] sm:$0xf] }
 0x520   : > { %3206 = vmatpush.bf16.msra.mxu1 %v5769_v42  ;;  %v5937_v42 = vor.u32 %v6623_v5, %v5936_v0  ;;  %v5586_v5 = vld [vmem:[%s7282_s18 + $0x128] sm:$0xf0] }
 0x522   : > { %3225 = vmatpush.bf16.msra.mxu2 %v5517_v9  ;;  %3245 = vmatpush.bf16.msra.mxu3 %v5741_v22  ;;  %v5682_v9 = vld [vmem:[%s7282_s18 + $0x1e8] sm:$0xf0]  ;;  %v5905_v22 = vor.u32 %v6615_v20, %v5904_v13 }
 0x523   : > { %3189 = vmatpush.bf16.msra.mxu0 %v5449_v28  ;;  %v5685_v40 = vor.u32 %v6555_v43, %v5682_v9  ;;  %v5909_v28 = vor.u32 %v6611_v25, %v5906_v19  ;;  %v6595_v9 = vld [vmem:[%s7282_s18 + $0x30c] sm:$0xf]  ;;  %v5776_v25 = vld [vmem:[%s7282_s18 + $0x288] sm:$0xf] }
 0x524   : > { %3207 = vmatpush.bf16.msra.mxu1 %v5737_v24  ;;  %v6523_v13 = vld [vmem:[%s7282_s18 + $0xcc] sm:$0xf]  ;;  %v6583_v19 = vld [vmem:[%s7282_s18 + $0x2a4] sm:$0xf0] }
 0x525   : > { %v6587_v20 = vld [vmem:[%s7282_s18 + $0x2cc] sm:$0xf] }
 0x526   : > { %3226 = vmatpush.bf16.msra.mxu2 %v5485_v48  ;;  %3246 = vmatpush.bf16.msra.mxu3 %v5709_v47  ;;  %v5649_v48 = vor.u32 %v6551_v62, %v5648_v49  ;;  %v6607_v47 = vld [vmem:[%s7282_s18 + $0x364] sm:$0xf0] }
 0x527   : > { %3258 = vmatpush.bf16.msrb.mxu0 %v5681_v3  ;;  %v6531_v3 = vld [vmem:[%s7282_s18 + $0x10c] sm:$0xf]  ;;  %v6591_v62 = vld [vmem:[%s7282_s18 + $0x2e4] sm:$0xf0] }
 0x528   : > { %3208 = vmatpush.bf16.msra.mxu1 %v5705_v44  ;;  %v5872_v44 = vld [vmem:[%s7282_s18 + $0x348] sm:$0xf] }
 0x52a   : > { %3227 = vmatpush.bf16.msra.mxu2 %v5453_v8  ;;  %3315 = vmatpush.bf16.msrb.mxu3 %v5941_v32  ;;  %v6527_v32 = vld [vmem:[%s7282_s18 + $0xe4] sm:$0xf0] }
 0x52b   : > { %3259 = vmatpush.bf16.msrb.mxu0 %v5649_v48 }
 0x52c   : > { %3277 = vmatpush.bf16.msrb.mxu1 %v5937_v42  ;;  %v5589_v42 = vor.u32 %v6531_v3, %v5586_v5  ;;  %v5712_v3 = vld [vmem:[%s7282_s18 + $0x208] sm:$0xf] }
 0x52d   : > { %v6567_v5 = vld [vmem:[%s7282_s18 + $0x224] sm:$0xf0] }
 0x52e   : > { %3296 = vmatpush.bf16.msrb.mxu2 %v5685_v40  ;;  %3316 = vmatpush.bf16.msrb.mxu3 %v5909_v28  ;;  %v5552_v40 = vld [vmem:[%s7282_s18 + $0xc8] sm:$0xf] }
 0x52f   : > { %v5553_v49 = vor.u32 %v6527_v32, %v5552_v40 }
 0x530   : > { %3278 = vmatpush.bf16.msrb.mxu1 %v5905_v22 }
 0x563   : > { %v2331_v21 = vpop.xlane.xlu2 %2330 }
 0x564   : > { %v2341_v27 = vmul.f32 %v2331_v21, %v7433_v10  ;;  %v5650_v21 = vld [vmem:[%s7282_s18 + $0x1a8] sm:$0xf0] }
 0x566   : > { %v2345_v38 = vadd.f32 1e-06, %v2341_v27  ;;  %v5653_v27 = vor.u32 %v6547_v14, %v5650_v21  ;;  %v5810_v14 = vld [vmem:[%s7282_s18 + $0x2e8] sm:$0xf0]  ;;  %v5520_v21 = vld [vmem:[%s7282_s18 + $0x88] sm:$0xf] }
 0x567   : > { %v5813_v22 = vor.u32 %v6587_v20, %v5810_v14  ;;  %v6560_v20 = vld [vmem:[%s7282_s18 + $0x1ec] sm:$0xf0] }
 0x568   : > { %6835 = vrsqrt.f32 %v2345_v38  ;;  %vm2355_vm11 = vweird.f32 %v2345_v38  ;;  %3297 = vmatpush.bf16.msrb.mxu2 %v5653_v27  ;;  %v6519_v27 = vld [vmem:[%s7282_s18 + $0xa4] sm:$0xf0]  ;;  %v5944_v14 = vld [vmem:[%s7282_s18 + $0x3d0] sm:$0xf] }
 0x569   : > { %v5521_v28 = vor.u32 %v6519_v27, %v5520_v21  ;;  %v6624_v27 = vld [vmem:[%s7282_s18 + $0x3ec] sm:$0xf0] }
 0x56b   : > { %v2334_v58 = vpop.xlane.xlu1 %2333 }
 0x56c   : > { %v2342_v6 = vmul.f32 %v2334_v58, %v7433_v10  ;;  %v6539_v58 = vld [vmem:[%s7282_s18 + $0x14c] sm:$0xf] }
 0x56e   : > { %v6836_v51 = vpop.eup %6835  ;;  %v2346_v52 = vadd.f32 1e-06, %v2342_v6  ;;  %v5618_v6 = vld [vmem:[%s7282_s18 + $0x168] sm:$0xf0] }
 0x56f   : > { %v2350_v54 = vmul.f32 %v6836_v51, %v2345_v38  ;;  %vm2356_vm8 = vweird.f32 %v6836_v51  ;;  %v6543_v38 = vld [vmem:[%s7282_s18 + $0x164] sm:$0xf0] }
 0x570   : > { %6837 = vrsqrt.f32 %v2346_v52  ;;  %vm2357_vm12 = vmor %vm2355_vm11, %vm2356_vm8  ;;  %vm2365_vm14 = vweird.f32 %v2346_v52  ;;  %v5617_v46 = vor.u32 %v6543_v38, %v5616_v37  ;;  %v5522_v37 = vld [vmem:[%s7282_s18 + $0xa8] sm:$0xf0] }
 0x571   : > { %v2351_v26 = vmul.f32 %v6836_v51, %v2350_v54  ;;  %v5873_v54 = vor.u32 %v6607_v47, %v5872_v44  ;;  %v6579_v38 = vld [vmem:[%s7282_s18 + $0x28c] sm:$0xf]  ;;  %v6511_v47 = vld [vmem:[%s7282_s18 + $0x64] sm:$0xf0] }
 0x572   : > { %3260 = vmatpush.bf16.msrb.mxu0 %v5617_v46  ;;  %v5488_v46 = vld [vmem:[%s7282_s18 + $0x48] sm:$0xf] }
 0x573   : > { %v2352_v55 = vmul.f32 0.5, %v2351_v26  ;;  %v5621_v26 = vor.u32 %v6539_v58, %v5618_v6  ;;  %3279 = vmatpush.bf16.msrb.mxu1 %v5873_v54  ;;  %v5744_v6 = vld [vmem:[%s7282_s18 + $0x248] sm:$0xf] }
 0x575   : > { %v2353_v56 = vsub.f32 1.5, %v2352_v55  ;;  %v6603_v55 = vld [vmem:[%s7282_s18 + $0x34c] sm:$0xf]  ;;  %3298 = vmatpush.bf16.msrb.mxu2 %v5621_v26 }
 0x576   : > { %v6838_v59 = vpop.eup %6837 }
 0x577   : > { %v2354_v16 = vmul.f32 %v6836_v51, %v2353_v56  ;;  %v2360_v50 = vmul.f32 %v6838_v59, %v2346_v52  ;;  %vm2366_vm13 = vweird.f32 %v6838_v59  ;;  %v5874_v56 = vld [vmem:[%s7282_s18 + $0x368] sm:$0xf0] }
 0x578   : > { %vm2367_vm15 = vmor %vm2365_vm14, %vm2366_vm13 }
 0x579   : > { %v2361_v35 = vmul.f32 %v6838_v59, %v2360_v50  ;;  %v2358_v36 = vsel %vm2357_vm12, %v6836_v51, %v2354_v16  ;;  %3299 = vmatpush.bf16.msrb.mxu2 %v5589_v42  ;;  %v6499_v42 = vld [vmem:[%s7282_s18 + $0xc] sm:$0xf] }
 0x57a   : > { %v2389_v7 = vmul.f32 %v2358_v36, %v7981_v15  ;;  %v2390_v60 = vmul.f32 %v2358_v36, %v7983_v18 }
 0x57b   : > { %v2362_v1 = vmul.f32 0.5, %v2361_v35  ;;  %v5584_v35 = vld [vmem:[%s7282_s18 + $0x108] sm:$0xf] }
 0x57c   : > { %v2402_v8 = vmul.f32 %v8080_v61, %v2389_v7  ;;  %v2403_v4 = vmul.f32 %v8085_v23, %v2390_v60  ;;  %v5585_v36 = vor.u32 %v6535_v33, %v5584_v35  ;;  %v5808_v7 = vld [vmem:[%s7282_s18 + $0x2c8] sm:$0xf]  ;;  %v5554_v60 = vld [vmem:[%s7282_s18 + $0xe8] sm:$0xf0] }
 0x57d   : > { %v2363_v39 = vsub.f32 1.5, %v2362_v1  ;;  %v6599_v1 = vld [vmem:[%s7282_s18 + $0x324] sm:$0xf0]  ;;  %v5557_v48 = vor.u32 %v6523_v13, %v5554_v60  ;;  %v5746_v33 = vld [vmem:[%s7282_s18 + $0x268] sm:$0xf0] }
 0x57e   : > { %v5841_v43 = vor.u32 %v6599_v1, %v5840_v63  ;;  %3261 = vmatpush.bf16.msrb.mxu0 %v5585_v36  ;;  %v5456_v63 = vld [vmem:[%s7282_s18 + $0x8] sm:$0xf] }
 0x57f   : > { %v2364_v24 = vmul.f32 %v6838_v59, %v2363_v39  ;;  %v5845_v39 = vor.u32 %v6595_v9, %v5842_v11  ;;  %3300 = vmatpush.bf16.msrb.mxu2 %v5557_v48  ;;  %v6503_v1 = vld [vmem:[%s7282_s18 + $0x24] sm:$0xf0]  ;;  %v5458_v9 = vld [vmem:[%s7282_s18 + $0x28] sm:$0xf0]  ;;  %v5688_v48 = vld [vmem:[%s7282_s18 + $0x1d0] sm:$0xf] }
 0x580   : > { %3280 = vmatpush.bf16.msrb.mxu1 %v5841_v43  ;;  %v6563_v11 = vld [vmem:[%s7282_s18 + $0x20c] sm:$0xf]  ;;  %v5457_v32 = vor.u32 %v6503_v1, %v5456_v63  ;;  %v6540_v1 = vld [vmem:[%s7282_s18 + $0x154] sm:$0xf] }
 0x581   : > { %v2368_v12 = vsel %vm2367_vm15, %v6838_v59, %v2364_v24  ;;  %v5877_v59 = vor.u32 %v6603_v55, %v5874_v56  ;;  %v5809_v24 = vor.u32 %v6591_v62, %v5808_v7  ;;  %v5490_v55 = vld [vmem:[%s7282_s18 + $0x68] sm:$0xf0]  ;;  %v5713_v7 = vor.u32 %v6567_v5, %v5712_v3 }
 0x582   : > { %v2391_v30 = vmul.f32 %v2368_v12, %v7989_v2  ;;  %v2392_v34 = vmul.f32 %v2368_v12, %v7991_v17  ;;  %3262 = vmatpush.bf16.msrb.mxu0 %v5553_v49  ;;  %v6571_v56 = vld [vmem:[%s7282_s18 + $0x24c] sm:$0xf]  ;;  %v5461_v49 = vor.u32 %v6499_v42, %v5458_v9  ;;  %v5626_v42 = vld [vmem:[%s7282_s18 + $0x170] sm:$0xf0] }
 0x583   : > { %3317 = vmatpush.bf16.msrb.mxu3 %v5877_v59  ;;  %v5749_v36 = vor.u32 %v6571_v56, %v5746_v33  ;;  %v5914_v56 = vld [vmem:[%s7282_s18 + $0x3b0] sm:$0xf0]  ;;  %v6544_v33 = vld [vmem:[%s7282_s18 + $0x16c] sm:$0xf0] }
 0x584   : > { %v2404_v51 = vmul.f32 %v8080_v61, %v2391_v30  ;;  %v2405_v52 = vmul.f32 %v8085_v23, %v2392_v34  ;;  %3281 = vmatpush.bf16.msrb.mxu1 %v5809_v24  ;;  %v5777_v30 = vor.u32 %v6583_v19, %v5776_v25  ;;  %v6515_v34 = vld [vmem:[%s7282_s18 + $0x8c] sm:$0xf]  ;;  %v6556_v25 = vld [vmem:[%s7282_s18 + $0x1d4] sm:$0xf] }
 0x585   : > { %v6604_v9 = vld [vmem:[%s7282_s18 + $0x354] sm:$0xf] }
 0x586   : > { %v8117_v53 = vpack.c.bf16 %v2404_v51, %v2402_v8  ;;  %v8119_v16 = vpack.c.bf16 %v2405_v52, %v2403_v4  ;;  %v2337_v50 = vpop.xlane.xlu0 %2336  ;;  %v5525_v8 = vor.u32 %v6515_v34, %v5522_v37  ;;  %v5778_v4 = vld [vmem:[%s7282_s18 + $0x2a8] sm:$0xf0]  ;;  %v6575_v51 = vld [vmem:[%s7282_s18 + $0x264] sm:$0xf0]  ;;  %3263 = vmatpush.bf16.msrb.mxu0 %v5521_v28  ;;  %v5690_v28 = vld [vmem:[%s7282_s18 + $0x1f0] sm:$0xf0] }
 0x587   : > { %v2343_v0 = vmul.f32 %v2337_v50, %v7433_v10  ;;  %3318 = vmatpush.bf16.msrb.mxu3 %v5845_v39  ;;  %v5781_v58 = vor.u32 %v6579_v38, %v5778_v4  ;;  %v6507_v52 = vld [vmem:[%s7282_s18 + $0x4c] sm:$0xf]  ;;  %v5489_v50 = vor.u32 %v6511_v47, %v5488_v46  ;;  %v5745_v35 = vor.u32 %v6575_v51, %v5744_v6  ;;  %v5946_v34 = vld [vmem:[%s7282_s18 + $0x3f0] sm:$0xf0]  ;;  %v5912_v4 = vld [vmem:[%s7282_s18 + $0x390] sm:$0xf] }
 0x588   : > { %3190 = vmatmul.bf16.vlgmr.msra.gmra.mxu0 %v8117_v53  ;;  %3209 = vmatmul.bf16.vlgmr.msra.gmra.mxu1 %v8119_v16  ;;  %v5714_v39 = vld [vmem:[%s7282_s18 + $0x228] sm:$0xf0]  ;;  %v5693_v37 = vor.u32 %v6556_v25, %v5690_v28  ;;  %v5594_v25 = vld [vmem:[%s7282_s18 + $0x130] sm:$0xf0] }
 0x589   : > { %v8132_v31 = vadd.f32 1e-06, %v2343_v0  ;;  %3228 = vmatmul.bf16.vlgmr.msra.gmra.mxu2 %v8117_v53  ;;  %3247 = vmatmul.bf16.vlgmr.msra.gmra.mxu3 %v8119_v16  ;;  %v5493_v0 = vor.u32 %v6507_v52, %v5490_v55  ;;  %v5717_v62 = vor.u32 %v6563_v11, %v5714_v39  ;;  %v5658_v52 = vld [vmem:[%s7282_s18 + $0x1b0] sm:$0xf0] }
 0x58a   : > { %3282 = vmatpush.bf16.msrb.mxu1 %v5777_v30  ;;  %3301 = vmatpush.bf16.msrb.mxu2 %v5525_v8  ;;  %v6620_v30 = vld [vmem:[%s7282_s18 + $0x3d4] sm:$0xf]  ;;  %v6552_v8 = vld [vmem:[%s7282_s18 + $0x1ac] sm:$0xf0] }
 0x58b   : > { %6839 = vrsqrt.f32 %v8132_v31  ;;  %3319 = vmatpush.bf16.msrb.mxu3 %v5813_v22  ;;  %3264 = vmatpush.bf16.msrb.mxu0 %v5489_v50  ;;  %v5689_v22 = vor.u32 %v6560_v20, %v5688_v48  ;;  %vm2375_vm1 = vweird.f32 %v8132_v31  ;;  %v5949_v38 = vor.u32 %v6620_v30, %v5946_v34  ;;  %v6612_v55 = vld [vmem:[%s7282_s18 + $0x394] sm:$0xf]  ;;  %v5784_v50 = vld [vmem:[%s7282_s18 + $0x290] sm:$0xf] }
 0x58c   : > { %v5882_v11 = vld [vmem:[%s7282_s18 + $0x370] sm:$0xf0] }
 0x58e   : > { %v2340_v12 = vpop.xlane.xlu2 %2339  ;;  %3283 = vmatpush.bf16.msrb.mxu1 %v5745_v35  ;;  %3302 = vmatpush.bf16.msrb.mxu2 %v5493_v0  ;;  %v5624_v35 = vld [vmem:[%s7282_s18 + $0x150] sm:$0xf] }
 0x58f   : > { %v2344_v44 = vmul.f32 %v2340_v12, %v7433_v10  ;;  %3320 = vmatpush.bf16.msrb.mxu3 %v5781_v58  ;;  %3265 = vmatpush.bf16.msrb.mxu0 %v5457_v32  ;;  %v5945_v12 = vor.u32 %v6624_v27, %v5944_v14  ;;  %v6548_v58 = vld [vmem:[%s7282_s18 + $0x194] sm:$0xf]  ;;  %v5625_v63 = vor.u32 %v6544_v33, %v5624_v35  ;;  %v5880_v0 = vld [vmem:[%s7282_s18 + $0x350] sm:$0xf] }
 0x590   : > { %v5885_v32 = vor.u32 %v6604_v9, %v5882_v11  ;;  %v6516_v33 = vld [vmem:[%s7282_s18 + $0x94] sm:$0xf] }
 0x591   : > { %v8159_v54 = vpop.eup %6839  ;;  %v8161_v26 = vadd.f32 1e-06, %v2344_v44  ;;  %v5656_v44 = vld [vmem:[%s7282_s18 + $0x190] sm:$0xf]  ;;  %v6508_v11 = vld [vmem:[%s7282_s18 + $0x54] sm:$0xf] }
 0x592   : > { %v2370_v59 = vmul.f32 %v8159_v54, %v8132_v31  ;;  %3284 = vmatpush.bf16.msrb.mxu1 %v5713_v7  ;;  %vm2376_vm0 = vweird.f32 %v8159_v54  ;;  %3303 = vmatpush.bf16.msrb.mxu2 %v5461_v49  ;;  %v5657_v47 = vor.u32 %v6552_v8, %v5656_v44  ;;  %v6616_v31 = vld [vmem:[%s7282_s18 + $0x3ac] sm:$0xf0] }
 0x593   : > { %6841 = vrsqrt.f32 %v8161_v26  ;;  %3321 = vmatpush.bf16.msrb.mxu3 %v5749_v36  ;;  %3334 = vmatpush.bf16.msra.mxu0 %v5689_v22  ;;  %vm2377_vm3 = vmor %vm2375_vm1, %vm2376_vm0  ;;  %vm2385_vm4 = vweird.f32 %v8161_v26  ;;  %v5913_v51 = vor.u32 %v6616_v31, %v5912_v4  ;;  %v6608_v36 = vld [vmem:[%s7282_s18 + $0x36c] sm:$0xf0]  ;;  %v5562_v31 = vld [vmem:[%s7282_s18 + $0xf0] sm:$0xf0] }
 0x594   : > { %v2371_v43 = vmul.f32 %v8159_v54, %v2370_v59  ;;  %v5592_v7 = vld [vmem:[%s7282_s18 + $0x110] sm:$0xf] }
 0x595   : > { %v6536_v49 = vld [vmem:[%s7282_s18 + $0x12c] sm:$0xf0] }
 0x596   : > { %v2372_v40 = vmul.f32 0.5, %v2371_v43  ;;  %3353 = vmatpush.bf16.msra.mxu1 %v5945_v12  ;;  %3372 = vmatpush.bf16.msra.mxu2 %v5693_v37  ;;  %v5881_v43 = vor.u32 %v6608_v36, %v5880_v0  ;;  %v5593_v14 = vor.u32 %v6536_v49, %v5592_v7  ;;  %v5850_v12 = vld [vmem:[%s7282_s18 + $0x330] sm:$0xf0]  ;;  %v5560_v8 = vld [vmem:[%s7282_s18 + $0xd0] sm:$0xf] }
 0x597   : > { %3322 = vmatpush.bf16.msrb.mxu3 %v5717_v62  ;;  %3335 = vmatpush.bf16.msra.mxu0 %v5657_v47  ;;  %v5848_v62 = vld [vmem:[%s7282_s18 + $0x310] sm:$0xf]  ;;  %v6524_v47 = vld [vmem:[%s7282_s18 + $0xd4] sm:$0xf] }
 0x598   : > { %v2373_v13 = vsub.f32 1.5, %v2372_v40  ;;  %v5629_v40 = vor.u32 %v6540_v1, %v5626_v42  ;;  %v5816_v4 = vld [vmem:[%s7282_s18 + $0x2d0] sm:$0xf]  ;;  %v6580_v0 = vld [vmem:[%s7282_s18 + $0x294] sm:$0xf] }
 0x599   : > { %v8178_v60 = vpop.eup %6841  ;;  %v5786_v36 = vld [vmem:[%s7282_s18 + $0x2b0] sm:$0xf0]  ;;  %v5496_v1 = vld [vmem:[%s7282_s18 + $0x50] sm:$0xf] }
 0x59a   : > { %v2380_v24 = vmul.f32 %v8178_v60, %v8161_v26  ;;  %v2374_v21 = vmul.f32 %v8159_v54, %v2373_v13  ;;  %vm2386_vm2 = vweird.f32 %v8178_v60  ;;  %v5917_v26 = vor.u32 %v6612_v55, %v5914_v56  ;;  %3354 = vmatpush.bf16.msra.mxu1 %v5913_v51  ;;  %v5818_v51 = vld [vmem:[%s7282_s18 + $0x2f0] sm:$0xf0] }
 0x59b   : > { %3391 = vmatpush.bf16.msra.mxu3 %v5949_v38  ;;  %vm8209_vm5 = vmor %vm2385_vm4, %vm2386_vm2  ;;  %3336 = vmatpush.bf16.msra.mxu0 %v5625_v63  ;;  %v5565_v55 = vor.u32 %v6524_v47, %v5562_v31  ;;  %v5530_v63 = vld [vmem:[%s7282_s18 + $0xb0] sm:$0xf0]  ;;  %v5789_v9 = vor.u32 %v6580_v0, %v5786_v36  ;;  %v6621_v31 = vld [vmem:[%s7282_s18 + $0x3dc] sm:$0xf] }
 0x59c   : > { %v2381_v19 = vmul.f32 %v8178_v60, %v2380_v24  ;;  %v2378_v6 = vsel %vm2377_vm3, %v8159_v54, %v2374_v21  ;;  %v5661_v54 = vor.u32 %v6548_v58, %v5658_v52  ;;  %v6600_v24 = vld [vmem:[%s7282_s18 + $0x32c] sm:$0xf0]  ;;  %v6532_v21 = vld [vmem:[%s7282_s18 + $0x114] sm:$0xf]  ;;  %v5533_v42 = vor.u32 %v6516_v33, %v5530_v63  ;;  %v5922_v63 = vld [vmem:[%s7282_s18 + $0x3b8] sm:$0xf0] }
 0x59d   : > { %v2393_v3 = vmul.f32 %v2378_v6, %v7997_v41  ;;  %v2394_v39 = vmul.f32 %v2378_v6, %v7999_v45  ;;  %v5849_v27 = vor.u32 %v6600_v24, %v5848_v62  ;;  %v5597_v38 = vor.u32 %v6532_v21, %v5594_v25  ;;  %v6588_v6 = vld [vmem:[%s7282_s18 + $0x2d4] sm:$0xf]  ;;  %v5528_v52 = vld [vmem:[%s7282_s18 + $0x90] sm:$0xf]  ;;  %v5632_v0 = vld [vmem:[%s7282_s18 + $0x158] sm:$0xf] }
 0x59e   : > { %v2382_v46 = vmul.f32 0.5, %v2381_v19  ;;  %3373 = vmatpush.bf16.msra.mxu2 %v5661_v54  ;;  %3355 = vmatpush.bf16.msra.mxu1 %v5881_v43  ;;  %v6596_v19 = vld [vmem:[%s7282_s18 + $0x314] sm:$0xf]  ;;  %v5821_v56 = vor.u32 %v6588_v6, %v5818_v51  ;;  %v6584_v54 = vld [vmem:[%s7282_s18 + $0x2ac] sm:$0xf0] }
 0x59f   : > { %3392 = vmatpush.bf16.msra.mxu3 %v5917_v26  ;;  %v2406_v22 = vmul.f32 %v8080_v61, %v2393_v3  ;;  %3337 = vmatpush.bf16.msra.mxu0 %v5593_v14  ;;  %v5853_v44 = vor.u32 %v6596_v19, %v5850_v12  ;;  %v5785_v35 = vor.u32 %v6584_v54, %v5784_v50  ;;  %v6512_v3 = vld [vmem:[%s7282_s18 + $0x6c] sm:$0xf0]  ;;  %v6572_v7 = vld [vmem:[%s7282_s18 + $0x254] sm:$0xf]  ;;  %v5664_v6 = vld [vmem:[%s7282_s18 + $0x198] sm:$0xf] }
 0x5a0   : > { %v2383_v59 = vsub.f32 1.5, %v2382_v46  ;;  %v6592_v46 = vld [vmem:[%s7282_s18 + $0x2ec] sm:$0xf0]  ;;  %v5754_v49 = vld [vmem:[%s7282_s18 + $0x270] sm:$0xf0] }
 0x5a1   : > { %v5817_v58 = vor.u32 %v6592_v46, %v5816_v4  ;;  %v6576_v43 = vld [vmem:[%s7282_s18 + $0x26c] sm:$0xf0]  ;;  %v5757_v14 = vor.u32 %v6572_v7, %v5754_v49  ;;  %v6500_v21 = vld [vmem:[%s7282_s18 + $0x14] sm:$0xf]  ;;  %v6557_v4 = vld [vmem:[%s7282_s18 + $0x1dc] sm:$0xf] }
 0x5a2   : > { %v2384_v5 = vmul.f32 %v8178_v60, %v2383_v59  ;;  %3374 = vmatpush.bf16.msra.mxu2 %v5629_v40  ;;  %3356 = vmatpush.bf16.msra.mxu1 %v5849_v27  ;;  %v6520_v59 = vld [vmem:[%s7282_s18 + $0xac] sm:$0xf0]  ;;  %v5497_v40 = vor.u32 %v6512_v3, %v5496_v1  ;;  %v5466_v25 = vld [vmem:[%s7282_s18 + $0x30] sm:$0xf0]  ;;  %v6549_v54 = vld [vmem:[%s7282_s18 + $0x19c] sm:$0xf] }
 0x5a3   : > { %3393 = vmatpush.bf16.msra.mxu3 %v5885_v32  ;;  %v5529_v26 = vor.u32 %v6520_v59, %v5528_v52  ;;  %v5464_v62 = vld [vmem:[%s7282_s18 + $0x10] sm:$0xf]  ;;  %v6564_v19 = vld [vmem:[%s7282_s18 + $0x214] sm:$0xf]  ;;  %v6553_v52 = vld [vmem:[%s7282_s18 + $0x1b4] sm:$0xf0] }
 0x5a4   : > { %v2388_v13 = vsel %vm8209_vm5, %v8178_v60, %v2384_v5  ;;  %v2407_v60 = vmul.f32 %v8085_v23, %v2394_v39  ;;  %v5752_v5 = vld [vmem:[%s7282_s18 + $0x250] sm:$0xf]  ;;  %v5498_v39 = vld [vmem:[%s7282_s18 + $0x70] sm:$0xf0]  ;;  %v5665_v59 = vor.u32 %v6553_v52, %v5664_v6  ;;  %v6545_v36 = vld [vmem:[%s7282_s18 + $0x174] sm:$0xf0] }
 0x5a5   : > { %v2395_v48 = vmul.f32 %v2388_v13, %v8005_v29  ;;  %v2396_v20 = vmul.f32 %v2388_v13, %v8007_v57  ;;  %v5753_v32 = vor.u32 %v6576_v43, %v5752_v5  ;;  %v6504_v13 = vld [vmem:[%s7282_s18 + $0x2c] sm:$0xf0]  ;;  %v5722_v12 = vld [vmem:[%s7282_s18 + $0x230] sm:$0xf0]  ;;  %v5888_v3 = vld [vmem:[%s7282_s18 + $0x358] sm:$0xf] }
 0x5a6   : > { %3375 = vmatpush.bf16.msra.mxu2 %v5597_v38  ;;  %3357 = vmatpush.bf16.msra.mxu1 %v5817_v58  ;;  %v5720_v24 = vld [vmem:[%s7282_s18 + $0x210] sm:$0xf]  ;;  %v6561_v38 = vld [vmem:[%s7282_s18 + $0x1f4] sm:$0xf0]  ;;  %v5954_v58 = vld [vmem:[%s7282_s18 + $0x3f8] sm:$0xf0] }
 0x5a7   : > { %v2408_v28 = vmul.f32 %v8080_v61, %v2395_v48  ;;  %v2409_v30 = vmul.f32 %v8085_v23, %v2396_v20  ;;  %v6528_v61 = vld [vmem:[%s7282_s18 + $0xec] sm:$0xf0]  ;;  %3394 = vmatpush.bf16.msra.mxu3 %v5853_v44  ;;  %v5501_v20 = vor.u32 %v6508_v11, %v5498_v39  ;;  %v5952_v44 = vld [vmem:[%s7282_s18 + $0x3d8] sm:$0xf]  ;;  %v5957_v51 = vor.u32 %v6621_v31, %v5954_v58  ;;  %v6541_v43 = vld [vmem:[%s7282_s18 + $0x15c] sm:$0xf] }
 0x5a8   : > { %v5561_v23 = vor.u32 %v6528_v61, %v5560_v8  ;;  %v6568_v48 = vld [vmem:[%s7282_s18 + $0x22c] sm:$0xf0]  ;;  %v6625_v61 = vld [vmem:[%s7282_s18 + $0x3f4] sm:$0xf0]  ;;  %v5890_v11 = vld [vmem:[%s7282_s18 + $0x378] sm:$0xf0]  ;;  %v5633_v39 = vor.u32 %v6545_v36, %v5632_v0 }
 0x5a9   : > { %v8241_v34 = vpack.c.bf16 %v2408_v28, %v2406_v22  ;;  %v8243_v37 = vpack.c.bf16 %v2409_v30, %v2407_v60  ;;  %v5465_v22 = vor.u32 %v6504_v13, %v5464_v62  ;;  %v5721_v27 = vor.u32 %v6568_v48, %v5720_v24  ;;  %v5696_v30 = vld [vmem:[%s7282_s18 + $0x1d8] sm:$0xf]  ;;  %v6533_v48 = vld [vmem:[%s7282_s18 + $0x11c] sm:$0xf]  ;;  %v6160_v57 = vld [vmem:[%s7305_s20 + $0x170] sm:$0xf] }
 0x5aa   : > { %3338 = vmatpush.bf16.msra.mxu0 %v5561_v23  ;;  %3376 = vmatpush.bf16.msra.mxu2 %v5565_v55  ;;  %v5469_v60 = vor.u32 %v6500_v21, %v5466_v25  ;;  %v5725_v28 = vor.u32 %v6564_v19, %v5722_v12  ;;  %v5697_v8 = vor.u32 %v6561_v38, %v5696_v30  ;;  %v5698_v23 = vld [vmem:[%s7282_s18 + $0x1f8] sm:$0xf0]  ;;  %v5920_v55 = vld [vmem:[%s7282_s18 + $0x398] sm:$0xf] }
 0x5ab   : > { %3195 = vmatmul.bf16.gmra.mxu0 %v8241_v34  ;;  %3214 = vmatmul.bf16.gmra.mxu1 %v8243_v37  ;;  %v5953_v46 = vor.u32 %v6625_v61, %v5952_v44  ;;  %v5701_v47 = vor.u32 %v6557_v4, %v5698_v23  ;;  %v6609_v5 = vld [vmem:[%s7282_s18 + $0x374] sm:$0xf0]  ;;  %v5602_v21 = vld [vmem:[%s7282_s18 + $0x138] sm:$0xf0] }
 0x5ac   : > { %3233 = vmatmul.bf16.gmra.mxu2 %v8241_v34  ;;  %3252 = vmatmul.bf16.gmra.mxu3 %v8243_v37  ;;  %v6537_v62 = vld [vmem:[%s7282_s18 + $0x134] sm:$0xf0]  ;;  %v5605_v25 = vor.u32 %v6533_v48, %v5602_v21  ;;  %v6525_v44 = vld [vmem:[%s7282_s18 + $0xdc] sm:$0xf] }
 0x5ad   : > { %3395 = vmatpush.bf16.msra.mxu3 %v5821_v56  ;;  %3358 = vmatpush.bf16.msra.mxu1 %v5785_v35  ;;  %v6617_v56 = vld [vmem:[%s7282_s18 + $0x3b4] sm:$0xf0]  ;;  %v6613_v35 = vld [vmem:[%s7282_s18 + $0x39c] sm:$0xf] }
 0x5ae   : > { %3339 = vmatpush.bf16.msra.mxu0 %v5529_v26  ;;  %3377 = vmatpush.bf16.msra.mxu2 %v5533_v42  ;;  %v5921_v50 = vor.u32 %v6617_v56, %v5920_v55  ;;  %v5666_v26 = vld [vmem:[%s7282_s18 + $0x1b8] sm:$0xf0]  ;;  %v5925_v1 = vor.u32 %v6613_v35, %v5922_v63  ;;  %v5856_v13 = vld [vmem:[%s7282_s18 + $0x318] sm:$0xf] }
 0x5af   : > { %v5669_v33 = vor.u32 %v6549_v54, %v5666_v26  ;;  %v5634_v42 = vld [vmem:[%s7282_s18 + $0x178] sm:$0xf0]  ;;  %v6601_v24 = vld [vmem:[%s7282_s18 + $0x334] sm:$0xf0] }
 0x5b0   : > { %v5637_v7 = vor.u32 %v6541_v43, %v5634_v42  ;;  %v5568_v12 = vld [vmem:[%s7282_s18 + $0xd8] sm:$0xf]  ;;  %v6589_v4 = vld [vmem:[%s7282_s18 + $0x2dc] sm:$0xf] }
 0x5b1   : > { %3396 = vmatpush.bf16.msra.mxu3 %v5789_v9  ;;  %3359 = vmatpush.bf16.msra.mxu1 %v5753_v32  ;;  %v6605_v9 = vld [vmem:[%s7282_s18 + $0x35c] sm:$0xf]  ;;  %v5600_v32 = vld [vmem:[%s7282_s18 + $0x118] sm:$0xf] }
 0x5b2   : > { %3340 = vmatpush.bf16.msra.mxu0 %v5497_v40  ;;  %3378 = vmatpush.bf16.msra.mxu2 %v5501_v20  ;;  %v5889_v40 = vor.u32 %v6609_v5, %v5888_v3  ;;  %v5893_v49 = vor.u32 %v6605_v9, %v5890_v11  ;;  %v5601_v20 = vor.u32 %v6537_v62, %v5600_v32  ;;  %v6593_v38 = vld [vmem:[%s7282_s18 + $0x2f4] sm:$0xf0]  ;;  %v5826_v23 = vld [vmem:[%s7282_s18 + $0x2f8] sm:$0xf0] }
 0x5b3   : > { %v5829_v31 = vor.u32 %v6589_v4, %v5826_v23  ;;  %v6521_v58 = vld [vmem:[%s7282_s18 + $0xb4] sm:$0xf0]  ;;  %v6517_v56 = vld [vmem:[%s7282_s18 + $0x9c] sm:$0xf] }
 0x5b4   : > { %v5792_v6 = vld [vmem:[%s7282_s18 + $0x298] sm:$0xf]  ;;  %v5794_v54 = vld [vmem:[%s7282_s18 + $0x2b8] sm:$0xf0] }
 0x5b5   : > { %3397 = vmatpush.bf16.msra.mxu3 %v5757_v14  ;;  %3360 = vmatpush.bf16.msra.mxu1 %v5721_v27  ;;  %v5857_v14 = vor.u32 %v6601_v24, %v5856_v13  ;;  %v5858_v27 = vld [vmem:[%s7282_s18 + $0x338] sm:$0xf0]  ;;  %v5504_v26 = vld [vmem:[%s7282_s18 + $0x58] sm:$0xf] }
 0x5b6   : > { %3341 = vmatpush.bf16.msra.mxu0 %v5465_v22  ;;  %3379 = vmatpush.bf16.msra.mxu2 %v5469_v60  ;;  %v6597_v22 = vld [vmem:[%s7282_s18 + $0x31c] sm:$0xf]  ;;  %v6529_v60 = vld [vmem:[%s7282_s18 + $0xf4] sm:$0xf0] }
 0x5b7   : > { %v5861_v19 = vor.u32 %v6597_v22, %v5858_v27  ;;  %v5569_v30 = vor.u32 %v6529_v60, %v5568_v12  ;;  %v6513_v35 = vld [vmem:[%s7282_s18 + $0x74] sm:$0xf0]  ;;  %v5506_v3 = vld [vmem:[%s7282_s18 + $0x78] sm:$0xf0] }
 0x5b8   : > { %v6577_v63 = vld [vmem:[%s7282_s18 + $0x274] sm:$0xf0]  ;;  %v5505_v5 = vor.u32 %v6513_v35, %v5504_v26  ;;  %v6573_v42 = vld [vmem:[%s7282_s18 + $0x25c] sm:$0xf]  ;;  %v6024_v35 = vld [vmem:[%s7305_s20 + $0x60] sm:$0xf] }
 0x5b9   : > { %3398 = vmatpush.bf16.msra.mxu3 %v5725_v28  ;;  %v5824_v28 = vld [vmem:[%s7282_s18 + $0x2d8] sm:$0xf]  ;;  %v5762_v9 = vld [vmem:[%s7282_s18 + $0x278] sm:$0xf0] }
 0x5ba   : > { %v5825_v61 = vor.u32 %v6593_v38, %v5824_v28  ;;  %v5472_v11 = vld [vmem:[%s7282_s18 + $0x18] sm:$0xf]  ;;  %v6501_v62 = vld [vmem:[%s7282_s18 + $0x1c] sm:$0xf] }
 0x5bb   : > { %3266 = vmatmul.bf16.vlgmr.msrb.gmra.mxu0 %v8117_v53  ;;  %3285 = vmatmul.bf16.vlgmr.msrb.gmra.mxu1 %v8119_v16  ;;  %v6569_v32 = vld [vmem:[%s7282_s18 + $0x234] sm:$0xf0]  ;;  %v5474_v48 = vld [vmem:[%s7282_s18 + $0x38] sm:$0xf0] }
 0x5bc   : > { %3304 = vmatmul.bf16.vlgmr.msrb.gmra.mxu2 %v8117_v53  ;;  %3323 = vmatmul.bf16.vlgmr.msrb.gmra.mxu3 %v8119_v16  ;;  %v5477_v21 = vor.u32 %v6501_v62, %v5474_v48 }
 0x5bd   : > { %3410 = vmatpush.bf16.msrb.mxu0 %v5697_v8  ;;  %3429 = vmatpush.bf16.msrb.mxu1 %v5953_v46  ;;  %v5570_v8 = vld [vmem:[%s7282_s18 + $0xf8] sm:$0xf0]  ;;  %v5536_v46 = vld [vmem:[%s7282_s18 + $0x98] sm:$0xf] }
 0x5be   : > { %3448 = vmatpush.bf16.msrb.mxu2 %v5701_v47  ;;  %3467 = vmatpush.bf16.msrb.mxu3 %v5957_v51  ;;  %v5573_v47 = vor.u32 %v6525_v44, %v5570_v8  ;;  %v6585_v51 = vld [vmem:[%s7282_s18 + $0x2b4] sm:$0xf0]  ;;  %v5537_v52 = vor.u32 %v6521_v58, %v5536_v46 }
 0x5bf   : > { %v5793_v55 = vor.u32 %v6585_v51, %v5792_v6  ;;  %v6641_v58 = vld [vmem:[%s7305_s20 + $0x74] sm:$0xf0] }
 0x5c1   : > { %3411 = vmatpush.bf16.msrb.mxu0 %v5665_v59  ;;  %3430 = vmatpush.bf16.msrb.mxu1 %v5921_v50  ;;  %v5538_v59 = vld [vmem:[%s7282_s18 + $0xb8] sm:$0xf0] }
 0x5c2   : > { %3449 = vmatpush.bf16.msrb.mxu2 %v5669_v33  ;;  %3468 = vmatpush.bf16.msrb.mxu3 %v5925_v1  ;;  %v6581_v50 = vld [vmem:[%s7282_s18 + $0x29c] sm:$0xf]  ;;  %v5760_v33 = vld [vmem:[%s7282_s18 + $0x258] sm:$0xf]  ;;  %v5541_v0 = vor.u32 %v6517_v56, %v5538_v59 }
 0x5c3   : > { %v5797_v36 = vor.u32 %v6581_v50, %v5794_v54  ;;  %v6509_v1 = vld [vmem:[%s7282_s18 + $0x5c] sm:$0xf]  ;;  %v5761_v43 = vor.u32 %v6577_v63, %v5760_v33  ;;  %v6639_v33 = vld [vmem:[%s7305_s20 + $0x64] sm:$0xf0] }
 0x5c5   : > { %3412 = vmatpush.bf16.msrb.mxu0 %v5633_v39  ;;  %3431 = vmatpush.bf16.msrb.mxu1 %v5889_v40  ;;  %v6505_v39 = vld [vmem:[%s7282_s18 + $0x34] sm:$0xf0] }
 0x5c6   : > { %3450 = vmatpush.bf16.msrb.mxu2 %v5637_v7  ;;  %3469 = vmatpush.bf16.msrb.mxu3 %v5893_v49  ;;  %v5728_v40 = vld [vmem:[%s7282_s18 + $0x218] sm:$0xf]  ;;  %v5509_v7 = vor.u32 %v6509_v1, %v5506_v3  ;;  %v5765_v49 = vor.u32 %v6573_v42, %v5762_v9  ;;  %v5473_v13 = vor.u32 %v6505_v39, %v5472_v11  ;;  %v6096_v3 = vld [vmem:[%s7305_s20 + $0xf0] sm:$0xf] }
 0x5c7   : > { %v5729_v24 = vor.u32 %v6569_v32, %v5728_v40  ;;  %v6016_v32 = vld [vmem:[%s7305_s20 + $0x50] sm:$0xf] }
 0x5c9   : > { %3413 = vmatpush.bf16.msrb.mxu0 %v5601_v20  ;;  %3432 = vmatpush.bf16.msrb.mxu1 %v5857_v14  ;;  %v6565_v20 = vld [vmem:[%s7282_s18 + $0x21c] sm:$0xf] }
 0x5ca   : > { %3451 = vmatpush.bf16.msrb.mxu2 %v5605_v25  ;;  %3470 = vmatpush.bf16.msrb.mxu3 %v5861_v19  ;;  %v5730_v14 = vld [vmem:[%s7282_s18 + $0x238] sm:$0xf0] }
 0x5cb   : > { %3271 = vmatmul.bf16.gmra.mxu0 %v8241_v34  ;;  %3290 = vmatmul.bf16.gmra.mxu1 %v8243_v37  ;;  %v5733_v22 = vor.u32 %v6565_v20, %v5730_v14  ;;  %v6088_v14 = vld [vmem:[%s7305_s20 + $0xe0] sm:$0xf] }
 0x5cc   : > { %3309 = vmatmul.bf16.gmra.mxu2 %v8241_v34  ;;  %3328 = vmatmul.bf16.gmra.mxu3 %v8243_v37 }
 0x5cd   : > { %3414 = vmatpush.bf16.msrb.mxu0 %v5569_v30  ;;  %3433 = vmatpush.bf16.msrb.mxu1 %v5825_v61 }
 0x5ce   : > { %3452 = vmatpush.bf16.msrb.mxu2 %v5573_v47  ;;  %3471 = vmatpush.bf16.msrb.mxu3 %v5829_v31  ;;  %v6032_v31 = vld [vmem:[%s7305_s20 + $0x70] sm:$0xf] }
 0x5d1   : > { %3415 = vmatpush.bf16.msrb.mxu0 %v5537_v52  ;;  %3434 = vmatpush.bf16.msrb.mxu1 %v5793_v55  ;;  %v6033_v55 = vor.u32 %v6641_v58, %v6032_v31 }
 0x5d2   : > { %3453 = vmatpush.bf16.msrb.mxu2 %v5541_v0  ;;  %3472 = vmatpush.bf16.msrb.mxu3 %v5797_v36  ;;  %v6025_v0 = vor.u32 %v6639_v33, %v6024_v35 }
 0x5d5   : > { %3416 = vmatpush.bf16.msrb.mxu0 %v5505_v5  ;;  %3435 = vmatpush.bf16.msrb.mxu1 %v5761_v43  ;;  %v6657_v5 = vld [vmem:[%s7305_s20 + $0xf4] sm:$0xf0] }
 0x5d6   : > { %3454 = vmatpush.bf16.msrb.mxu2 %v5509_v7  ;;  %3473 = vmatpush.bf16.msrb.mxu3 %v5765_v49  ;;  %v6097_v42 = vor.u32 %v6657_v5, %v6096_v3  ;;  %v6637_v7 = vld [vmem:[%s7305_s20 + $0x54] sm:$0xf0] }
 0x5d9   : > { %3417 = vmatpush.bf16.msrb.mxu0 %v5473_v13  ;;  %3436 = vmatpush.bf16.msrb.mxu1 %v5729_v24  ;;  %v6017_v24 = vor.u32 %v6637_v7, %v6016_v32 }
 0x5da   : > { %3455 = vmatpush.bf16.msrb.mxu2 %v5477_v21  ;;  %3474 = vmatpush.bf16.msrb.mxu3 %v5733_v22  ;;  %v6655_v21 = vld [vmem:[%s7305_s20 + $0xe4] sm:$0xf0] }
 0x5db   : > { %3342 = vmatmul.bf16.vlgmr.msra.gmra.mxu0 %v8117_v53  ;;  %3361 = vmatmul.bf16.vlgmr.msra.gmra.mxu1 %v8119_v16  ;;  %v6089_v22 = vor.u32 %v6655_v21, %v6088_v14 }
 0x5dc   : > { %3380 = vmatmul.bf16.vlgmr.msra.gmra.mxu2 %v8117_v53  ;;  %3399 = vmatmul.bf16.vlgmr.msra.gmra.mxu3 %v8119_v16 }
 0x5dd   : > { %4214 = vmatpush.bf16.msra.mxu0 %v6033_v55  ;;  %4233 = vmatpush.bf16.msra.mxu1 %v6097_v42 }
 0x5e1   : > { %4215 = vmatpush.bf16.msra.mxu0 %v6025_v0  ;;  %4234 = vmatpush.bf16.msra.mxu1 %v6089_v22 }
 0x5e5   : > { %4216 = vmatpush.bf16.msra.mxu0 %v6017_v24 }
 0x5eb   : > { %3347 = vmatmul.bf16.gmra.mxu0 %v8241_v34  ;;  %3366 = vmatmul.bf16.gmra.mxu1 %v8243_v37 }
 0x5ec   : > { %3385 = vmatmul.bf16.gmra.mxu2 %v8241_v34  ;;  %3404 = vmatmul.bf16.gmra.mxu3 %v8243_v37 }
 0x5fb   : > { %3418 = vmatmul.bf16.vlgmr.msrb.gmra.mxu0 %v8117_v53  ;;  %3437 = vmatmul.bf16.vlgmr.msrb.gmra.mxu1 %v8119_v16 }
 0x5fc   : > { %3456 = vmatmul.bf16.vlgmr.msrb.gmra.mxu2 %v8117_v53  ;;  %3475 = vmatmul.bf16.vlgmr.msrb.gmra.mxu3 %v8119_v16 }
 0x605   : > { %v3191_v27 = vpop.f32.mrf.mxu0  ;;  %v3210_v25 = vpop.f32.mrf.mxu1 }
 0x606   : > { %v8369_v60 = vadd.f32 %v3210_v25, %v3191_v27 }
 0x608   : > { %v5958_v53 = vmul.f32 -1.442695, %v8369_v60 }
 0x60a   : > { %6843 = vpow2.f32 %v5958_v53 }
 0x60b   : > { %3423 = vmatmul.bf16.gmra.mxu0 %v8241_v34  ;;  %3442 = vmatmul.bf16.gmra.mxu1 %v8243_v37 }
 0x60c   : > { %3461 = vmatmul.bf16.gmra.mxu2 %v8241_v34  ;;  %3480 = vmatmul.bf16.gmra.mxu3 %v8243_v37  ;;  %v3229_v19 = vpop.f32.mrf.mxu2  ;;  %v3248_v12 = vpop.f32.mrf.mxu3 }
 0x60d   : > { %v3193_v28 = vpop.f32.mrf.mxu0  ;;  %v3212_v30 = vpop.f32.mrf.mxu1  ;;  %v8372_v16 = vadd.f32 %v3248_v12, %v3229_v19 }
 0x60e   : > { %v8374_v38 = vadd.f32 %v3212_v30, %v3193_v28  ;;  %v6008_v28 = vld [vmem:[%s7305_s20 + $0x40] sm:$0xf]  ;;  %v6635_v30 = vld [vmem:[%s7305_s20 + $0x44] sm:$0xf0] }
 0x60f   : > { %v5959_v37 = vmul.f32 -1.442695, %v8372_v16  ;;  %v6009_v58 = vor.u32 %v6635_v30, %v6008_v28 }
 0x610   : > { %v5962_v8 = vmul.f32 -1.442695, %v8374_v38  ;;  %v6844_v46 = vpop.eup %6843 }
 0x611   : > { %6845 = vpow2.f32 %v5959_v37  ;;  %v8383_v6 = vadd.f32 1.0, %v6844_v46  ;;  %4217 = vmatpush.bf16.msra.mxu0 %v6009_v58 }
 0x612   : > { %6847 = vpow2.f32 %v5962_v8  ;;  %v6080_v8 = vld [vmem:[%s7305_s20 + $0xd0] sm:$0xf] }
 0x613   : > { %v3559_v5 = vand.u32 2147483647, %v8383_v6  ;;  %vm3555_vm7 = vweird.f32 %v8383_v6 }
 0x614   : > { %v3231_v44 = vpop.f32.mrf.mxu2  ;;  %v3250_v34 = vpop.f32.mrf.mxu3 }
 0x615   : > { %v8378_v61 = vadd.f32 %v3250_v34, %v3231_v44  ;;  %vm8455_vm6 = vcmp.eq.f32.partialorder %v3559_v5, 8.507059e+37 }
 0x617   : > { %v5963_v47 = vmul.f32 -1.442695, %v8378_v61  ;;  %v6846_v56 = vpop.eup %6845 }
 0x618   : > { %v6848_v54 = vpop.eup %6847  ;;  %v8390_v63 = vadd.f32 1.0, %v6846_v56  ;;  %v6072_v56 = vld [vmem:[%s7305_s20 + $0xc0] sm:$0xf] }
 0x619   : > { %6849 = vpow2.f32 %v5963_v47  ;;  %v8392_v36 = vadd.f32 1.0, %v6848_v54 }
 0x61a   : > { %6851 = vrcp.f32 %v8383_v6  ;;  %v3574_v14 = vand.u32 2147483647, %v8390_v63  ;;  %vm3570_vm10 = vweird.f32 %v8390_v63  ;;  %v3576_v58 = vand.u32 2147483648, %v8390_v63 }
 0x61b   : > { %6853 = vrcp.f32 %v8390_v63  ;;  %vm3615_vm8 = vweird.f32 %v8392_v36 }
 0x61c   : > { %6855 = vrcp.f32 %v8392_v36  ;;  %vm8495_vm13 = vcmp.eq.f32.partialorder %v3574_v14, 8.507059e+37 }
 0x61f   : > { %v6850_v9 = vpop.eup %6849 }
 0x620   : > { %v8410_v48 = vpop.eup %6851  ;;  %v8412_v20 = vadd.f32 1.0, %v6850_v9 }
 0x621   : > { %v3551_v25 = vmul.f32 %v8410_v48, %v8383_v6  ;;  %v8419_v19 = vpop.eup %6853  ;;  %vm3556_vm9 = vweird.f32 %v8410_v48 }
 0x622   : > { %v8426_v53 = vpop.eup %6855  ;;  %vm8490_vm11 = vmor %vm3555_vm7, %vm3556_vm9  ;;  %vm3571_vm12 = vweird.f32 %v8419_v19  ;;  %vm3630_vm3 = vweird.f32 %v8412_v20 }
 0x623   : > { %v3552_v46 = vsub.f32 1.0, %v3551_v25  ;;  %v3611_v54 = vmul.f32 %v8426_v53, %v8392_v36  ;;  %vm3616_vm14 = vweird.f32 %v8426_v53  ;;  %vm8531_vm15 = vmor %vm3570_vm10, %vm3571_vm12 }
 0x624   : > { %vm8555_vm1 = vmor %vm3615_vm8, %vm3616_vm14 }
 0x625   : > { %v3612_v7 = vsub.f32 1.0, %v3611_v54 }
 0x628   : > { %v3196_v4 = vpop.f32.mrf.mxu0  ;;  %v3215_v23 = vpop.f32.mrf.mxu1 }
 0x629   : > { %v8385_v26 = vadd.f32 %v3215_v23, %v3196_v4  ;;  %v6653_v4 = vld [vmem:[%s7305_s20 + $0xd4] sm:$0xf0]  ;;  %v6000_v23 = vld [vmem:[%s7305_s20 + $0x30] sm:$0xf] }
 0x62a   : > { %v6081_v33 = vor.u32 %v6653_v4, %v6080_v8  ;;  %v6631_v8 = vld [vmem:[%s7305_s20 + $0x24] sm:$0xf0] }
 0x62b   : > { %v5966_v43 = vmul.f32 -1.442695, %v8385_v26 }
 0x62c   : > { %4235 = vmatpush.bf16.msra.mxu1 %v6081_v33 }
 0x62d   : > { %6857 = vpow2.f32 %v5966_v43  ;;  %v3561_v43 = vand.u32 2147483648, %v8383_v6 }
 0x62f   : > { %v3234_v51 = vpop.f32.mrf.mxu2  ;;  %v3253_v52 = vpop.f32.mrf.mxu3 }
 0x630   : > { %v3198_v59 = vpop.f32.mrf.mxu0  ;;  %v3217_v50 = vpop.f32.mrf.mxu1  ;;  %v8394_v1 = vadd.f32 %v3253_v52, %v3234_v51  ;;  %v6633_v51 = vld [vmem:[%s7305_s20 + $0x34] sm:$0xf0]  ;;  %v3566_v52 = vmul.f32 %v8419_v19, %v8390_v63 }
 0x631   : > { %v8400_v11 = vadd.f32 %v3217_v50, %v3198_v59  ;;  %v6651_v59 = vld [vmem:[%s7305_s20 + $0xc4] sm:$0xf0]  ;;  %v6001_v0 = vor.u32 %v6633_v51, %v6000_v23  ;;  %v3613_v51 = vmul.f32 %v8426_v53, %v3612_v7 }
 0x632   : > { %v5967_v49 = vmul.f32 -1.442695, %v8394_v1  ;;  %v6073_v42 = vor.u32 %v6651_v59, %v6072_v56  ;;  %v3619_v56 = vand.u32 2147483647, %v8392_v36 }
 0x633   : > { %v5970_v27 = vmul.f32 -1.442695, %v8400_v11  ;;  %v6858_v44 = vpop.eup %6857  ;;  %4218 = vmatpush.bf16.msra.mxu0 %v6001_v0  ;;  %v3614_v5 = vadd.f32 %v8426_v53, %v3613_v51 }
 0x634   : > { %6859 = vpow2.f32 %v5967_v49  ;;  %v8443_v35 = vadd.f32 1.0, %v6858_v44  ;;  %4236 = vmatpush.bf16.msra.mxu1 %v6073_v42  ;;  %v5992_v44 = vld [vmem:[%s7305_s20 + $0x20] sm:$0xf]  ;;  %vm8535_vm0 = vcmp.eq.f32.partialorder %v3619_v56, 8.507059e+37 }
 0x635   : > { %6861 = vrcp.f32 %v8412_v20 }
 0x636   : > { %6863 = vpow2.f32 %v5970_v27  ;;  %v3562_v27 = vor.u32 1.1754944e-38, %v3561_v43 }
 0x637   : > { %v3236_v39 = vpop.f32.mrf.mxu2  ;;  %v3255_v40 = vpop.f32.mrf.mxu3 }
 0x638   : > { %v8406_v62 = vpop.f32.mrf.mxu0  ;;  %v8408_v13 = vpop.f32.mrf.mxu1  ;;  %v8422_v12 = vadd.f32 %v3255_v40, %v3236_v39  ;;  %v3553_v39 = vmul.f32 %v8410_v48, %v3552_v46  ;;  %v3567_v40 = vsub.f32 1.0, %v3566_v52 }
 0x639   : > { %v8475_v46 = vadd.f32 %v8408_v13, %v8406_v62  ;;  %v5984_v62 = vld [vmem:[%s7305_s20 + $0x10] sm:$0xf] }
 0x63a   : > { %v5971_v55 = vmul.f32 -1.442695, %v8422_v12  ;;  %v6860_v50 = vpop.eup %6859  ;;  %v3554_v4 = vadd.f32 %v8410_v48, %v3553_v39  ;;  %v3568_v23 = vmul.f32 %v8419_v19, %v3567_v40  ;;  %v3634_v39 = vand.u32 2147483647, %v8412_v20 }
 0x63b   : > { %v8445_v3 = vpop.eup %6861  ;;  %v8450_v32 = vadd.f32 1.0, %v6860_v50  ;;  %v5993_v50 = vor.u32 %v6631_v8, %v5992_v44  ;;  %v5960_v33 = vmul.f32 -1.442695, %v8475_v46  ;;  %v3636_v8 = vand.u32 2147483648, %v8412_v20 }
 0x63c   : > { %v6864_v9 = vpop.eup %6863  ;;  %6865 = vpow2.f32 %v5971_v55  ;;  %v3626_v49 = vmul.f32 %v8445_v3, %v8412_v20  ;;  %v3569_v6 = vadd.f32 %v8419_v19, %v3568_v23  ;;  %vm3631_vm2 = vweird.f32 %v8445_v3 }
 0x63d   : > { %6867 = vrcp.f32 %v8443_v35  ;;  %v8462_v25 = vadd.f32 1.0, %v6864_v9  ;;  %4219 = vmatpush.bf16.msra.mxu0 %v5993_v50  ;;  %v3577_v9 = vor.u32 1.1754944e-38, %v3576_v58  ;;  %v6649_v58 = vld [vmem:[%s7305_s20 + $0xb4] sm:$0xf0]  ;;  %vm8585_vm4 = vmor %vm3630_vm3, %vm3631_vm2  ;;  %vm8589_vm5 = vcmp.eq.f32.partialorder %v3634_v39, 8.507059e+37 }
 0x63e   : > { %6869 = vrcp.f32 %v8450_v32  ;;  %v3627_v52 = vsub.f32 1.0, %v3626_v49  ;;  %v3573_v63 = vsel %vm8531_vm15, %v8419_v19, %v3569_v6  ;;  %v3618_v19 = vsel %vm8555_vm1, %v8426_v53, %v3614_v5  ;;  %v6056_v5 = vld [vmem:[%s7305_s20 + $0xa0] sm:$0xf] }
 0x63f   : > { %v8428_v34 = vpop.f32.mrf.mxu2  ;;  %v8430_v37 = vpop.f32.mrf.mxu3  ;;  %6871 = vrcp.f32 %v8462_v25  ;;  %vm3690_vm10 = vweird.f32 %v8450_v32 }
 0x640   : > { %v3269_v47 = vpop.f32.mrf.mxu0  ;;  %v3288_v31 = vpop.f32.mrf.mxu1  ;;  %v8508_v0 = vadd.f32 %v8430_v37, %v8428_v34  ;;  %v3628_v43 = vmul.f32 %v8445_v3, %v3627_v52  ;;  %6873 = vpow2.f32 %v5960_v33  ;;  %v3578_v33 = vsel %vm8495_vm13, %v3577_v9, %v3573_v63 }
 0x641   : > { %v8482_v59 = vadd.f32 %v3288_v31, %v3269_v47  ;;  %v3621_v47 = vand.u32 2147483648, %v8392_v36  ;;  %v3558_v31 = vsel %vm8490_vm11, %v8410_v48, %v3554_v4  ;;  %v3637_v9 = vor.u32 1.1754944e-38, %v3636_v8 }
 0x642   : > { %v6866_v55 = vpop.eup %6865  ;;  %v3563_v49 = vsel %vm8455_vm6, %v3562_v27, %v3558_v31  ;;  %v6064_v27 = vld [vmem:[%s7305_s20 + $0xb0] sm:$0xf]  ;;  %v3629_v52 = vadd.f32 %v8445_v3, %v3628_v43  ;;  %v6629_v31 = vld [vmem:[%s7305_s20 + $0x14] sm:$0xf0]  ;;  %v6647_v43 = vld [vmem:[%s7305_s20 + $0xa4] sm:$0xf0]  ;;  %v8600_v44 = vmul.f32 %v3578_v33, %v8372_v16  ;;  %vm3675_vm6 = vweird.f32 %v8443_v35 }
 0x643   : > { %v8484_v54 = vpop.eup %6867  ;;  %v8513_v42 = vadd.f32 1.0, %v6866_v55  ;;  %v5964_v37 = vmul.f32 -1.442695, %v8482_v59  ;;  %v3622_v55 = vor.u32 1.1754944e-38, %v3621_v47  ;;  %v6065_v50 = vor.u32 %v6649_v58, %v6064_v27 }
 0x644   : > { %v8515_v48 = vpop.eup %6869  ;;  %v3671_v34 = vmul.f32 %v8484_v54, %v8443_v35  ;;  %v8573_v6 = vmul.f32 %v3563_v49, %v8369_v60  ;;  %v3633_v13 = vsel %vm8585_vm4, %v8445_v3, %v3629_v52  ;;  %v5985_v63 = vor.u32 %v6629_v31, %v5984_v62 }
 0x645   : > { %v3686_v36 = vmul.f32 %v8515_v48, %v8450_v32  ;;  %6875 = vrcp.f32 %v8513_v42  ;;  %v3623_v47 = vsel %vm8535_vm0, %v3622_v55, %v3618_v19  ;;  %4237 = vmatpush.bf16.msra.mxu1 %v6065_v50  ;;  %v6057_v51 = vor.u32 %v6647_v43, %v6056_v5 }
 0x646   : > { %v3672_v56 = vsub.f32 1.0, %v3671_v34  ;;  %6877 = vpow2.f32 %v5964_v37  ;;  %v3681_v37 = vand.u32 2147483648, %v8443_v35  ;;  %v8610_v3 = vmul.f32 %v3623_v47, %v8374_v38  ;;  %4220 = vmatpush.bf16.msra.mxu0 %v5985_v63 }
 0x647   : > { %v3307_v21 = vpop.f32.mrf.mxu2  ;;  %v3326_v22 = vpop.f32.mrf.mxu3  ;;  %v3687_v49 = vsub.f32 1.0, %v3686_v36  ;;  %v3679_v8 = vand.u32 2147483647, %v8443_v35  ;;  %v3696_v19 = vand.u32 2147483648, %v8450_v32  ;;  %v8616_v55 = vsel %vm8589_vm5, %v3637_v9, %v3633_v13  ;;  %v5976_v9 = vld [vmem:[%s7305_s20] sm:$0xf] }
 0x648   : > { %v8464_v28 = vpop.f32.mrf.mxu0  ;;  %v8466_v30 = vpop.f32.mrf.mxu1  ;;  %v8540_v4 = vadd.f32 %v3326_v22, %v3307_v21  ;;  %v5961_v21 = vmul.f32 -1.442695, %v8508_v0  ;;  %v3673_v39 = vmul.f32 %v8484_v54, %v3672_v56  ;;  %v3741_v50 = vand.u32 2147483648, %v8462_v25  ;;  %v6048_v35 = vld [vmem:[%s7305_s20 + $0x90] sm:$0xf] }
 0x649   : > { %v8561_v22 = vpop.eup %6871  ;;  %4238 = vmatpush.bf16.msra.mxu1 %v6057_v51  ;;  %v8620_v38 = vor.u32 1.1754944e-38, %v3681_v37  ;;  %v3688_v62 = vmul.f32 %v8515_v48, %v3687_v49  ;;  %v3694_v31 = vand.u32 2147483647, %v8450_v32  ;;  %vm3676_vm7 = vweird.f32 %v8484_v54  ;;  %v6627_v37 = vld [vmem:[%s7305_s20 + $0x4] sm:$0xf0] }
 0x64a   : > { %v5965_v53 = vmul.f32 -1.442695, %v8540_v4  ;;  %v3731_v20 = vmul.f32 %v8561_v22, %v8462_v25  ;;  %6879 = vpow2.f32 %v5961_v21  ;;  %v6874_v14 = vpop.eup %6873  ;;  %v8627_v5 = vadd.f32 %v8484_v54, %v3673_v39  ;;  %vm8658_vm12 = vmor %vm3675_vm6, %vm3676_vm7 }
 0x64b   : > { %v8607_v21 = vpop.eup %6875  ;;  %v8624_v33 = vadd.f32 1.0, %v6874_v14  ;;  %v3739_v43 = vand.u32 2147483647, %v8462_v25  ;;  %vm8633_vm9 = vcmp.eq.f32.partialorder %v3679_v8, 8.507059e+37  ;;  %v8638_v60 = vor.u32 1.1754944e-38, %v3696_v19 }
 0x64c   : > { %6881 = vpow2.f32 %v5965_v53  ;;  %v6878_v36 = vpop.eup %6877  ;;  %v3732_v56 = vsub.f32 1.0, %v3731_v20  ;;  %v3746_v47 = vmul.f32 %v8607_v21, %v8513_v42  ;;  %v8644_v13 = vadd.f32 %v8466_v30, %v8464_v28 }
 0x64d   : > { %v8640_v20 = vadd.f32 1.0, %v6878_v36  ;;  %vm3691_vm8 = vweird.f32 %v8515_v48  ;;  %vm3735_vm11 = vweird.f32 %v8462_v25  ;;  %v8651_v14 = vor.u32 1.1754944e-38, %v3741_v50  ;;  %v6645_v36 = vld [vmem:[%s7305_s20 + $0x94] sm:$0xf0] }
 0x64e   : > { %9530 = vst [vmem:[#allocation27_spill] sm:$0xff] %v8644_v13  ;;  %v3733_v49 = vmul.f32 %v8561_v22, %v3732_v56  ;;  %v3754_v39 = vand.u32 2147483647, %v8513_v42  ;;  %v3689_v30 = vadd.f32 %v8515_v48, %v3688_v62  ;;  %vm8663_vm13 = vcmp.eq.f32.partialorder %v3694_v31, 8.507059e+37  ;;  %vm8696_vm15 = vmor %vm3690_vm10, %vm3691_vm8 }
 0x64f   : > { %v8521_v40 = vpop.f32.mrf.mxu2  ;;  %v8523_v7 = vpop.f32.mrf.mxu3  ;;  %6883 = vrcp.f32 %v8624_v33  ;;  %v3678_v56 = vsel %vm8658_vm12, %v8484_v54, %v8627_v5  ;;  %v3747_v50 = vsub.f32 1.0, %v3746_v47  ;;  %v3756_v62 = vand.u32 2147483648, %v8513_v42  ;;  %v6640_v54 = vld [vmem:[%s7305_s20 + $0x74] sm:$0xf]  ;;  %v6034_v5 = vld [vmem:[%s7305_s20 + $0x78] sm:$0xf0] }
 0x650   : > { %v8542_v23 = vpop.f32.mrf.mxu0  ;;  %v8544_v24 = vpop.f32.mrf.mxu1  ;;  %v5977_v10 = vor.u32 %v6627_v37, %v5976_v9  ;;  %vm3736_vm14 = vweird.f32 %v8561_v22  ;;  %6885 = vrcp.f32 %v8640_v20  ;;  %v3734_v9 = vadd.f32 %v8561_v22, %v3733_v49 }
 0x651   : > { %v6880_v53 = vpop.eup %6879  ;;  %v8672_v19 = vadd.f32 %v8544_v24, %v8542_v23  ;;  %v6673_v23 = vld [vmem:[%s7305_s20 + $0x174] sm:$0xf0]  ;;  %v5968_v24 = vmul.f32 -1.442695, %v8644_v13  ;;  %vm8701_vm0 = vcmp.eq.f32.partialorder %v3739_v43, 8.507059e+37  ;;  %v3693_v32 = vsel %vm8696_vm15, %v8515_v48, %v3689_v30  ;;  %vm8739_vm1 = vmor %vm3735_vm11, %vm3736_vm14 }
 0x652   : > { %v6882_v63 = vpop.eup %6881  ;;  %v8668_v8 = vadd.f32 1.0, %v6880_v53  ;;  %4221 = vmatpush.bf16.msra.mxu0 %v5977_v10  ;;  %v6049_v41 = vor.u32 %v6645_v36, %v6048_v35  ;;  %v6161_v2 = vor.u32 %v6673_v23, %v6160_v57  ;;  %v6037_v15 = vor.u32 %v6640_v54, %v6034_v5  ;;  %v6040_v35 = vld [vmem:[%s7305_s20 + $0x80] sm:$0xf]  ;;  %v6638_v54 = vld [vmem:[%s7305_s20 + $0x64] sm:$0xf] }
 0x653   : > { %v5972_v49 = vmul.f32 -1.442695, %v8672_v19  ;;  %v8726_v30 = vor.u32 1.1754944e-38, %v3756_v62  ;;  %vm3751_vm2 = vweird.f32 %v8607_v21  ;;  %vm8753_vm3 = vcmp.eq.f32.partialorder %v3754_v39, 8.507059e+37  ;;  %v6152_v62 = vld [vmem:[%s7305_s20 + $0x160] sm:$0xf] }
 0x654   : > { %6887 = vrcp.f32 %v8668_v8  ;;  %v3606_v29 = vand.u32 2147483648, %v8668_v8  ;;  %4239 = vmatpush.bf16.msra.mxu1 %v6049_v41  ;;  %4252 = vmatpush.bf16.msra.mxu2 %v6161_v2  ;;  %v3698_v2 = vsel %vm8663_vm13, %v8638_v60, %v3693_v32  ;;  %v3738_v41 = vsel %vm8739_vm1, %v8561_v22, %v3734_v9  ;;  %v6026_v5 = vld [vmem:[%s7305_s20 + $0x68] sm:$0xf0] }
 0x655   : > { %v8715_v13 = vpop.eup %6883  ;;  %6889 = vpow2.f32 %v5968_v24  ;;  %v3795_v36 = vmul.f32 %v8616_v55, %v8378_v61  ;;  %vm3750_vm4 = vweird.f32 %v8513_v42  ;;  %v3743_v61 = vsel %vm8701_vm0, %v8651_v14, %v3738_v41  ;;  %v6671_v55 = vld [vmem:[%s7305_s20 + $0x164] sm:$0xf0] }
 0x656   : > { %v8733_v57 = vpop.eup %6885  ;;  %4290 = vmatpush.bf16.msrb.mxu0 %v6037_v15  ;;  %v8765_v22 = vor.u32 1.1754944e-38, %v3606_v29  ;;  %vm8796_vm5 = vmor %vm3750_vm4, %vm3751_vm2  ;;  %vm3585_vm6 = vweird.f32 %v8624_v33  ;;  %vm3586_vm7 = vweird.f32 %v8715_v13  ;;  %vm3600_vm11 = vweird.f32 %v8668_v8 }
 0x657   : > { %v8603_v27 = vpop.f32.mrf.mxu2  ;;  %v8605_v58 = vpop.f32.mrf.mxu3  ;;  %vm3646_vm12 = vweird.f32 %v8733_v57  ;;  %vm8893_vm13 = vmor %vm3585_vm6, %vm3586_vm7 }
 0x658   : > { %v3343_v16 = vpop.f32.mrf.mxu0  ;;  %v3362_v52 = vpop.f32.mrf.mxu1  ;;  %v8720_v10 = vadd.f32 %v8605_v58, %v8603_v27 }
 0x659   : > { %v3363_v45 = vadd.f32 %v3362_v52, %v3343_v16  ;;  %v3591_v16 = vand.u32 2147483648, %v8624_v33  ;;  %v8706_v52 = vadd.f32 1.0, %v6882_v63  ;;  %v3683_v63 = vsel %vm8633_vm9, %v8620_v38, %v3678_v56 }
 0x65a   : > { %v5973_v60 = vmul.f32 -1.442695, %v8720_v10  ;;  %v3641_v56 = vmul.f32 %v8733_v57, %v8640_v20  ;;  %v8779_v24 = vmul.f32 %v3683_v63, %v8385_v26  ;;  %v6689_v63 = vld [vmem:[%s7305_s20 + $0x1f4] sm:$0xf0]  ;;  %vm3645_vm9 = vweird.f32 %v8640_v20 }
 0x65b   : > { %v3806_v48 = vmul.f32 %v8573_v6, %v3363_v45  ;;  %6891 = vrcp.f32 %v8706_v52  ;;  %v3589_v6 = vand.u32 2147483647, %v8624_v33  ;;  %v8763_v34 = vor.u32 1.1754944e-38, %v3591_v16  ;;  %vm8933_vm15 = vmor %vm3645_vm9, %vm3646_vm12 }
 0x65c   : > { %6893 = vpow2.f32 %v5972_v49  ;;  %v3642_v49 = vsub.f32 1.0, %v3641_v56 }
 0x65d   : > { %6895 = vpow2.f32 %v5973_v60  ;;  %vm8866_vm8 = vcmp.eq.f32.partialorder %v3589_v6, 8.507059e+37 }
 0x65f   : > { %v8681_v31 = vpop.f32.mrf.mxu2  ;;  %v8683_v53 = vpop.f32.mrf.mxu3 }
 0x660   : > { %v3345_v28 = vpop.f32.mrf.mxu0  ;;  %v3364_v17 = vpop.f32.mrf.mxu1  ;;  %v3401_v42 = vadd.f32 %v8683_v53, %v8681_v31  ;;  %v3649_v31 = vand.u32 2147483647, %v8640_v20  ;;  %v3651_v53 = vand.u32 2147483648, %v8640_v20 }
 0x661   : > { %v3365_v18 = vadd.f32 %v3364_v17, %v3345_v28  ;;  %v3748_v17 = vmul.f32 %v8607_v21, %v3747_v50  ;;  %v6643_v50 = vld [vmem:[%s7305_s20 + $0x84] sm:$0xf0]  ;;  %v8782_v28 = vmul.f32 %v3698_v2, %v8394_v1 }
 0x662   : > { %v6041_v32 = vor.u32 %v6643_v50, %v6040_v35  ;;  %v3807_v2 = vmul.f32 %v8600_v44, %v3401_v42  ;;  %v6018_v42 = vld [vmem:[%s7305_s20 + $0x58] sm:$0xf0]  ;;  %vm3650_vm2 = vcmp.eq.f32.partialorder %v3649_v31, 8.507059e+37  ;;  %v6628_v31 = vld [vmem:[%s7305_s20 + $0x14] sm:$0xf] }
 0x663   : > { %v3810_v43 = vmul.f32 %v8610_v3, %v3365_v18  ;;  %v8731_v18 = vadd.f32 %v8523_v7, %v8521_v40  ;;  %v3581_v40 = vmul.f32 %v8715_v13, %v8624_v33  ;;  %v3604_v7 = vand.u32 2147483647, %v8668_v8  ;;  %v8760_v3 = vpop.eup %6887  ;;  %v6200_v33 = vld [vmem:[%s7305_s20 + $0x1c0] sm:$0xf] }
 0x664   : > { %v3749_v38 = vadd.f32 %v8607_v21, %v3748_v17  ;;  %v6890_v23 = vpop.eup %6889  ;;  %v8802_v14 = vmul.f32 %v8760_v3, %v8668_v8  ;;  %v6029_v17 = vor.u32 %v6638_v54, %v6026_v5  ;;  %4240 = vmatpush.bf16.msra.mxu1 %v6041_v32  ;;  %v3643_v54 = vmul.f32 %v8733_v57, %v3642_v49 }
 0x665   : > { %v8745_v27 = vpack.c.bf16 %v3810_v43, %v3806_v48  ;;  %v5969_v29 = vmul.f32 -1.442695, %v8731_v18  ;;  %v8792_v47 = vpop.eup %6891  ;;  %v3582_v1 = vsub.f32 1.0, %v3581_v40  ;;  %v6153_v43 = vor.u32 %v6671_v55, %v6152_v62  ;;  %v6224_v48 = vld [vmem:[%s7305_s20 + $0x1f0] sm:$0xf] }
 0x666   : > { %v6894_v9 = vpop.eup %6893  ;;  %v3753_v37 = vsel %vm8796_vm5, %v8607_v21, %v3749_v38  ;;  %v8814_v45 = vmul.f32 %v8792_v47, %v8706_v52  ;;  %v8816_v21 = vadd.f32 1.0, %v6890_v23  ;;  %v6656_v40 = vld [vmem:[%s7305_s20 + $0xf4] sm:$0xf]  ;;  %v3597_v60 = vsub.f32 1.0, %v8802_v14  ;;  %4291 = vmatpush.bf16.msrb.mxu0 %v6029_v17  ;;  %v6216_v55 = vld [vmem:[%s7305_s20 + $0x1e0] sm:$0xf] }
 0x667   : > { %v3383_v15 = vpop.f32.mrf.mxu2  ;;  %v3402_v58 = vpop.f32.mrf.mxu3  ;;  %4222 = vmatmul.bf16.vlgmr.msra.gmra.mxu0 %v8745_v27  ;;  %6897 = vpow2.f32 %v5969_v29  ;;  %v3583_v38 = vmul.f32 %v8715_v13, %v3582_v1  ;;  %v8824_v35 = vadd.f32 1.0, %v6894_v9  ;;  %4253 = vmatpush.bf16.msra.mxu2 %v6153_v43  ;;  %v6669_v29 = vld [vmem:[%s7305_s20 + $0x154] sm:$0xf0]  ;;  %v6225_v26 = vor.u32 %v6689_v63, %v6224_v48  ;;  %v6687_v1 = vld [vmem:[%s7305_s20 + $0x1e4] sm:$0xf0] }
 0x668   : > { %v3348_v39 = vpop.f32.mrf.mxu0  ;;  %v3367_v51 = vpop.f32.mrf.mxu1  ;;  %v3403_v16 = vadd.f32 %v3402_v58, %v3383_v15  ;;  %v6098_v15 = vld [vmem:[%s7305_s20 + $0xf8] sm:$0xf0]  ;;  %v3802_v58 = vmul.f32 %v3743_v61, %v8400_v11  ;;  %v3758_v11 = vsel %vm8753_vm3, %v8726_v30, %v3753_v37  ;;  %v6636_v61 = vld [vmem:[%s7305_s20 + $0x54] sm:$0xf]  ;;  %v6654_v30 = vld [vmem:[%s7305_s20 + $0xe4] sm:$0xf]  ;;  %vm3601_vm10 = vweird.f32 %v8760_v3 }
 0x669   : > { %v3368_v5 = vadd.f32 %v3367_v51, %v3348_v39  ;;  %v6101_v25 = vor.u32 %v6656_v40, %v6098_v15  ;;  %v6090_v14 = vld [vmem:[%s7305_s20 + $0xe8] sm:$0xf0]  ;;  %v6896_v9 = vpop.eup %6895  ;;  %v3657_v37 = vsub.f32 1.0, %v8814_v45  ;;  %6899 = vrcp.f32 %v8816_v21  ;;  %v6136_v39 = vld [vmem:[%s7305_s20 + $0x140] sm:$0xf]  ;;  %4271 = vmatpush.bf16.msra.mxu3 %v6225_v26  ;;  %vm8973_vm1 = vmor %vm3600_vm11, %vm3601_vm10 }
 0x66a   : > { %v3811_v41 = vmul.f32 %v3795_v36, %v3403_v16  ;;  %v6144_v36 = vld [vmem:[%s7305_s20 + $0x150] sm:$0xf]  ;;  %v6667_v51 = vld [vmem:[%s7305_s20 + $0x144] sm:$0xf0]  ;;  %v8853_v43 = vmul.f32 %v3758_v11, %v8422_v12  ;;  %v8856_v17 = vadd.f32 %v8715_v13, %v3583_v38  ;;  %6901 = vrcp.f32 %v8824_v35  ;;  %v6634_v63 = vld [vmem:[%s7305_s20 + $0x44] sm:$0xf] }
 0x66b   : > { %v6145_v32 = vor.u32 %v6669_v29, %v6144_v36  ;;  %4309 = vmatpush.bf16.msrb.mxu1 %v6101_v25  ;;  %v6021_v48 = vor.u32 %v6636_v61, %v6018_v42  ;;  %v6010_v45 = vld [vmem:[%s7305_s20 + $0x48] sm:$0xf0]  ;;  %v6217_v15 = vor.u32 %v6687_v1, %v6216_v55  ;;  %v6685_v38 = vld [vmem:[%s7305_s20 + $0x1d4] sm:$0xf0]  ;;  %v6652_v36 = vld [vmem:[%s7305_s20 + $0xd4] sm:$0xf]  ;;  %v3814_v6 = vmul.f32 %v8779_v24, %v3368_v5 }
 0x66c   : > { %v8837_v50 = vpack.c.bf16 %v3811_v41, %v3807_v2  ;;  %v8862_v2 = vld [vmem:[%s7305_s20 + $0x1d0] sm:$0xf]  ;;  %v3598_v41 = vmul.f32 %v8760_v3, %v3597_v60  ;;  %v6082_v29 = vld [vmem:[%s7305_s20 + $0xd8] sm:$0xf0]  ;;  %v8876_v11 = vadd.f32 1.0, %v6896_v9  ;;  %v8882_v42 = vadd.f32 %v8733_v57, %v3643_v54 }
 0x66d   : > { %v6898_v49 = vpop.eup %6897  ;;  %4254 = vmatpush.bf16.msra.mxu2 %v6145_v32  ;;  %4292 = vmatpush.bf16.msrb.mxu0 %v6021_v48  ;;  %v6128_v60 = vld [vmem:[%s7305_s20 + $0x130] sm:$0xf]  ;;  %v6665_v61 = vld [vmem:[%s7305_s20 + $0x134] sm:$0xf0]  ;;  %v6013_v26 = vor.u32 %v6634_v63, %v6010_v45  ;;  %v6632_v25 = vld [vmem:[%s7305_s20 + $0x34] sm:$0xf]  ;;  %v6085_v9 = vor.u32 %v6652_v36, %v6082_v29  ;;  %vm3661_vm0 = vweird.f32 %v8792_v47  ;;  %vm3660_vm3 = vweird.f32 %v8706_v52 }
 0x66e   : > { %4241 = vmatmul.bf16.vlgmr.msra.gmra.mxu1 %v8837_v50  ;;  %v8885_v55 = vadd.f32 1.0, %v6898_v49  ;;  %v6002_v1 = vld [vmem:[%s7305_s20 + $0x38] sm:$0xf0]  ;;  %v3652_v5 = vor.u32 1.1754944e-38, %v3651_v53  ;;  %4272 = vmatpush.bf16.msra.mxu3 %v6217_v15  ;;  %v3588_v53 = vsel %vm8893_vm13, %v8715_v13, %v8856_v17  ;;  %vm8911_vm14 = vcmp.eq.f32.partialorder %v3604_v7, 8.507059e+37  ;;  %vm8988_vm4 = vmor %vm3660_vm3, %vm3661_vm0 }
 0x66f   : > { %v8826_v56 = vpop.f32.mrf.mxu2  ;;  %v8828_v44 = vpop.f32.mrf.mxu3  ;;  %v6129_v63 = vor.u32 %v6665_v61, %v6128_v60  ;;  %v6683_v45 = vld [vmem:[%s7305_s20 + $0x1c4] sm:$0xf0]  ;;  %v6650_v13 = vld [vmem:[%s7305_s20 + $0xc4] sm:$0xf]  ;;  %v6074_v17 = vld [vmem:[%s7305_s20 + $0xc8] sm:$0xf0]  ;;  %6903 = vrcp.f32 %v8876_v11  ;;  %vm3705_vm7 = vweird.f32 %v8816_v21  ;;  %vm3765_vm10 = vweird.f32 %v8824_v35 }
 0x670   : > { %v3350_v62 = vpop.f32.mrf.mxu0  ;;  %v3369_v23 = vpop.f32.mrf.mxu1  ;;  %v6120_v15 = vld [vmem:[%s7305_s20 + $0x120] sm:$0xf]  ;;  %v3666_v36 = vand.u32 2147483648, %v8706_v52  ;;  %6905 = vrcp.f32 %v8885_v55  ;;  %v6077_v60 = vor.u32 %v6650_v13, %v6074_v17  ;;  %v6192_v61 = vld [vmem:[%s7305_s20 + $0x1b0] sm:$0xf]  ;;  %vm3780_vm0 = vweird.f32 %v8876_v11 }
 0x671   : > { %v3370_v16 = vadd.f32 %v3369_v23, %v3350_v62  ;;  %v6093_v62 = vor.u32 %v6654_v30, %v6090_v14  ;;  %v6137_v23 = vor.u32 %v6667_v51, %v6136_v39  ;;  %v6209_v14 = vor.u32 %v6685_v38, %v8862_v2  ;;  %4293 = vmatpush.bf16.msrb.mxu0 %v6013_v26  ;;  %v6663_v38 = vld [vmem:[%s7305_s20 + $0x124] sm:$0xf0]  ;;  %v6066_v24 = vld [vmem:[%s7305_s20 + $0xb8] sm:$0xf0]  ;;  %v6184_v13 = vld [vmem:[%s7305_s20 + $0x1a0] sm:$0xf] }
 0x672   : > { %v3406_v39 = vadd.f32 %v8828_v44, %v8826_v56  ;;  %v8927_v2 = vadd.f32 %v8760_v3, %v3598_v41  ;;  %v3664_v44 = vand.u32 2147483647, %v8706_v52  ;;  %v3648_v41 = vsel %vm8933_vm15, %v8733_v57, %v8882_v42  ;;  %v6679_v17 = vld [vmem:[%s7305_s20 + $0x1a4] sm:$0xf0]  ;;  %v6672_v32 = vld [vmem:[%s7305_s20 + $0x174] sm:$0xf] }
 0x673   : > { %v3818_v40 = vmul.f32 %v3802_v58, %v3370_v16  ;;  %v3658_v58 = vmul.f32 %v8792_v47, %v3657_v37  ;;  %4310 = vmatpush.bf16.msrb.mxu1 %v6093_v62  ;;  %v8903_v16 = vpop.eup %6899  ;;  %4255 = vmatpush.bf16.msra.mxu2 %v6137_v23  ;;  %v5994_v62 = vld [vmem:[%s7305_s20 + $0x28] sm:$0xf0]  ;;  %v6201_v57 = vor.u32 %v6683_v45, %v6200_v33  ;;  %v5986_v33 = vld [vmem:[%s7305_s20 + $0x18] sm:$0xf0] }
 0x674   : > { %v8924_v7 = vpop.eup %6901  ;;  %4273 = vmatpush.bf16.msra.mxu3 %v6209_v14  ;;  %v3815_v26 = vmul.f32 %v8782_v28, %v3406_v39  ;;  %v6112_v14 = vld [vmem:[%s7305_s20 + $0x110] sm:$0xf]  ;;  %v3653_v8 = vsel %vm3650_vm2, %v3652_v5, %v3648_v41  ;;  %vm8992_vm5 = vcmp.eq.f32.partialorder %v3664_v44, 8.507059e+37  ;;  %v3667_v5 = vor.u32 1.1754944e-38, %v3666_v36  ;;  %v6058_v41 = vld [vmem:[%s7305_s20 + $0xa8] sm:$0xf0] }
 0x675   : > { %v8900_v37 = vpack.c.bf16 %v3818_v40, %v3814_v6  ;;  %v6005_v40 = vor.u32 %v6632_v25, %v6002_v1  ;;  %v6630_v6 = vld [vmem:[%s7305_s20 + $0x24] sm:$0xf]  ;;  %v3659_v23 = vadd.f32 %v8792_v47, %v3658_v58  ;;  %v8960_v42 = vmul.f32 %v8924_v7, %v8824_v35  ;;  %v6681_v25 = vld [vmem:[%s7305_s20 + $0x1b4] sm:$0xf0]  ;;  %v6648_v1 = vld [vmem:[%s7305_s20 + $0xb4] sm:$0xf] }
 0x676   : > { %v6121_v58 = vor.u32 %v6663_v38, %v6120_v15  ;;  %v5997_v28 = vor.u32 %v6630_v6, %v5994_v62  ;;  %v6069_v45 = vor.u32 %v6648_v1, %v6066_v24  ;;  %v6646_v38 = vld [vmem:[%s7305_s20 + $0xa4] sm:$0xf]  ;;  %v5989_v62 = vor.u32 %v6628_v31, %v5986_v33  ;;  %v6176_v24 = vld [vmem:[%s7305_s20 + $0x190] sm:$0xf] }
 0x677   : > { %v3388_v54 = vpop.f32.mrf.mxu2  ;;  %v3407_v30 = vpop.f32.mrf.mxu3  ;;  %4227 = vmatmul.bf16.gmra.mxu0 %v8900_v37  ;;  %4311 = vmatpush.bf16.msrb.mxu1 %v6085_v9  ;;  %v6661_v9 = vld [vmem:[%s7305_s20 + $0x114] sm:$0xf0]  ;;  %v3762_v56 = vsub.f32 1.0, %v8960_v42  ;;  %v6061_v1 = vor.u32 %v6646_v38, %v6058_v41  ;;  %vm3766_vm6 = vweird.f32 %v8924_v7  ;;  %vm3706_vm9 = vweird.f32 %v8903_v16 }
 0x678   : > { %v3408_v51 = vadd.f32 %v3407_v30, %v3388_v54  ;;  %v8917_v49 = vpop.f32.mrf.mxu0  ;;  %v8919_v48 = vpop.f32.mrf.mxu1  ;;  %4256 = vmatpush.bf16.msra.mxu2 %v6129_v63  ;;  %v3593_v54 = vsel %vm8866_vm8, %v8763_v34, %v3588_v53  ;;  %4294 = vmatpush.bf16.msrb.mxu0 %v6005_v40  ;;  %v3603_v34 = vsel %vm8973_vm1, %v8760_v3, %v8927_v2  ;;  %vm9081_vm11 = vmor %vm3765_vm10, %vm3766_vm6  ;;  %vm3720_vm2 = vweird.f32 %v8885_v55 }
 0x679   : > { %v9000_v53 = vpop.eup %6903  ;;  %v3663_v3 = vsel %vm8988_vm4, %v8792_v47, %v3659_v23  ;;  %4274 = vmatpush.bf16.msra.mxu3 %v6201_v57  ;;  %v6193_v63 = vor.u32 %v6681_v25, %v6192_v61  ;;  %v6113_v15 = vor.u32 %v6661_v9, %v6112_v14  ;;  %v3792_v36 = vmul.f32 %v3593_v54, %v8475_v46  ;;  %v6104_v23 = vld [vmem:[%s7305_s20 + $0x100] sm:$0xf]  ;;  %v6659_v57 = vld [vmem:[%s7305_s20 + $0x104] sm:$0xf0]  ;;  %v6644_v14 = vld [vmem:[%s7305_s20 + $0x94] sm:$0xf] }
 0x67a   : > { %v3819_v29 = vmul.f32 %v8853_v43, %v3408_v51  ;;  %v8956_v43 = vmul.f32 %v8903_v16, %v8816_v21  ;;  %v9011_v2 = vpop.eup %6905  ;;  %v3796_v61 = vmul.f32 %v3653_v8, %v8482_v59  ;;  %v3776_v42 = vmul.f32 %v9000_v53, %v8876_v11  ;;  %v6050_v9 = vld [vmem:[%s7305_s20 + $0x98] sm:$0xf0]  ;;  %vm9094_vm12 = vmor %vm3705_vm7, %vm3706_vm9 }
 0x67b   : > { %4312 = vmatpush.bf16.msrb.mxu1 %v6077_v60  ;;  %v6626_v60 = vld [vmem:[%s7305_s20 + $0x4] sm:$0xf]  ;;  %v3439_v46 = vadd.f32 %v8919_v48, %v8917_v49  ;;  %v3716_v59 = vmul.f32 %v9011_v2, %v8885_v55  ;;  %v6185_v25 = vor.u32 %v6679_v17, %v6184_v13  ;;  %v3763_v48 = vmul.f32 %v8924_v7, %v3762_v56 }
 0x67c   : > { %v8996_v52 = vpack.c.bf16 %v3819_v29, %v3815_v26  ;;  %v3702_v47 = vsub.f32 1.0, %v8956_v43  ;;  %4257 = vmatpush.bf16.msra.mxu2 %v6121_v58  ;;  %v3608_v29 = vsel %vm8911_vm14, %v8765_v22, %v3603_v34  ;;  %4295 = vmatpush.bf16.msrb.mxu0 %v5997_v28  ;;  %v3668_v43 = vsel %vm8992_vm5, %v3667_v5, %v3663_v3  ;;  %v5978_v22 = vld [vmem:[%s7305_s20 + $0x8] sm:$0xf0]  ;;  %v6162_v26 = vld [vmem:[%s7305_s20 + $0x178] sm:$0xf0] }
 0x67d   : > { %v3709_v58 = vand.u32 2147483647, %v8816_v21  ;;  %4275 = vmatpush.bf16.msra.mxu3 %v6193_v63  ;;  %v3793_v49 = vmul.f32 %v3608_v29, %v8508_v0  ;;  %v6105_v30 = vor.u32 %v6659_v57, %v6104_v23  ;;  %v6677_v28 = vld [vmem:[%s7305_s20 + $0x194] sm:$0xf0]  ;;  %v3711_v34 = vand.u32 2147483648, %v8816_v21 }
 0x67e   : > { %4246 = vmatmul.bf16.gmra.mxu1 %v8996_v52  ;;  %v3769_v8 = vand.u32 2147483647, %v8824_v35  ;;  %v5981_v12 = vor.u32 %v6626_v60, %v5978_v22  ;;  %v6165_v20 = vor.u32 %v6672_v32, %v6162_v26  ;;  %v3797_v0 = vmul.f32 %v3668_v43, %v8540_v4  ;;  %v6670_v5 = vld [vmem:[%s7305_s20 + $0x164] sm:$0xf]  ;;  %v6154_v63 = vld [vmem:[%s7305_s20 + $0x168] sm:$0xf0] }
 0x67f   : > { %v9005_v39 = vpop.f32.mrf.mxu2  ;;  %v9007_v51 = vpop.f32.mrf.mxu3  ;;  %4313 = vmatpush.bf16.msrb.mxu1 %v6069_v45  ;;  %v3703_v31 = vmul.f32 %v8903_v16, %v3702_v47  ;;  %v3777_v33 = vsub.f32 1.0, %v3776_v42  ;;  %v3808_v3 = vmul.f32 %v3792_v36, %v3439_v46  ;;  %v3717_v45 = vsub.f32 1.0, %v3716_v59  ;;  %v6675_v29 = vld [vmem:[%s7305_s20 + $0x184] sm:$0xf0]  ;;  %v6688_v23 = vld [vmem:[%s7305_s20 + $0x1f4] sm:$0xf] }
 0x680   : > { %v3421_v44 = vpop.f32.mrf.mxu0  ;;  %v3440_v40 = vpop.f32.mrf.mxu1  ;;  %4258 = vmatpush.bf16.msra.mxu2 %v6113_v15  ;;  %4296 = vmatpush.bf16.msrb.mxu0 %v5989_v62  ;;  %v6177_v56 = vor.u32 %v6677_v28, %v6176_v24  ;;  %v3764_v4 = vadd.f32 %v8924_v7, %v3763_v48  ;;  %v3477_v47 = vadd.f32 %v9007_v51, %v9005_v39  ;;  %v6042_v62 = vld [vmem:[%s7305_s20 + $0x88] sm:$0xf0]  ;;  %v3771_v39 = vand.u32 2147483648, %v8824_v35  ;;  %v6226_v57 = vld [vmem:[%s7305_s20 + $0x1f8] sm:$0xf0] }
 0x681   : > { %v3441_v6 = vadd.f32 %v3440_v40, %v3421_v44  ;;  %4276 = vmatpush.bf16.msra.mxu3 %v6185_v25  ;;  %v6053_v44 = vor.u32 %v6644_v14, %v6050_v9  ;;  %v6168_v40 = vld [vmem:[%s7305_s20 + $0x180] sm:$0xf]  ;;  %v6157_v51 = vor.u32 %v6670_v5, %v6154_v63  ;;  %v3704_v60 = vadd.f32 %v8903_v16, %v3703_v31  ;;  %v6668_v42 = vld [vmem:[%s7305_s20 + $0x154] sm:$0xf]  ;;  %v6146_v46 = vld [vmem:[%s7305_s20 + $0x158] sm:$0xf0] }
 0x682   : > { %vm9074_vm8 = vcmp.eq.f32.partialorder %v3709_v58, 8.507059e+37  ;;  %v3718_v32 = vmul.f32 %v9011_v2, %v3717_v45  ;;  %v6169_v35 = vor.u32 %v6675_v29, %v6168_v40  ;;  %v3712_v25 = vor.u32 1.1754944e-38, %v3711_v34  ;;  %v6666_v21 = vld [vmem:[%s7305_s20 + $0x144] sm:$0xf]  ;;  %v6138_v9 = vld [vmem:[%s7305_s20 + $0x148] sm:$0xf0] }
 0x683   : > { %v3812_v54 = vmul.f32 %v3796_v61, %v3441_v6  ;;  %4314 = vmatpush.bf16.msrb.mxu1 %v6061_v1  ;;  %v6642_v6 = vld [vmem:[%s7305_s20 + $0x84] sm:$0xf]  ;;  %v3778_v61 = vmul.f32 %v9000_v53, %v3777_v33  ;;  %v3768_v58 = vsel %vm9081_vm11, %v8924_v7, %v3764_v4  ;;  %v3809_v1 = vmul.f32 %v3793_v49, %v3477_v47  ;;  %v6218_v49 = vld [vmem:[%s7305_s20 + $0x1e8] sm:$0xf0]  ;;  %v6130_v29 = vld [vmem:[%s7305_s20 + $0x138] sm:$0xf0] }
 0x684   : > { %4259 = vmatpush.bf16.msra.mxu2 %v6105_v30  ;;  %4297 = vmatpush.bf16.msrb.mxu0 %v5981_v12  ;;  %v6045_v59 = vor.u32 %v6642_v6, %v6042_v62  ;;  %v6229_v24 = vor.u32 %v6688_v23, %v6226_v57  ;;  %vm3770_vm13 = vcmp.eq.f32.partialorder %v3769_v8, 8.507059e+37  ;;  %v6149_v7 = vor.u32 %v6668_v42, %v6146_v46  ;;  %v6686_v30 = vld [vmem:[%s7305_s20 + $0x1e4] sm:$0xf]  ;;  %v6194_v48 = vld [vmem:[%s7305_s20 + $0x1b8] sm:$0xf0] }
 0x685   : > { %v9055_v15 = vpack.c.bf16 %v3812_v54, %v3808_v3  ;;  %4277 = vmatpush.bf16.msra.mxu3 %v6177_v56  ;;  %v3772_v54 = vor.u32 1.1754944e-38, %v3771_v39  ;;  %v3708_v28 = vsel %vm9094_vm12, %v8903_v16, %v3704_v60  ;;  %vm3781_vm14 = vweird.f32 %v9000_v53  ;;  %v6684_v56 = vld [vmem:[%s7305_s20 + $0x1d4] sm:$0xf]  ;;  %v6682_v23 = vld [vmem:[%s7305_s20 + $0x1c4] sm:$0xf] }
 0x686   : > { %v3724_v34 = vand.u32 2147483647, %v8885_v55  ;;  %v3784_v12 = vand.u32 2147483647, %v8876_v11  ;;  %v3719_v31 = vadd.f32 %v9011_v2, %v3718_v32  ;;  %vm3721_vm15 = vweird.f32 %v9011_v2  ;;  %vm9120_vm1 = vmor %vm3780_vm0, %vm3781_vm14  ;;  %v6202_v60 = vld [vmem:[%s7305_s20 + $0x1c8] sm:$0xf0] }
 0x687   : > { %v3459_v13 = vpop.f32.mrf.mxu2  ;;  %v3478_v17 = vpop.f32.mrf.mxu3  ;;  %4315 = vmatpush.bf16.msrb.mxu1 %v6053_v44  ;;  %4260 = vmatmul.bf16.vlgmr.msra.gmra.mxu2 %v9055_v15  ;;  %v3773_v8 = vsel %vm3770_vm13, %v3772_v54, %v3768_v58  ;;  %v6221_v5 = vor.u32 %v6686_v30, %v6218_v49  ;;  %v3713_v63 = vsel %vm9074_vm8, %v3712_v25, %v3708_v28  ;;  %v3726_v45 = vand.u32 2147483648, %v8885_v55  ;;  %v6210_v44 = vld [vmem:[%s7305_s20 + $0x1d8] sm:$0xf0]  ;;  %vm9139_vm3 = vmor %vm3720_vm2, %vm3721_vm15  ;;  %v6680_v58 = vld [vmem:[%s7305_s20 + $0x1b4] sm:$0xf] }
 0x688   : > { %v3479_v38 = vadd.f32 %v3478_v17, %v3459_v13  ;;  %v9057_v41 = vpop.f32.mrf.mxu0  ;;  %v9059_v36 = vpop.f32.mrf.mxu1  ;;  %4328 = vmatpush.bf16.msrb.mxu2 %v6165_v20  ;;  %4298 = vmatmul.bf16.vlgmr.msrb.gmra.mxu0 %v8745_v27  ;;  %v3779_v27 = vadd.f32 %v9000_v53, %v3778_v61  ;;  %v3786_v20 = vand.u32 2147483648, %v8876_v11  ;;  %v6141_v11 = vor.u32 %v6666_v21, %v6138_v9  ;;  %v6662_v61 = vld [vmem:[%s7305_s20 + $0x124] sm:$0xf]  ;;  %v6660_v54 = vld [vmem:[%s7305_s20 + $0x114] sm:$0xf] }
 0x689   : > { %4278 = vmatpush.bf16.msra.mxu3 %v6169_v35  ;;  %v3804_v40 = vmul.f32 %v3773_v8, %v8672_v19  ;;  %v3444_v47 = vadd.f32 %v9059_v36, %v9057_v41  ;;  %vm3785_vm4 = vcmp.eq.f32.partialorder %v3784_v12, 8.507059e+37  ;;  %v6213_v6 = vor.u32 %v6684_v56, %v6210_v44  ;;  %v6678_v28 = vld [vmem:[%s7305_s20 + $0x1a4] sm:$0xf]  ;;  %v6106_v9 = vld [vmem:[%s7305_s20 + $0x108] sm:$0xf0] }
 0x68a   : > { %v3813_v43 = vmul.f32 %v3797_v0, %v3479_v38  ;;  %v3783_v4 = vsel %vm9120_vm1, %v9000_v53, %v3779_v27  ;;  %v6664_v38 = vld [vmem:[%s7305_s20 + $0x134] sm:$0xf]  ;;  %v3787_v19 = vor.u32 1.1754944e-38, %v3786_v20  ;;  %v9569_v53 = vld [vmem:[#allocation27_spill] sm:$0xff]  ;;  %vm3725_vm5 = vcmp.eq.f32.partialorder %v3724_v34, 8.507059e+37 }
 0x68b   : > { %4316 = vmatpush.bf16.msrb.mxu1 %v6045_v59  ;;  %v3800_v41 = vmul.f32 %v3713_v63, %v9569_v53  ;;  %v3727_v62 = vor.u32 1.1754944e-38, %v3726_v45  ;;  %v6205_v59 = vor.u32 %v6682_v23, %v6202_v60  ;;  %v6658_v21 = vld [vmem:[%s7305_s20 + $0x104] sm:$0xf]  ;;  %v6178_v12 = vld [vmem:[%s7305_s20 + $0x198] sm:$0xf0]  ;;  %v9572_v23 = vld [vmem:[#allocation23_spill] sm:$0xff] }
 0x68c   : > { %4329 = vmatpush.bf16.msrb.mxu2 %v6157_v51  ;;  %v9105_v14 = vpack.c.bf16 %v3813_v43, %v3809_v1  ;;  %v3788_v39 = vsel %vm3785_vm4, %v3787_v19, %v3783_v4  ;;  %v6133_v51 = vor.u32 %v6664_v38, %v6130_v29  ;;  %v6122_v43 = vld [vmem:[%s7305_s20 + $0x128] sm:$0xf0]  ;;  %v6109_v8 = vor.u32 %v6658_v21, %v6106_v9  ;;  %v9571_v53 = vld [vmem:[#allocation21_spill] sm:$0xff]  ;;  %v9575_v9 = vld [vmem:[#allocation22_spill] sm:$0xff] }
 0x68d   : > { %4347 = vmatpush.bf16.msrb.mxu3 %v6229_v24  ;;  %v3816_v57 = vmul.f32 %v3800_v41, %v3444_v47  ;;  %v3805_v22 = vmul.f32 %v3788_v39, %v8720_v10  ;;  %v6125_v25 = vor.u32 %v6662_v61, %v6122_v43  ;;  %v6197_v10 = vor.u32 %v6680_v58, %v6194_v48  ;;  %v9570_v4 = vld [vmem:[#allocation19_spill] sm:$0xff] }
 0x68e   : > { %4279 = vmatmul.bf16.vlgmr.msra.gmra.mxu3 %v9105_v14  ;;  %4317 = vmatmul.bf16.vlgmr.msrb.gmra.mxu1 %v8837_v50  ;;  %v3723_v50 = vsel %vm9139_vm3, %v9011_v2, %v3719_v31 }
 0x68f   : > { %v3462_v0 = vpop.f32.mrf.mxu2  ;;  %v3481_v16 = vpop.f32.mrf.mxu3  ;;  %v3728_v42 = vsel %vm3725_vm5, %v3727_v62, %v3723_v50 }
 0x690   : > { %v3426_v33 = vpop.f32.mrf.mxu0  ;;  %v3445_v3 = vpop.f32.mrf.mxu1  ;;  %4330 = vmatpush.bf16.msrb.mxu2 %v6149_v7  ;;  %v3482_v32 = vadd.f32 %v3481_v16, %v3462_v0  ;;  %v3801_v1 = vmul.f32 %v3728_v42, %v8731_v18  ;;  %v6114_v7 = vld [vmem:[%s7305_s20 + $0x118] sm:$0xf0]  ;;  %v6186_v18 = vld [vmem:[%s7305_s20 + $0x1a8] sm:$0xf0]  ;;  %v6674_v0 = vld [vmem:[%s7305_s20 + $0x184] sm:$0xf] }
 0x691   : > { %v3446_v17 = vadd.f32 %v3445_v3, %v3426_v33  ;;  %4348 = vmatpush.bf16.msrb.mxu3 %v6221_v5  ;;  %v6117_v49 = vor.u32 %v6660_v54, %v6114_v7  ;;  %v6189_v34 = vor.u32 %v6678_v28, %v6186_v18  ;;  %v6170_v16 = vld [vmem:[%s7305_s20 + $0x188] sm:$0xf0]  ;;  %v9574_v54 = vld [vmem:[#allocation20_spill] sm:$0xff] }
 0x692   : > { %v3817_v30 = vmul.f32 %v3801_v1, %v3482_v32  ;;  %v6173_v31 = vor.u32 %v6674_v0, %v6170_v16  ;;  %v9573_v32 = vld [vmem:[#allocation25_spill] sm:$0xff]  ;;  %v9576_v16 = vld [vmem:[#allocation24_spill] sm:$0xff] }
 0x693   : > { %v3820_v36 = vmul.f32 %v3804_v40, %v3446_v17 }
 0x694   : > { %4331 = vmatpush.bf16.msrb.mxu2 %v6141_v11 }
 0x695   : > { %4349 = vmatpush.bf16.msrb.mxu3 %v6213_v6  ;;  %v3828_v35 = vpack.c.bf16 %v3820_v36, %v3816_v57 }
 0x697   : > { %v3464_v46 = vpop.f32.mrf.mxu2  ;;  %v3483_v2 = vpop.f32.mrf.mxu3  ;;  %4265 = vmatmul.bf16.gmra.mxu2 %v3828_v35 }
 0x698   : > { %v3484_v26 = vadd.f32 %v3483_v2, %v3464_v46  ;;  %4332 = vmatpush.bf16.msrb.mxu2 %v6133_v51  ;;  %4303 = vmatmul.bf16.gmra.mxu0 %v8900_v37  ;;  %v6676_v37 = vld [vmem:[%s7305_s20 + $0x194] sm:$0xf] }
 0x699   : > { %4350 = vmatpush.bf16.msrb.mxu3 %v6205_v59  ;;  %v6181_v20 = vor.u32 %v6676_v37, %v6178_v12 }
 0x69a   : > { %v3821_v24 = vmul.f32 %v3805_v22, %v3484_v26 }
 0x69c   : > { %4333 = vmatpush.bf16.msrb.mxu2 %v6125_v25  ;;  %v3829_v27 = vpack.c.bf16 %v3821_v24, %v3817_v30 }
 0x69d   : > { %4351 = vmatpush.bf16.msrb.mxu3 %v6197_v10 }
 0x69e   : > { %4284 = vmatmul.bf16.gmra.mxu3 %v3829_v27  ;;  %4322 = vmatmul.bf16.gmra.mxu1 %v8996_v52 }
 0x6a0   : > { %4334 = vmatpush.bf16.msrb.mxu2 %v6117_v49 }
 0x6a1   : > { %4352 = vmatpush.bf16.msrb.mxu3 %v6189_v34 }
 0x6a4   : > { %4335 = vmatpush.bf16.msrb.mxu2 %v6109_v8 }
 0x6a5   : > { %4353 = vmatpush.bf16.msrb.mxu3 %v6181_v20 }
 0x6a7   : > { %4336 = vmatmul.bf16.vlgmr.msrb.gmra.mxu2 %v9055_v15 }
 0x6a9   : > { %4354 = vmatpush.bf16.msrb.mxu3 %v6173_v31 }
 0x6ae   : > { %4355 = vmatmul.bf16.vlgmr.msrb.gmra.mxu3 %v9105_v14 }
 0x6b7   : > { %4341 = vmatmul.bf16.gmra.mxu2 %v3828_v35 }
 0x6be   : > { %4360 = vmatmul.bf16.gmra.mxu3 %v3829_v27 }
 0x6e4   : > { %v4223_v3 = vpop.f32.mrf.mxu0 }
 0x6eb   : > { %v4242_v33 = vpop.f32.mrf.mxu1 }
 0x6ec   : > { %v4225_v52 = vpop.f32.mrf.mxu0  ;;  %v4243_v45 = vadd.f32 %v4242_v33, %v4223_v3 }
 0x6f3   : > { %v4244_v5 = vpop.f32.mrf.mxu1 }
 0x6f4   : > { %v4228_v44 = vpop.f32.mrf.mxu0  ;;  %v4245_v15 = vadd.f32 %v4244_v5, %v4225_v52 }
 0x6fb   : > { %v4247_v17 = vpop.f32.mrf.mxu1 }
 0x6fc   : > { %v4230_v50 = vpop.f32.mrf.mxu0  ;;  %v4248_v36 = vadd.f32 %v4247_v17, %v4228_v44 }
 0x703   : > { %v4249_v55 = vpop.f32.mrf.mxu1 }
 0x704   : > { %v4250_v61 = vadd.f32 %v4249_v55, %v4230_v50 }
 0x705   : > { %v4299_v43 = vpop.f32.mrf.mxu0 }
 0x70a   : > { %v4261_v63 = vpop.f32.mrf.mxu2 }
 0x70b   : > { %v4262_v13 = vadd.f32 %v4261_v63, %v4243_v45  ;;  %v4318_v60 = vpop.f32.mrf.mxu1 }
 0x70c   : > { %v4319_v35 = vadd.f32 %v4318_v60, %v4299_v43 }
 0x70d   : > { %v4301_v58 = vpop.f32.mrf.mxu0 }
 0x711   : > { %v4280_v11 = vpop.f32.mrf.mxu3 }
 0x712   : > { %v4281_v56 = vadd.f32 %v4280_v11, %v4262_v13  ;;  %v4263_v40 = vpop.f32.mrf.mxu2  ;;  %v9577_v13 = vld [vmem:[#allocation26_spill] sm:$0xff] }
 0x713   : > { %v4264_v14 = vadd.f32 %v4263_v40, %v4245_v15  ;;  %v4320_v59 = vpop.f32.mrf.mxu1 }
 0x714   : > { %v9170_v47 = vadd.f32 %v4281_v56, %v9570_v4  ;;  %v4321_v30 = vadd.f32 %v4320_v59, %v4301_v58 }
 0x715   : > { %v4304_v18 = vpop.f32.mrf.mxu0 }
 0x716   : > { %4374 = vst [vmem:[#allocation2 + $0x30] sm:$0xff] %v9170_v47 }
 0x719   : > { %v4282_v38 = vpop.f32.mrf.mxu3 }
 0x71a   : > { %v4283_v29 = vadd.f32 %v4282_v38, %v4264_v14  ;;  %v4266_v19 = vpop.f32.mrf.mxu2 }
 0x71b   : > { %v4267_v6 = vadd.f32 %v4266_v19, %v4248_v36  ;;  %v4323_v49 = vpop.f32.mrf.mxu1 }
 0x71c   : > { %v9174_v41 = vadd.f32 %v4283_v29, %v9571_v53  ;;  %v4324_v8 = vadd.f32 %v4323_v49, %v4304_v18 }
 0x71d   : > { %v4306_v33 = vpop.f32.mrf.mxu0 }
 0x71e   : > { %4376 = vst [vmem:[#allocation2 + $0x18] sm:$0xff] %v9174_v41 }
 0x721   : > { %v4285_v62 = vpop.f32.mrf.mxu3 }
 0x722   : > { %v4286_v39 = vadd.f32 %v4285_v62, %v4267_v6  ;;  %v4268_v51 = vpop.f32.mrf.mxu2 }
 0x723   : > { %v4269_v42 = vadd.f32 %v4268_v51, %v4250_v61  ;;  %v4325_v0 = vpop.f32.mrf.mxu1 }
 0x724   : > { %v9178_v57 = vadd.f32 %v4286_v39, %v9572_v23  ;;  %v4326_v5 = vadd.f32 %v4325_v0, %v4306_v33 }
 0x726   : > { %4378 = vst [vmem:[#allocation2 + $0x8] sm:$0xff] %v9178_v57 }
 0x729   : > { %v4287_v46 = vpop.f32.mrf.mxu3 }
 0x72a   : > { %v4288_v2 = vadd.f32 %v4287_v46, %v4269_v42  ;;  %v4337_v22 = vpop.f32.mrf.mxu2 }
 0x72b   : > { %v4338_v25 = vadd.f32 %v4337_v22, %v4319_v35 }
 0x72c   : > { %v9182_v26 = vadd.f32 %v4288_v2, %v9573_v32 }
 0x72e   : > { %4380 = vst [vmem:[#allocation2 + $0x28] sm:$0xff] %v9182_v26 }
 0x731   : > { %v4356_v1 = vpop.f32.mrf.mxu3 }
 0x732   : > { %v4357_v24 = vadd.f32 %v4356_v1, %v4338_v25  ;;  %v4339_v48 = vpop.f32.mrf.mxu2 }
 0x733   : > { %v4340_v10 = vadd.f32 %v4339_v48, %v4321_v30 }
 0x734   : > { %v9186_v7 = vadd.f32 %v4357_v24, %v9574_v54 }
 0x736   : > { %4375 = vst [vmem:[#allocation2] sm:$0xff] %v9186_v7 }
 0x739   : > { %v4358_v28 = vpop.f32.mrf.mxu3 }
 0x73a   : > { %v4359_v27 = vadd.f32 %v4358_v28, %v4340_v10  ;;  %v4342_v21 = vpop.f32.mrf.mxu2 }
 0x73b   : > { %v4343_v37 = vadd.f32 %v4342_v21, %v4324_v8 }
 0x73c   : > { %v9190_v34 = vadd.f32 %v4359_v27, %v9575_v9 }
 0x73e   : > { %4377 = vst [vmem:[#allocation2 + $0x10] sm:$0xff] %v9190_v34 }
 0x741   : > { %v4361_v12 = vpop.f32.mrf.mxu3 }
 0x742   : > { %v4362_v20 = vadd.f32 %v4361_v12, %v4343_v37  ;;  %v4344_v3 = vpop.f32.mrf.mxu2 }
 0x743   : > { %v4345_v52 = vadd.f32 %v4344_v3, %v4326_v5 }
 0x744   : > { %v9194_v31 = vadd.f32 %v4362_v20, %v9576_v16 }
 0x746   : > { %4379 = vst [vmem:[#allocation2 + $0x20] sm:$0xff] %v9194_v31 }
 0x749   : > { %v4363_v63 = vpop.f32.mrf.mxu3 }
 0x74a   : > { %v4364_v45 = vadd.f32 %v4363_v63, %v4345_v52  ;;  %4385 = sbr.rel (%p6230_p10) target bundleno = 2188 (0x88c), region = 88 }
 0x74c   : > { %v9198_v17 = vadd.f32 %v4364_v45, %v9577_v13 }
 0x74e   : > { %4381 = vst [vmem:[#allocation2 + $0x38] sm:$0xff] %v9198_v17 }
 0x74f   : > { %v4391_v11 = vmul.f32 %v9178_v57, %v9178_v57  ;;  %v4392_v56 = vmul.f32 %v9194_v31, %v9194_v31  ;;  %v4387_v44 = vmul.f32 %v9170_v47, %v9170_v47  ;;  %v4388_v40 = vmul.f32 %v9186_v7, %v9186_v7  ;;  %v6289_v50 = vld [vmem:[%s9578_s16 + $0x70] sm:$0xf]  ;;  %v6705_v36 = vld [vmem:[%s9578_s16 + $0x74] sm:$0xf0]  ;;  %v6704_v51 = vld [vmem:[%s9578_s16 + $0x74] sm:$0xf] }
 0x750   : > { %v4393_v14 = vmul.f32 %v9182_v26, %v9182_v26  ;;  %v4394_v38 = vmul.f32 %v9198_v17, %v9198_v17  ;;  %v4389_v29 = vmul.f32 %v9174_v41, %v9174_v41  ;;  %v4390_v55 = vmul.f32 %v9190_v34, %v9190_v34  ;;  %v6353_v6 = vld [vmem:[%s9578_s16 + $0xf0] sm:$0xf]  ;;  %v6721_v39 = vld [vmem:[%s9578_s16 + $0xf4] sm:$0xf0]  ;;  %v6291_v23 = vld [vmem:[%s9578_s16 + $0x78] sm:$0xf0] }
 0x751   : > { %v4401_v4 = vadd.f32 %v4392_v56, %v4391_v11  ;;  %v4395_v15 = vadd.f32 %v4388_v40, %v4387_v44  ;;  %v6290_v62 = vor.u32 %v6705_v36, %v6289_v50  ;;  %v6354_v60 = vor.u32 %v6721_v39, %v6353_v6  ;;  %v6720_v43 = vld [vmem:[%s9578_s16 + $0xf4] sm:$0xf]  ;;  %v6355_v42 = vld [vmem:[%s9578_s16 + $0xf8] sm:$0xf0]  ;;  %v6281_v2 = vld [vmem:[%s9578_s16 + $0x60] sm:$0xf] }
 0x752   : > { %v4404_v19 = vadd.f32 %v4394_v38, %v4393_v14  ;;  %v4398_v53 = vadd.f32 %v4390_v55, %v4389_v29  ;;  %v6294_v61 = vor.u32 %v6704_v51, %v6291_v23  ;;  %v6358_v46 = vor.u32 %v6720_v43, %v6355_v42  ;;  %v6703_v22 = vld [vmem:[%s9578_s16 + $0x64] sm:$0xf0]  ;;  %v6345_v32 = vld [vmem:[%s9578_s16 + $0xe0] sm:$0xf]  ;;  %v6702_v25 = vld [vmem:[%s9578_s16 + $0x64] sm:$0xf] }
 0x753   : > { %4402 = vadd.xlane.f32.xlu1 %v4401_v4  ;;  %4396 = vadd.xlane.f32.xlu0 %v4395_v15  ;;  %v6282_v35 = vor.u32 %v6703_v22, %v6281_v2  ;;  %v6719_v59 = vld [vmem:[%s9578_s16 + $0xe4] sm:$0xf0]  ;;  %v6283_v58 = vld [vmem:[%s9578_s16 + $0x68] sm:$0xf0]  ;;  %v6718_v48 = vld [vmem:[%s9578_s16 + $0xe4] sm:$0xf] }
 0x754   : > { %4672 = vmatpush.bf16.msra.mxu0 %v6290_v62  ;;  %4691 = vmatpush.bf16.msra.mxu1 %v6354_v60  ;;  %v6346_v1 = vor.u32 %v6719_v59, %v6345_v32  ;;  %v6286_v24 = vor.u32 %v6702_v25, %v6283_v58  ;;  %v6347_v54 = vld [vmem:[%s9578_s16 + $0xe8] sm:$0xf0]  ;;  %v6273_v10 = vld [vmem:[%s9578_s16 + $0x50] sm:$0xf]  ;;  %v6701_v49 = vld [vmem:[%s9578_s16 + $0x54] sm:$0xf0] }
 0x755   : > { %4710 = vmatpush.bf16.msra.mxu2 %v6294_v61  ;;  %4729 = vmatpush.bf16.msra.mxu3 %v6358_v46  ;;  %v6350_v30 = vor.u32 %v6718_v48, %v6347_v54  ;;  %v6337_v28 = vld [vmem:[%s9578_s16 + $0xd0] sm:$0xf]  ;;  %v6274_v27 = vor.u32 %v6701_v49, %v6273_v10  ;;  %v6717_v18 = vld [vmem:[%s9578_s16 + $0xd4] sm:$0xf0]  ;;  %v6700_v21 = vld [vmem:[%s9578_s16 + $0x54] sm:$0xf] }
 0x756   : > { %v6275_v9 = vld [vmem:[%s9578_s16 + $0x58] sm:$0xf0]  ;;  %v6338_v8 = vor.u32 %v6717_v18, %v6337_v28  ;;  %v6716_v12 = vld [vmem:[%s9578_s16 + $0xd4] sm:$0xf]  ;;  %v6265_v16 = vld [vmem:[%s9578_s16 + $0x40] sm:$0xf] }
 0x757   : > { %v6278_v37 = vor.u32 %v6700_v21, %v6275_v9  ;;  %v6339_v20 = vld [vmem:[%s9578_s16 + $0xd8] sm:$0xf0]  ;;  %v6699_v33 = vld [vmem:[%s9578_s16 + $0x44] sm:$0xf0]  ;;  %v6329_v3 = vld [vmem:[%s9578_s16 + $0xc0] sm:$0xf] }
 0x758   : > { %4673 = vmatpush.bf16.msra.mxu0 %v6282_v35  ;;  %4692 = vmatpush.bf16.msra.mxu1 %v6346_v1  ;;  %v6342_v0 = vor.u32 %v6716_v12, %v6339_v20  ;;  %v6266_v5 = vor.u32 %v6699_v33, %v6265_v16  ;;  %v6715_v52 = vld [vmem:[%s9578_s16 + $0xc4] sm:$0xf0]  ;;  %v6698_v63 = vld [vmem:[%s9578_s16 + $0x44] sm:$0xf]  ;;  %v6267_v45 = vld [vmem:[%s9578_s16 + $0x48] sm:$0xf0] }
 0x759   : > { %4711 = vmatpush.bf16.msra.mxu2 %v6286_v24  ;;  %4730 = vmatpush.bf16.msra.mxu3 %v6350_v30  ;;  %v6330_v13 = vor.u32 %v6715_v52, %v6329_v3  ;;  %v6270_v11 = vor.u32 %v6698_v63, %v6267_v45  ;;  %v6714_v56 = vld [vmem:[%s9578_s16 + $0xc4] sm:$0xf]  ;;  %v6331_v44 = vld [vmem:[%s9578_s16 + $0xc8] sm:$0xf0]  ;;  %v6257_v4 = vld [vmem:[%s9578_s16 + $0x30] sm:$0xf] }
 0x75a   : > { %v6334_v40 = vor.u32 %v6714_v56, %v6331_v44  ;;  %v6697_v15 = vld [vmem:[%s9578_s16 + $0x34] sm:$0xf0]  ;;  %v6321_v14 = vld [vmem:[%s9578_s16 + $0xb0] sm:$0xf]  ;;  %v6696_v55 = vld [vmem:[%s9578_s16 + $0x34] sm:$0xf] }
 0x75b   : > { %4405 = vadd.xlane.f32.xlu1 %v4404_v19  ;;  %4399 = vadd.xlane.f32.xlu0 %v4398_v53  ;;  %v6258_v38 = vor.u32 %v6697_v15, %v6257_v4  ;;  %v6713_v29 = vld [vmem:[%s9578_s16 + $0xb4] sm:$0xf0]  ;;  %v6259_v19 = vld [vmem:[%s9578_s16 + $0x38] sm:$0xf0]  ;;  %v6712_v36 = vld [vmem:[%s9578_s16 + $0xb4] sm:$0xf] }
 0x75c   : > { %4674 = vmatpush.bf16.msra.mxu0 %v6274_v27  ;;  %4693 = vmatpush.bf16.msra.mxu1 %v6338_v8  ;;  %v6322_v53 = vor.u32 %v6713_v29, %v6321_v14  ;;  %v6262_v50 = vor.u32 %v6696_v55, %v6259_v19  ;;  %v6323_v6 = vld [vmem:[%s9578_s16 + $0xb8] sm:$0xf0]  ;;  %v6249_v39 = vld [vmem:[%s9578_s16 + $0x20] sm:$0xf]  ;;  %v6695_v51 = vld [vmem:[%s9578_s16 + $0x24] sm:$0xf0] }
 0x75d   : > { %4712 = vmatpush.bf16.msra.mxu2 %v6278_v37  ;;  %4731 = vmatpush.bf16.msra.mxu3 %v6342_v0  ;;  %v6326_v62 = vor.u32 %v6712_v36, %v6323_v6  ;;  %v6313_v23 = vld [vmem:[%s9578_s16 + $0xa0] sm:$0xf]  ;;  %v6250_v60 = vor.u32 %v6695_v51, %v6249_v39  ;;  %v6711_v61 = vld [vmem:[%s9578_s16 + $0xa4] sm:$0xf0]  ;;  %v6694_v43 = vld [vmem:[%s9578_s16 + $0x24] sm:$0xf] }
 0x75e   : > { %v6251_v42 = vld [vmem:[%s9578_s16 + $0x28] sm:$0xf0]  ;;  %v6314_v46 = vor.u32 %v6711_v61, %v6313_v23  ;;  %v6710_v22 = vld [vmem:[%s9578_s16 + $0xa4] sm:$0xf]  ;;  %v6241_v59 = vld [vmem:[%s9578_s16 + $0x10] sm:$0xf] }
 0x75f   : > { %v6254_v2 = vor.u32 %v6694_v43, %v6251_v42  ;;  %v6315_v32 = vld [vmem:[%s9578_s16 + $0xa8] sm:$0xf0]  ;;  %v6693_v25 = vld [vmem:[%s9578_s16 + $0x14] sm:$0xf0]  ;;  %v6305_v58 = vld [vmem:[%s9578_s16 + $0x90] sm:$0xf] }
 0x760   : > { %4675 = vmatpush.bf16.msra.mxu0 %v6266_v5  ;;  %4694 = vmatpush.bf16.msra.mxu1 %v6330_v13  ;;  %v6318_v35 = vor.u32 %v6710_v22, %v6315_v32  ;;  %v6242_v1 = vor.u32 %v6693_v25, %v6241_v59  ;;  %v6709_v24 = vld [vmem:[%s9578_s16 + $0x94] sm:$0xf0]  ;;  %v6692_v48 = vld [vmem:[%s9578_s16 + $0x14] sm:$0xf]  ;;  %v6243_v54 = vld [vmem:[%s9578_s16 + $0x18] sm:$0xf0] }
 0x761   : > { %4713 = vmatpush.bf16.msra.mxu2 %v6270_v11  ;;  %4732 = vmatpush.bf16.msra.mxu3 %v6334_v40  ;;  %v6306_v30 = vor.u32 %v6709_v24, %v6305_v58  ;;  %v6246_v10 = vor.u32 %v6692_v48, %v6243_v54  ;;  %v6708_v49 = vld [vmem:[%s9578_s16 + $0x94] sm:$0xf]  ;;  %v6307_v28 = vld [vmem:[%s9578_s16 + $0x98] sm:$0xf0]  ;;  %v6233_v27 = vld [vmem:[%s9578_s16] sm:$0xf] }
 0x762   : > { %v6310_v18 = vor.u32 %v6708_v49, %v6307_v28  ;;  %v6691_v21 = vld [vmem:[%s9578_s16 + $0x4] sm:$0xf0]  ;;  %v6297_v9 = vld [vmem:[%s9578_s16 + $0x80] sm:$0xf]  ;;  %v6690_v16 = vld [vmem:[%s9578_s16 + $0x4] sm:$0xf] }
 0x763   : > { %v6707_v8 = vld [vmem:[%s9578_s16 + $0x84] sm:$0xf0]  ;;  %v6234_v20 = vor.u32 %v6691_v21, %v6233_v27  ;;  %v6235_v33 = vld [vmem:[%s9578_s16 + $0x8] sm:$0xf0]  ;;  %v6706_v3 = vld [vmem:[%s9578_s16 + $0x84] sm:$0xf] }
 0x764   : > { %4676 = vmatpush.bf16.msra.mxu0 %v6258_v38  ;;  %4695 = vmatpush.bf16.msra.mxu1 %v6322_v53  ;;  %v6298_v0 = vor.u32 %v6707_v8, %v6297_v9  ;;  %v9579_v5 = vld [vmem:[#allocation18_spill] sm:$0xff]  ;;  %v6238_v63 = vor.u32 %v6690_v16, %v6235_v33  ;;  %v6299_v45 = vld [vmem:[%s9578_s16 + $0x88] sm:$0xf0] }
 0x765   : > { %4714 = vmatpush.bf16.msra.mxu2 %v6262_v50  ;;  %4733 = vmatpush.bf16.msra.mxu3 %v6326_v62  ;;  %v6302_v13 = vor.u32 %v6706_v3, %v6299_v45  ;;  %v4386_v32 = vld [vmem:[%s9580_s14] sm:$0x3] }
 0x766   : > { %v4465_v48 = vperm.slane %v4386_v32, 1 }
 0x768   : > { %4677 = vmatpush.bf16.msra.mxu0 %v6250_v60  ;;  %4696 = vmatpush.bf16.msra.mxu1 %v6314_v46 }
 0x769   : > { %4715 = vmatpush.bf16.msra.mxu2 %v6254_v2  ;;  %4734 = vmatpush.bf16.msra.mxu3 %v6318_v35 }
 0x76c   : > { %4678 = vmatpush.bf16.msra.mxu0 %v6242_v1  ;;  %4697 = vmatpush.bf16.msra.mxu1 %v6306_v30  ;;  %v4464_v1 = vperm.slane %v4386_v32, 0 }
 0x76d   : > { %4716 = vmatpush.bf16.msra.mxu2 %v6246_v10  ;;  %4735 = vmatpush.bf16.msra.mxu3 %v6310_v18 }
 0x770   : > { %4679 = vmatpush.bf16.msra.mxu0 %v6234_v20  ;;  %4698 = vmatpush.bf16.msra.mxu1 %v6298_v0 }
 0x771   : > { %4717 = vmatpush.bf16.msra.mxu2 %v6238_v63  ;;  %4736 = vmatpush.bf16.msra.mxu3 %v6302_v13 }
 0x7c6   : > { %v4403_v37 = vpop.xlane.xlu1 %4402  ;;  %v4397_v12 = vpop.xlane.xlu0 %4396 }
 0x7c7   : > { %v4407_v52 = vmul.f32 %v4397_v12, %v9579_v5  ;;  %v4409_v56 = vmul.f32 %v4403_v37, %v9579_v5 }
 0x7c9   : > { %v4411_v11 = vadd.f32 1e-06, %v4407_v52  ;;  %v9412_v44 = vadd.f32 1e-06, %v4409_v56 }
 0x7cb   : > { %6915 = vrsqrt.f32 %v4411_v11  ;;  %vm4421_vm7 = vweird.f32 %v4411_v11  ;;  %vm4441_vm14 = vweird.f32 %v9412_v44 }
 0x7cc   : > { %6917 = vrsqrt.f32 %v9412_v44 }
 0x7ce   : > { %v4406_v40 = vpop.xlane.xlu1 %4405  ;;  %v4400_v4 = vpop.xlane.xlu0 %4399 }
 0x7cf   : > { %v4410_v15 = vmul.f32 %v4406_v40, %v9579_v5  ;;  %v4408_v14 = vmul.f32 %v4400_v4, %v9579_v5 }
 0x7d1   : > { %v4414_v38 = vadd.f32 1e-06, %v4410_v15  ;;  %v4412_v29 = vadd.f32 1e-06, %v4408_v14  ;;  %v6916_v55 = vpop.eup %6915 }
 0x7d2   : > { %v4416_v19 = vmul.f32 %v6916_v55, %v4411_v11  ;;  %v6918_v36 = vpop.eup %6917  ;;  %vm4422_vm6 = vweird.f32 %v6916_v55 }
 0x7d3   : > { %6919 = vrsqrt.f32 %v4414_v38  ;;  %v4436_v60 = vmul.f32 %v6918_v36, %v9412_v44  ;;  %vm4423_vm9 = vmor %vm4421_vm7, %vm4422_vm6  ;;  %vm4431_vm8 = vweird.f32 %v4412_v29  ;;  %vm4451_vm12 = vweird.f32 %v4414_v38 }
 0x7d4   : > { %6921 = vrsqrt.f32 %v4412_v29  ;;  %v4417_v53 = vmul.f32 %v6916_v55, %v4416_v19  ;;  %vm4442_vm15 = vweird.f32 %v6918_v36 }
 0x7d5   : > { %v4437_v2 = vmul.f32 %v6918_v36, %v4436_v60  ;;  %vm4443_vm1 = vmor %vm4441_vm14, %vm4442_vm15 }
 0x7d6   : > { %v4418_v50 = vmul.f32 0.5, %v4417_v53 }
 0x7d7   : > { %v4438_v54 = vmul.f32 0.5, %v4437_v2 }
 0x7d8   : > { %v4419_v62 = vsub.f32 1.5, %v4418_v50 }
 0x7d9   : > { %v6920_v6 = vpop.eup %6919  ;;  %v4439_v8 = vsub.f32 1.5, %v4438_v54 }
 0x7da   : > { %v6922_v39 = vpop.eup %6921  ;;  %v4446_v51 = vmul.f32 %v6920_v6, %v4414_v38  ;;  %v4420_v61 = vmul.f32 %v6916_v55, %v4419_v62  ;;  %vm4452_vm13 = vweird.f32 %v6920_v6 }
 0x7db   : > { %v4426_v23 = vmul.f32 %v6922_v39, %v4412_v29  ;;  %vm4432_vm10 = vweird.f32 %v6922_v39  ;;  %vm4453_vm0 = vmor %vm4451_vm12, %vm4452_vm13 }
 0x7dc   : > { %v4447_v42 = vmul.f32 %v6920_v6, %v4446_v51  ;;  %v4424_v35 = vsel %vm4423_vm9, %v6916_v55, %v4420_v61  ;;  %vm4433_vm11 = vmor %vm4431_vm8, %vm4432_vm10 }
 0x7dd   : > { %v4427_v43 = vmul.f32 %v6922_v39, %v4426_v23  ;;  %v4455_v58 = vmul.f32 %v4424_v35, %v9170_v47  ;;  %v4456_v24 = vmul.f32 %v4424_v35, %v9186_v7 }
 0x7de   : > { %v4448_v59 = vmul.f32 0.5, %v4447_v42 }
 0x7df   : > { %v4428_v46 = vmul.f32 0.5, %v4427_v43  ;;  %v4468_v27 = vmul.f32 %v4464_v1, %v4455_v58  ;;  %v4469_v21 = vmul.f32 %v4465_v48, %v4456_v24 }
 0x7e0   : > { %v4449_v28 = vsub.f32 1.5, %v4448_v59 }
 0x7e1   : > { %v4429_v22 = vsub.f32 1.5, %v4428_v46 }
 0x7e2   : > { %v4450_v7 = vmul.f32 %v6920_v6, %v4449_v28 }
 0x7e3   : > { %v4430_v25 = vmul.f32 %v6922_v39, %v4429_v22 }
 0x7e5   : > { %v4434_v30 = vsel %vm4433_vm11, %v6922_v39, %v4430_v25 }
 0x7e6   : > { %v4457_v10 = vmul.f32 %v4434_v30, %v9174_v41  ;;  %v4458_v49 = vmul.f32 %v4434_v30, %v9190_v34  ;;  %v4440_v41 = vmul.f32 %v6918_v36, %v4439_v8  ;;  %v4454_v34 = vsel %vm4453_vm0, %v6920_v6, %v4450_v7 }
 0x7e7   : > { %v4461_v20 = vmul.f32 %v4454_v34, %v9182_v26  ;;  %v4462_v0 = vmul.f32 %v4454_v34, %v9198_v17 }
 0x7e8   : > { %v4470_v18 = vmul.f32 %v4464_v1, %v4457_v10  ;;  %v4471_v9 = vmul.f32 %v4465_v48, %v4458_v49  ;;  %v4444_v12 = vsel %vm4443_vm1, %v6918_v36, %v4440_v41 }
 0x7e9   : > { %v4459_v16 = vmul.f32 %v4444_v12, %v9178_v57  ;;  %v4460_v33 = vmul.f32 %v4444_v12, %v9194_v31  ;;  %v4474_v3 = vmul.f32 %v4464_v1, %v4461_v20  ;;  %v4475_v5 = vmul.f32 %v4465_v48, %v4462_v0 }
 0x7ea   : > { %v4476_v37 = vpack.c.bf16 %v4470_v18, %v4468_v27  ;;  %v4477_v47 = vpack.c.bf16 %v4471_v9, %v4469_v21 }
 0x7eb   : > { %v4472_v52 = vmul.f32 %v4464_v1, %v4459_v16  ;;  %v4473_v63 = vmul.f32 %v4465_v48, %v4460_v33 }
 0x7ec   : > { %4680 = vmatmul.bf16.vlgmr.msra.gmra.mxu0 %v4476_v37  ;;  %4699 = vmatmul.bf16.vlgmr.msra.gmra.mxu1 %v4477_v47 }
 0x7ed   : > { %4718 = vmatmul.bf16.vlgmr.msra.gmra.mxu2 %v4476_v37  ;;  %4737 = vmatmul.bf16.vlgmr.msra.gmra.mxu3 %v4477_v47  ;;  %v4478_v45 = vpack.c.bf16 %v4474_v3, %v4472_v52  ;;  %v4479_v13 = vpack.c.bf16 %v4475_v5, %v4473_v63 }
 0x7fc   : > { %4685 = vmatmul.bf16.gmra.mxu0 %v4478_v45  ;;  %4704 = vmatmul.bf16.gmra.mxu1 %v4479_v13 }
 0x7fd   : > { %4723 = vmatmul.bf16.gmra.mxu2 %v4478_v45  ;;  %4742 = vmatmul.bf16.gmra.mxu3 %v4479_v13 }
 0x869   : > { %v4681_v11 = vpop.f32.mrf.mxu0  ;;  %v4700_v56 = vpop.f32.mrf.mxu1 }
 0x86a   : > { %v4701_v44 = vadd.f32 %v4700_v56, %v4681_v11 }
 0x86c   : > { %4748 = vst [vmem:[#allocation11] sm:$0xff] %v4701_v44 }
 0x870   : > { %v4719_v26 = vpop.f32.mrf.mxu2  ;;  %v4738_v17 = vpop.f32.mrf.mxu3 }
 0x871   : > { %v4739_v40 = vadd.f32 %v4738_v17, %v4719_v26  ;;  %v4683_v57 = vpop.f32.mrf.mxu0  ;;  %v4702_v4 = vpop.f32.mrf.mxu1 }
 0x872   : > { %v4703_v31 = vadd.f32 %v4702_v4, %v4683_v57 }
 0x873   : > { %4749 = vst [vmem:[#allocation11 + $0x8] sm:$0xff] %v4739_v40 }
 0x874   : > { %4750 = vst [vmem:[#allocation11 + $0x10] sm:$0xff] %v4703_v31 }
 0x878   : > { %v4721_v15 = vpop.f32.mrf.mxu2  ;;  %v4740_v14 = vpop.f32.mrf.mxu3 }
 0x879   : > { %v4741_v38 = vadd.f32 %v4740_v14, %v4721_v15  ;;  %v4686_v29 = vpop.f32.mrf.mxu0  ;;  %v4705_v55 = vpop.f32.mrf.mxu1 }
 0x87a   : > { %v4706_v19 = vadd.f32 %v4705_v55, %v4686_v29 }
 0x87b   : > { %4751 = vst [vmem:[#allocation11 + $0x18] sm:$0xff] %v4741_v38 }
 0x87c   : > { %4752 = vst [vmem:[#allocation11 + $0x20] sm:$0xff] %v4706_v19 }
 0x880   : > { %v4724_v53 = vpop.f32.mrf.mxu2  ;;  %v4743_v50 = vpop.f32.mrf.mxu3 }
 0x881   : > { %v4744_v36 = vadd.f32 %v4743_v50, %v4724_v53  ;;  %v4688_v6 = vpop.f32.mrf.mxu0  ;;  %v4707_v62 = vpop.f32.mrf.mxu1 }
 0x882   : > { %v4708_v39 = vadd.f32 %v4707_v62, %v4688_v6 }
 0x883   : > { %4753 = vst [vmem:[#allocation11 + $0x28] sm:$0xff] %v4744_v36 }
 0x884   : > { %4754 = vst [vmem:[#allocation11 + $0x30] sm:$0xff] %v4708_v39 }
 0x888   : > { %v4726_v51 = vpop.f32.mrf.mxu2  ;;  %v4745_v23 = vpop.f32.mrf.mxu3 }
 0x889   : > { %v4746_v60 = vadd.f32 %v4745_v23, %v4726_v51 }
 0x88b   : > { %4755 = vst [vmem:[#allocation11 + $0x38] sm:$0xff] %v4746_v60 }
 0x88c PF: > { %p6746_p5 = scmp.eq.s32.totalorder %s7182_s25, 1  ;;  %s7095_s29 = smov [#allocation11]  }
 0x88d   : > { %s4761_s15 = sshll.u32 %s7095_s29, 4  ;;  %s9581_s20 = sld [smem:[#allocation32_spill]]  ;;  %s4762_s15 = int_to_ptr.vmem [resolvable:$true] %s4761_s15 }
 0x88e   : > { %s7096_s19 = smov 256   ;;  %s7097_s11 = smov 16  }
 0x893   : > { %s4763_s10 = sshll.u32 %s9581_s20, 4  ;;  %s4764_s10 = int_to_ptr.hbm [resolvable:$true] %s4763_s10 }
 0x894   : > { %6732 = dma.vmem_to_hbm [thread:$0]  (%p6746_p5), %s4762_s15, 1024, %s4764_s10, [#allocation7], %s7096_s19, %s7096_s19, %s7097_s11  }
 0x895   : > { %7066 = dma.done.wait (%p6746_p5), [#allocation7], 1024  }
 0x896   : > { %7068 = vsyncadd (%p6746_p5), [#allocation7], 4294966272 }
 0x897 PF: > { %s9582_s24 = sld [smem:[#allocation16_spill]]  ;;  %s9585_s21 = smov %s7075_s22 }
 0x898   : > { %s9583_s23 = sld [smem:[#allocation15_spill]] }
 0x899   : > { %s9584_s26 = sld [smem:[#allocation17_spill]] }
 0x89d   : > { %p26_p13 = scmp.ge.s32.totalorder %s9582_s24, 4  }
 0x89e   : > { %s9586_s22 = smov %s9583_s23 }
 0x89f   : > { %s9587_s23 = smov %s9584_s26  ;;  %28 = sbr.rel (!%p26_p13) target bundleno = 12 (0xc), region = 148 }
 0x8a4   :  { %4780 = vsyncpa [#allocation6], 1 }
 0x8a5   :  { %4782 = vsyncpa [#allocation6 + $0x1], 1 }
 0x8a6   :  { %4783 = vsyncpa [#allocation9], 1 }
 0x8a7   :  { %4785 = vsyncpa [#allocation9 + $0x1], 1 }
 0x8a8   :  { %4786 = vsyncpa [#allocation7], 1 }
 0x8a9   :  { %4788 = vsyncpa [#allocation7 + $0x1], 1 }

</bundles_post_ra>
